<compile_context>
chip_gen: v7x
topology: tpu7x:2x2x1
jax: 0.10.0
libtpu: 0.0.40
codegen_flags: <defaults>
</compile_context>

<pallas_src>
import functools
import math

import jax
import jax.numpy as jnp
from jax.experimental import pallas as pl
from jax.experimental.pallas import tpu as pltpu

BN_EPS = 1e-5
LANE = 128      # lane tile
BF16_SUB = 16   # bf16 sublane tile


def _ceil_to(x, m):
    return (x + m - 1) // m * m


def make_dims(n_stacks, n_input):
    dims = []
    for n_dim in n_input:
        d = [int(round(n_dim * 0.8)) for _ in range(n_stacks - 2)]
        d.append(1500)
        dims.append(d)
    return dims


# -----------------------------------------------------------------------------
# Static packing plan (pure Python ints; shared by packer, kernel and wrapper)
# -----------------------------------------------------------------------------
def build_plan(n_stacks, n_input, n_z, n_label):
    dims = make_dims(n_stacks, n_input)
    n_views = len(n_input)

    bias_order, sw_order, big_order = [], [], []
    bias_off, sw_off, sw_width, out_off = 0, 0, 0, 0
    views = []

    def add_bias(vi, kind, key, size):
        nonlocal bias_off
        off = bias_off
        bias_order.append((vi, kind, key, off, size))
        bias_off += _ceil_to(size, LANE)
        return off

    def add_sw(vi, kind, key, rows, cols):
        nonlocal sw_off, sw_width
        off = sw_off
        sw_order.append((vi, kind, key, off, rows, cols))
        sw_off += _ceil_to(rows, BF16_SUB)
        sw_width = max(sw_width, cols)
        return off

    def add_big(vi, kind, key):
        big_order.append((vi, kind, key))
        return len(big_order) - 1

    def add_out(size):
        nonlocal out_off
        off = out_off
        out_off += _ceil_to(size, LANE)
        return off

    for vi, n_dim in enumerate(n_input):
        d0, d1, d2 = dims[vi]
        v = {"n_dim": n_dim, "d0": d0, "d1": d1, "d2": d2}
        # encoder
        v["enc_w1"] = add_sw(vi, "enc", "w1", n_dim, d0)
        v["enc_b1"] = add_bias(vi, "enc", "b1", d0)
        v["enc_w2"] = add_sw(vi, "enc", "w2", d0, d1)
        v["enc_b2"] = add_bias(vi, "enc", "b2", d1)
        v["enc_w3"] = add_big(vi, "enc", "w3")          # (d1, 1500)  big
        v["enc_b3"] = add_bias(vi, "enc", "b3", d2)
        v["enc_wz"] = add_big(vi, "enc", "wz")          # (1500, n_z) big
        v["enc_bz"] = add_bias(vi, "enc", "bz", n_z)
        v["gamma"] = add_bias(vi, "enc", "gamma", n_z)
        v["beta"] = add_bias(vi, "enc", "beta", n_z)
        # decoder
        v["dec_w0"] = add_sw(vi, "dec", "w0", n_z, n_z)
        v["dec_b0"] = add_bias(vi, "dec", "b0", n_z)
        v["dec_w1"] = add_big(vi, "dec", "w1")          # (n_z, 1500) big
        v["dec_b1"] = add_bias(vi, "dec", "b1", d2)
        v["dec_w2"] = add_big(vi, "dec", "w2")          # (1500, d1)  big
        v["dec_b2"] = add_bias(vi, "dec", "b2", d1)
        v["dec_w3"] = add_sw(vi, "dec", "w3", d1, d0)
        v["dec_b3"] = add_bias(vi, "dec", "b3", d0)
        v["dec_wx"] = add_sw(vi, "dec", "wx", d0, n_dim)
        v["dec_bx"] = add_bias(vi, "dec", "bx", n_dim)
        views.append(v)

    wr_row = add_sw(-1, "root", "wr", n_z, n_label)
    br_off = add_bias(-1, "root", "br", n_label)

    # output layout: xbar_0..xbar_{V-1} | y | z | z_0..z_{V-1}, 128-aligned
    for v in views:
        v["out_xbar"] = add_out(v["n_dim"])
    out_y = add_out(n_label)
    out_z = add_out(n_z)
    for v in views:
        v["out_zi"] = add_out(n_z)

    return {
        "n_views": n_views, "n_z": n_z, "n_label": n_label, "views": views,
        "bias_order": bias_order, "sw_order": sw_order, "big_order": big_order,
        "bias_total": bias_off, "sw_rows": sw_off, "sw_width": sw_width,
        "wr_row": wr_row, "br_off": br_off,
        "out_y": out_y, "out_z": out_z, "out_total": out_off,
        "n_big": len(big_order),
    }


# -----------------------------------------------------------------------------
# One-time parameter packing (OUTSIDE the jitted per-call path)
# -----------------------------------------------------------------------------
def prepare_params(params, plan):
    def fetch(vi, kind, key):
        if kind == "enc":
            return params["encoders"][vi][key]
        if kind == "dec":
            return params["decoders"][vi][key]
        return params[key]  # root: wr / br

    # All tiny 1-D vectors -> one fp32 (1, bias_total) operand.
    bias_segs = []
    for vi, kind, key, off, size in plan["bias_order"]:
        vec = fetch(vi, kind, key).astype(jnp.float32).reshape(-1)
        bias_segs.append(jnp.pad(vec, (0, _ceil_to(size, LANE) - size)))
    bias_packed = jnp.concatenate(bias_segs).reshape(1, -1)

    # Small weight matrices -> one bf16 (sw_rows, sw_width) operand.
    W = plan["sw_width"]
    sw_segs = []
    for vi, kind, key, row_off, rows, cols in plan["sw_order"]:
        w = fetch(vi, kind, key).astype(jnp.bfloat16)
        sw_segs.append(jnp.pad(
            w, ((0, _ceil_to(rows, BF16_SUB) - rows), (0, W - cols))))
    sw_packed = jnp.concatenate(sw_segs, axis=0)

    # Big (1500-wide) matrices stay separate, bf16-cast once.
    big = tuple(fetch(vi, kind, key).astype(jnp.bfloat16)
                for vi, kind, key in plan["big_order"])

    return {"bias": bias_packed, "sw": sw_packed, "big": big}


# -----------------------------------------------------------------------------
# The single fused Pallas kernel: whole AE forward
# -----------------------------------------------------------------------------
def _ae_fused_kernel(plan, *refs):
    n_views = plan["n_views"]
    n_z = plan["n_z"]
    n_label = plan["n_label"]
    n_big = plan["n_big"]

    x_refs = refs[:n_views]                       # bf16 (B, n_dim_v)
    we_ref = refs[n_views]                        # f32  (B, n_views)
    bias_ref = refs[n_views + 1]                  # f32  (1, bias_total)
    sw_ref = refs[n_views + 2]                    # bf16 (sw_rows, sw_width)
    big_refs = refs[n_views + 3:n_views + 3 + n_big]
    out_ref = refs[n_views + 3 + n_big]           # f32  (B, out_total)

    def bvec(off, n):
        return bias_ref[:, off:off + n]

    def dense_small(x, row_off, fan_in, fan_out, b_off, relu=False):
        w = sw_ref[row_off:row_off + fan_in, :fan_out]
        y = jnp.dot(x.astype(jnp.bfloat16), w,
                    preferred_element_type=jnp.float32) + bvec(b_off, fan_out)
        return jnp.maximum(y, 0.0) if relu else y

    def dense_big(x, big_idx, fan_out, b_off, relu=False):
        y = jnp.dot(x.astype(jnp.bfloat16), big_refs[big_idx][...],
                    preferred_element_type=jnp.float32) + bvec(b_off, fan_out)
        return jnp.maximum(y, 0.0) if relu else y

    we = we_ref[...]

    # ---- encoders (+ fused training-mode BatchNorm1d) ----
    zs = []
    for vi in range(n_views):
        v = plan["views"][vi]
        x = x_refs[vi][...]
        h = dense_small(x, v["enc_w1"], v["n_dim"], v["d0"], v["enc_b1"], True)
        h = dense_small(h, v["enc_w2"], v["d0"], v["d1"], v["enc_b2"], True)
        h = dense_big(h, v["enc_w3"], v["d2"], v["enc_b3"], True)
        zl = dense_big(h, v["enc_wz"], n_z, v["enc_bz"])
        mean = jnp.mean(zl, axis=0, keepdims=True)
        var = jnp.mean(jnp.square(zl - mean), axis=0, keepdims=True)
        zi = ((zl - mean) * jax.lax.rsqrt(var + BN_EPS)
              * bvec(v["gamma"], n_z) + bvec(v["beta"], n_z))
        out_ref[:, v["out_zi"]:v["out_zi"] + n_z] = zi
        zs.append(zi)

    # ---- weighted view fusion (all in VMEM / vregs) ----
    summ = zs[0] * we[:, 0:1]
    for vi in range(1, n_views):
        summ = summ + zs[vi] * we[:, vi:vi + 1]
    wei = 1.0 / jnp.sum(we, axis=1, keepdims=True)
    z = wei * summ
    out_ref[:, plan["out_z"]:plan["out_z"] + n_z] = z

    # ---- decoders ----
    for vi in range(n_views):
        v = plan["views"][vi]
        h = dense_small(zs[vi], v["dec_w0"], n_z, n_z, v["dec_b0"], True)
        h = dense_big(h, v["dec_w1"], v["d2"], v["dec_b1"], True)
        h = dense_big(h, v["dec_w2"], v["d1"], v["dec_b2"], True)
        h = dense_small(h, v["dec_w3"], v["d1"], v["d0"], v["dec_b3"], True)
        xbar = dense_small(h, v["dec_wx"], v["d0"], v["n_dim"], v["dec_bx"])
        out_ref[:, v["out_xbar"]:v["out_xbar"] + v["n_dim"]] = xbar

    # ---- regression head on ReLU(z) ----
    y = dense_small(jnp.maximum(z, 0.0), plan["wr_row"], n_z, n_label,
                    plan["br_off"])
    out_ref[:, plan["out_y"]:plan["out_y"] + n_label] = y


# -----------------------------------------------------------------------------
# Forward wrapper (factory closes over the static plan)
# -----------------------------------------------------------------------------
def _matmul_flops(plan, B):
    total = 0
    nz = plan["n_z"]
    for v in plan["views"]:
        mm = (v["n_dim"] * v["d0"] + v["d0"] * v["d1"] + v["d1"] * v["d2"]
              + v["d2"] * nz + nz * nz + nz * v["d2"] + v["d2"] * v["d1"]
              + v["d1"] * v["d0"] + v["d0"] * v["n_dim"])
        total += 2 * B * mm
    total += 2 * B * nz * plan["n_label"]
    return total


def make_ae_forward(n_stacks, n_input, n_z, n_label):
    plan = build_plan(n_stacks, n_input, n_z, n_label)

    def forward(prepped, mul_X, we):
        B = mul_X[0].shape[0]
        inputs = [x.astype(jnp.bfloat16) for x in mul_X]
        inputs.append(we.astype(jnp.float32))
        inputs.append(prepped["bias"])
        inputs.append(prepped["sw"])
        inputs.extend(prepped["big"])

        bytes_accessed = int(sum(int(a.size) * a.dtype.itemsize for a in inputs)
                             + B * plan["out_total"] * 4)
        out = pl.pallas_call(
            functools.partial(_ae_fused_kernel, plan),
            out_shape=jax.ShapeDtypeStruct((B, plan["out_total"]), jnp.float32),
            compiler_params=pltpu.CompilerParams(
                vmem_limit_bytes=32 * 1024 * 1024),
            cost_estimate=pl.CostEstimate(
                flops=_matmul_flops(plan, B),
                transcendentals=0,
                bytes_accessed=bytes_accessed),
        )(*inputs)

        x_bar_list = [out[:, v["out_xbar"]:v["out_xbar"] + v["n_dim"]]
                      for v in plan["views"]]
        y_label = out[:, plan["out_y"]:plan["out_y"] + plan["n_label"]]
        z = out[:, plan["out_z"]:plan["out_z"] + plan["n_z"]]
        individual_zs = [out[:, v["out_zi"]:v["out_zi"] + plan["n_z"]]
                         for v in plan["views"]]
        return x_bar_list, y_label, z, individual_zs

    return forward, plan


# -----------------------------------------------------------------------------
# Parameter construction (deterministic, PyTorch-Linear-style uniform init)
# -----------------------------------------------------------------------------
def _init_linear(key, fan_in, fan_out):
    kw, kb = jax.random.split(key)
    bound = 1.0 / math.sqrt(fan_in)
    w = jax.random.uniform(kw, (fan_in, fan_out), jnp.float32, -bound, bound)
    b = jax.random.uniform(kb, (fan_out,), jnp.float32, -bound, bound)
    return w, b


def init_ae_params(key, n_stacks, n_input, n_z, n_label):
    dims = make_dims(n_stacks, n_input)
    params = {"encoders": [], "decoders": []}
    for i, n_dim in enumerate(n_input):
        d = dims[i]
        key, *ks = jax.random.split(key, 10)
        enc = {}
        enc["w1"], enc["b1"] = _init_linear(ks[0], n_dim, d[0])
        enc["w2"], enc["b2"] = _init_linear(ks[1], d[0], d[1])
        enc["w3"], enc["b3"] = _init_linear(ks[2], d[1], d[2])
        enc["wz"], enc["bz"] = _init_linear(ks[3], d[2], n_z)
        enc["gamma"] = jnp.ones((n_z,), jnp.float32)    # BatchNorm1d defaults
        enc["beta"] = jnp.zeros((n_z,), jnp.float32)
        params["encoders"].append(enc)

        dec = {}
        dec["w0"], dec["b0"] = _init_linear(ks[4], n_z, n_z)
        dec["w1"], dec["b1"] = _init_linear(ks[5], n_z, d[2])
        dec["w2"], dec["b2"] = _init_linear(ks[6], d[2], d[1])
        dec["w3"], dec["b3"] = _init_linear(ks[7], d[1], d[0])
        dec["wx"], dec["bx"] = _init_linear(ks[8], d[0], n_dim)
        params["decoders"].append(dec)

    key, kr = jax.random.split(key)
    params["wr"], params["br"] = _init_linear(kr, n_z, n_label)
    return params


# -----------------------------------------------------------------------------
# Pure-JAX reference using the SAME precision policy (bf16 inputs, fp32 acc)
# -----------------------------------------------------------------------------
def ae_forward_ref(params, mul_X, we, eps=BN_EPS):
    def dense(x, w, b, relu=False):
        y = jnp.dot(x.astype(jnp.bfloat16), w.astype(jnp.bfloat16),
                    preferred_element_type=jnp.float32) + b
        return jax.nn.relu(y) if relu else y

    individual_zs = []
    for i, enc in enumerate(params["encoders"]):
        h = dense(mul_X[i], enc["w1"], enc["b1"], relu=True)
        h = dense(h, enc["w2"], enc["b2"], relu=True)
        h = dense(h, enc["w3"], enc["b3"], relu=True)
        zl = dense(h, enc["wz"], enc["bz"])
        mean = jnp.mean(zl, axis=0, keepdims=True)
        var = jnp.mean(jnp.square(zl - mean), axis=0, keepdims=True)
        zi = (zl - mean) * jax.lax.rsqrt(var + eps) * enc["gamma"] + enc["beta"]
        individual_zs.append(zi)

    summ = individual_zs[0] * we[:, 0:1]
    for i in range(1, len(individual_zs)):
        summ = summ + individual_zs[i] * we[:, i:i + 1]
    wei = 1.0 / jnp.sum(we, axis=1, keepdims=True)
    z = wei * summ

    x_bar_list = []
    for i, dec in enumerate(params["decoders"]):
        h = dense(individual_zs[i], dec["w0"], dec["b0"], relu=True)
        h = dense(h, dec["w1"], dec["b1"], relu=True)
        h = dense(h, dec["w2"], dec["b2"], relu=True)
        h = dense(h, dec["w3"], dec["b3"], relu=True)
        x_bar_list.append(dense(h, dec["wx"], dec["bx"]))

    y_label = dense(jax.nn.relu(z), params["wr"], params["br"])
    return x_bar_list, y_label, z, individual_zs


# -----------------------------------------------------------------------------
if __name__ == "__main__":
    # AE.__init__ semantics: per-view dims = [round(0.8*n_dim)]*(n_stacks-2)+[1500]
    n_stacks = 4
    n_input = [64, 48]      # two views
    n_z = 32
    n_label = 16
    batch = 8

    key = jax.random.PRNGKey(0)
    key, kp, kx0, kx1, kw = jax.random.split(key, 5)
    params = init_ae_params(kp, n_stacks, n_input, n_z, n_label)

    forward, plan = make_ae_forward(n_stacks, n_input, n_z, n_label)
    # One-time bf16 cast + operand packing (NOT in the per-call jitted path).
    prepped = prepare_params(params, plan)
    prepped = jax.tree_util.tree_map(jnp.asarray, prepped)

    mul_X = [
        jax.random.normal(kx0, (batch, n_input[0]), jnp.float32),
        jax.random.normal(kx1, (batch, n_input[1]), jnp.float32),
    ]
    we = jax.random.uniform(kw, (batch, len(n_input)), jnp.float32, 0.5, 1.5)

    fwd = jax.jit(forward)
    x_bar_list, y_label, z, individual_zs = fwd(prepped, mul_X, we)
    jax.block_until_ready((x_bar_list, y_label, z, individual_zs))

    # Correctness check vs. pure-JAX reference (same bf16-in / fp32-acc policy).
    ref = ae_forward_ref(params, mul_X, we)
    flat_out = jax.tree_util.tree_leaves((x_bar_list, y_label, z, individual_zs))
    flat_ref = jax.tree_util.tree_leaves(ref)
    assert len(flat_out) == len(flat_ref)
    for a, b in zip(flat_out, flat_ref):
        assert a.shape == b.shape and a.dtype == b.dtype
        assert jnp.allclose(a, b, atol=2e-3, rtol=2e-3), float(
            jnp.max(jnp.abs(a - b)))

    print("KERNEL_OK")
</pallas_src>

<mosaic_0001>
module attributes {stable_mosaic.version = 11 : i64} {
  func.func @_ae_fused_kernel(%arg0: memref<8x64xbf16, #tpu.memory_space<vmem>>, %arg1: memref<8x48xbf16, #tpu.memory_space<vmem>>, %arg2: memref<8x2xf32, #tpu.memory_space<vmem>>, %arg3: memref<1x8576xf32, #tpu.memory_space<vmem>>, %arg4: memref<544x64xbf16, #tpu.memory_space<vmem>>, %arg5: memref<51x1500xbf16, #tpu.memory_space<vmem>>, %arg6: memref<1500x32xbf16, #tpu.memory_space<vmem>>, %arg7: memref<32x1500xbf16, #tpu.memory_space<vmem>>, %arg8: memref<1500x51xbf16, #tpu.memory_space<vmem>>, %arg9: memref<38x1500xbf16, #tpu.memory_space<vmem>>, %arg10: memref<1500x32xbf16, #tpu.memory_space<vmem>>, %arg11: memref<32x1500xbf16, #tpu.memory_space<vmem>>, %arg12: memref<1500x38xbf16, #tpu.memory_space<vmem>>, %arg13: memref<8x768xf32, #tpu.memory_space<vmem>>) attributes {dimension_semantics = [], scalar_prefetch = 0 : i64, scratch_operands = 0 : i64, tpu.core_type = #tpu.core_type<tc>} {
    %c0 = arith.constant 0 : index
    %c0_0 = arith.constant 0 : index
    %0 = vector.load %arg2[%c0, %c0_0] : memref<8x2xf32, #tpu.memory_space<vmem>>, vector<8x2xf32>
    %c0_1 = arith.constant 0 : index
    %c0_2 = arith.constant 0 : index
    %1 = vector.load %arg0[%c0_1, %c0_2] : memref<8x64xbf16, #tpu.memory_space<vmem>>, vector<8x64xbf16>
    %c0_3 = arith.constant 0 : index
    %c0_4 = arith.constant 0 : index
    %2 = vector.load %arg4[%c0_3, %c0_4] : memref<544x64xbf16, #tpu.memory_space<vmem>>, vector<64x51xbf16>
    %cst = arith.constant dense<0.000000e+00> : vector<8x51xf32>
    %3 = tpu.matmul %1, %2, %cst {dimension_numbers = #tpu.dot_dimension_numbers<[1], [0], [0], [1], [0, 0, 1, 1], [], []>} : vector<8x64xbf16>, vector<64x51xbf16>, vector<8x51xf32> -> vector<8x51xf32>
    %c0_5 = arith.constant 0 : index
    %c0_6 = arith.constant 0 : index
    %4 = vector.load %arg3[%c0_5, %c0_6] : memref<1x8576xf32, #tpu.memory_space<vmem>>, vector<1x51xf32>
    %5 = vector.broadcast %4 : vector<1x51xf32> to vector<8x51xf32>
    %6 = arith.addf %3, %5 : vector<8x51xf32>
    %cst_7 = arith.constant 0.000000e+00 : f32
    %7 = vector.broadcast %cst_7 : f32 to vector<8x51xf32>
    %8 = arith.maximumf %6, %7 : vector<8x51xf32>
    %c64 = arith.constant 64 : index
    %c0_8 = arith.constant 0 : index
    %9 = vector.load %arg4[%c64, %c0_8] : memref<544x64xbf16, #tpu.memory_space<vmem>>, vector<51x51xbf16>
    %10 = arith.truncf %8 : vector<8x51xf32> to vector<8x51xbf16>
    %cst_9 = arith.constant dense<0.000000e+00> : vector<8x51xf32>
    %11 = tpu.matmul %10, %9, %cst_9 {dimension_numbers = #tpu.dot_dimension_numbers<[1], [0], [0], [1], [0, 0, 1, 1], [], []>} : vector<8x51xbf16>, vector<51x51xbf16>, vector<8x51xf32> -> vector<8x51xf32>
    %c0_10 = arith.constant 0 : index
    %c128 = arith.constant 128 : index
    %12 = vector.load %arg3[%c0_10, %c128] : memref<1x8576xf32, #tpu.memory_space<vmem>>, vector<1x51xf32>
    %13 = vector.broadcast %12 : vector<1x51xf32> to vector<8x51xf32>
    %14 = arith.addf %11, %13 : vector<8x51xf32>
    %cst_11 = arith.constant 0.000000e+00 : f32
    %15 = vector.broadcast %cst_11 : f32 to vector<8x51xf32>
    %16 = arith.maximumf %14, %15 : vector<8x51xf32>
    %17 = arith.truncf %16 : vector<8x51xf32> to vector<8x51xbf16>
    %c0_12 = arith.constant 0 : index
    %c0_13 = arith.constant 0 : index
    %18 = vector.load %arg5[%c0_12, %c0_13] : memref<51x1500xbf16, #tpu.memory_space<vmem>>, vector<51x1500xbf16>
    %cst_14 = arith.constant dense<0.000000e+00> : vector<8x1500xf32>
    %19 = tpu.matmul %17, %18, %cst_14 {dimension_numbers = #tpu.dot_dimension_numbers<[1], [0], [0], [1], [0, 0, 1, 1], [], []>} : vector<8x51xbf16>, vector<51x1500xbf16>, vector<8x1500xf32> -> vector<8x1500xf32>
    %c0_15 = arith.constant 0 : index
    %c256 = arith.constant 256 : index
    %20 = vector.load %arg3[%c0_15, %c256] : memref<1x8576xf32, #tpu.memory_space<vmem>>, vector<1x1500xf32>
    %21 = vector.broadcast %20 : vector<1x1500xf32> to vector<8x1500xf32>
    %22 = arith.addf %19, %21 : vector<8x1500xf32>
    %cst_16 = arith.constant 0.000000e+00 : f32
    %23 = vector.broadcast %cst_16 : f32 to vector<8x1500xf32>
    %24 = arith.maximumf %22, %23 : vector<8x1500xf32>
    %25 = arith.truncf %24 : vector<8x1500xf32> to vector<8x1500xbf16>
    %c0_17 = arith.constant 0 : index
    %c0_18 = arith.constant 0 : index
    %26 = vector.load %arg6[%c0_17, %c0_18] : memref<1500x32xbf16, #tpu.memory_space<vmem>>, vector<1500x32xbf16>
    %cst_19 = arith.constant dense<0.000000e+00> : vector<8x32xf32>
    %27 = tpu.matmul %25, %26, %cst_19 {dimension_numbers = #tpu.dot_dimension_numbers<[1], [0], [0], [1], [0, 0, 1, 1], [], []>} : vector<8x1500xbf16>, vector<1500x32xbf16>, vector<8x32xf32> -> vector<8x32xf32>
    %c0_20 = arith.constant 0 : index
    %c1792 = arith.constant 1792 : index
    %28 = vector.load %arg3[%c0_20, %c1792] : memref<1x8576xf32, #tpu.memory_space<vmem>>, vector<1x32xf32>
    %29 = vector.broadcast %28 : vector<1x32xf32> to vector<8x32xf32>
    %30 = arith.addf %27, %29 : vector<8x32xf32>
    %cst_21 = arith.constant dense<0.000000e+00> : vector<32xf32>
    %31 = vector.multi_reduction <add>, %30, %cst_21 [0] : vector<8x32xf32> to vector<32xf32>
    %32 = vector.shape_cast %31 : vector<32xf32> to vector<1x32xf32>
    %cst_22 = arith.constant 8.000000e+00 : f32
    %33 = vector.broadcast %cst_22 : f32 to vector<1x32xf32>
    %34 = arith.divf %32, %33 : vector<1x32xf32>
    %35 = vector.broadcast %34 : vector<1x32xf32> to vector<8x32xf32>
    %36 = arith.subf %30, %35 : vector<8x32xf32>
    %37 = arith.mulf %36, %36 : vector<8x32xf32>
    %cst_23 = arith.constant dense<0.000000e+00> : vector<32xf32>
    %38 = vector.multi_reduction <add>, %37, %cst_23 [0] : vector<8x32xf32> to vector<32xf32>
    %39 = vector.shape_cast %38 : vector<32xf32> to vector<1x32xf32>
    %cst_24 = arith.constant 8.000000e+00 : f32
    %40 = vector.broadcast %cst_24 : f32 to vector<1x32xf32>
    %41 = arith.divf %39, %40 : vector<1x32xf32>
    %42 = vector.broadcast %34 : vector<1x32xf32> to vector<8x32xf32>
    %43 = arith.subf %30, %42 : vector<8x32xf32>
    %cst_25 = arith.constant 9.99999974E-6 : f32
    %44 = vector.broadcast %cst_25 : f32 to vector<1x32xf32>
    %45 = arith.addf %41, %44 : vector<1x32xf32>
    %46 = math.rsqrt %45 : vector<1x32xf32>
    %47 = vector.broadcast %46 : vector<1x32xf32> to vector<8x32xf32>
    %48 = arith.mulf %43, %47 : vector<8x32xf32>
    %c0_26 = arith.constant 0 : index
    %c1920 = arith.constant 1920 : index
    %49 = vector.load %arg3[%c0_26, %c1920] : memref<1x8576xf32, #tpu.memory_space<vmem>>, vector<1x32xf32>
    %50 = vector.broadcast %49 : vector<1x32xf32> to vector<8x32xf32>
    %51 = arith.mulf %48, %50 : vector<8x32xf32>
    %c0_27 = arith.constant 0 : index
    %c2048 = arith.constant 2048 : index
    %52 = vector.load %arg3[%c0_27, %c2048] : memref<1x8576xf32, #tpu.memory_space<vmem>>, vector<1x32xf32>
    %53 = vector.broadcast %52 : vector<1x32xf32> to vector<8x32xf32>
    %54 = arith.addf %51, %53 : vector<8x32xf32>
    %c0_28 = arith.constant 0 : index
    %c512 = arith.constant 512 : index
    %55 = vector.load %arg13[%c0_28, %c512] : memref<8x768xf32, #tpu.memory_space<vmem>>, vector<8x32xf32>
    tpu.vector_store %arg13[%c0_28, %c512], %54 {strides = array<i32>} : memref<8x768xf32, #tpu.memory_space<vmem>>, vector<8x32xf32>,
    %c0_29 = arith.constant 0 : index
    %c0_30 = arith.constant 0 : index
    %56 = vector.load %arg1[%c0_29, %c0_30] : memref<8x48xbf16, #tpu.memory_space<vmem>>, vector<8x48xbf16>
    %c288 = arith.constant 288 : index
    %c0_31 = arith.constant 0 : index
    %57 = vector.load %arg4[%c288, %c0_31] : memref<544x64xbf16, #tpu.memory_space<vmem>>, vector<48x38xbf16>
    %cst_32 = arith.constant dense<0.000000e+00> : vector<8x38xf32>
    %58 = tpu.matmul %56, %57, %cst_32 {dimension_numbers = #tpu.dot_dimension_numbers<[1], [0], [0], [1], [0, 0, 1, 1], [], []>} : vector<8x48xbf16>, vector<48x38xbf16>, vector<8x38xf32> -> vector<8x38xf32>
    %c0_33 = arith.constant 0 : index
    %c4224 = arith.constant 4224 : index
    %59 = vector.load %arg3[%c0_33, %c4224] : memref<1x8576xf32, #tpu.memory_space<vmem>>, vector<1x38xf32>
    %60 = vector.broadcast %59 : vector<1x38xf32> to vector<8x38xf32>
    %61 = arith.addf %58, %60 : vector<8x38xf32>
    %cst_34 = arith.constant 0.000000e+00 : f32
    %62 = vector.broadcast %cst_34 : f32 to vector<8x38xf32>
    %63 = arith.maximumf %61, %62 : vector<8x38xf32>
    %c336 = arith.constant 336 : index
    %c0_35 = arith.constant 0 : index
    %64 = vector.load %arg4[%c336, %c0_35] : memref<544x64xbf16, #tpu.memory_space<vmem>>, vector<38x38xbf16>
    %65 = arith.truncf %63 : vector<8x38xf32> to vector<8x38xbf16>
    %cst_36 = arith.constant dense<0.000000e+00> : vector<8x38xf32>
    %66 = tpu.matmul %65, %64, %cst_36 {dimension_numbers = #tpu.dot_dimension_numbers<[1], [0], [0], [1], [0, 0, 1, 1], [], []>} : vector<8x38xbf16>, vector<38x38xbf16>, vector<8x38xf32> -> vector<8x38xf32>
    %c0_37 = arith.constant 0 : index
    %c4352 = arith.constant 4352 : index
    %67 = vector.load %arg3[%c0_37, %c4352] : memref<1x8576xf32, #tpu.memory_space<vmem>>, vector<1x38xf32>
    %68 = vector.broadcast %67 : vector<1x38xf32> to vector<8x38xf32>
    %69 = arith.addf %66, %68 : vector<8x38xf32>
    %cst_38 = arith.constant 0.000000e+00 : f32
    %70 = vector.broadcast %cst_38 : f32 to vector<8x38xf32>
    %71 = arith.maximumf %69, %70 : vector<8x38xf32>
    %72 = arith.truncf %71 : vector<8x38xf32> to vector<8x38xbf16>
    %c0_39 = arith.constant 0 : index
    %c0_40 = arith.constant 0 : index
    %73 = vector.load %arg9[%c0_39, %c0_40] : memref<38x1500xbf16, #tpu.memory_space<vmem>>, vector<38x1500xbf16>
    %cst_41 = arith.constant dense<0.000000e+00> : vector<8x1500xf32>
    %74 = tpu.matmul %72, %73, %cst_41 {dimension_numbers = #tpu.dot_dimension_numbers<[1], [0], [0], [1], [0, 0, 1, 1], [], []>} : vector<8x38xbf16>, vector<38x1500xbf16>, vector<8x1500xf32> -> vector<8x1500xf32>
    %c0_42 = arith.constant 0 : index
    %c4480 = arith.constant 4480 : index
    %75 = vector.load %arg3[%c0_42, %c4480] : memref<1x8576xf32, #tpu.memory_space<vmem>>, vector<1x1500xf32>
    %76 = vector.broadcast %75 : vector<1x1500xf32> to vector<8x1500xf32>
    %77 = arith.addf %74, %76 : vector<8x1500xf32>
    %cst_43 = arith.constant 0.000000e+00 : f32
    %78 = vector.broadcast %cst_43 : f32 to vector<8x1500xf32>
    %79 = arith.maximumf %77, %78 : vector<8x1500xf32>
    %80 = arith.truncf %79 : vector<8x1500xf32> to vector<8x1500xbf16>
    %c0_44 = arith.constant 0 : index
    %c0_45 = arith.constant 0 : index
    %81 = vector.load %arg10[%c0_44, %c0_45] : memref<1500x32xbf16, #tpu.memory_space<vmem>>, vector<1500x32xbf16>
    %cst_46 = arith.constant dense<0.000000e+00> : vector<8x32xf32>
    %82 = tpu.matmul %80, %81, %cst_46 {dimension_numbers = #tpu.dot_dimension_numbers<[1], [0], [0], [1], [0, 0, 1, 1], [], []>} : vector<8x1500xbf16>, vector<1500x32xbf16>, vector<8x32xf32> -> vector<8x32xf32>
    %c0_47 = arith.constant 0 : index
    %c6016 = arith.constant 6016 : index
    %83 = vector.load %arg3[%c0_47, %c6016] : memref<1x8576xf32, #tpu.memory_space<vmem>>, vector<1x32xf32>
    %84 = vector.broadcast %83 : vector<1x32xf32> to vector<8x32xf32>
    %85 = arith.addf %82, %84 : vector<8x32xf32>
    %cst_48 = arith.constant dense<0.000000e+00> : vector<32xf32>
    %86 = vector.multi_reduction <add>, %85, %cst_48 [0] : vector<8x32xf32> to vector<32xf32>
    %87 = vector.shape_cast %86 : vector<32xf32> to vector<1x32xf32>
    %cst_49 = arith.constant 8.000000e+00 : f32
    %88 = vector.broadcast %cst_49 : f32 to vector<1x32xf32>
    %89 = arith.divf %87, %88 : vector<1x32xf32>
    %90 = vector.broadcast %89 : vector<1x32xf32> to vector<8x32xf32>
    %91 = arith.subf %85, %90 : vector<8x32xf32>
    %92 = arith.mulf %91, %91 : vector<8x32xf32>
    %cst_50 = arith.constant dense<0.000000e+00> : vector<32xf32>
    %93 = vector.multi_reduction <add>, %92, %cst_50 [0] : vector<8x32xf32> to vector<32xf32>
    %94 = vector.shape_cast %93 : vector<32xf32> to vector<1x32xf32>
    %cst_51 = arith.constant 8.000000e+00 : f32
    %95 = vector.broadcast %cst_51 : f32 to vector<1x32xf32>
    %96 = arith.divf %94, %95 : vector<1x32xf32>
    %97 = vector.broadcast %89 : vector<1x32xf32> to vector<8x32xf32>
    %98 = arith.subf %85, %97 : vector<8x32xf32>
    %cst_52 = arith.constant 9.99999974E-6 : f32
    %99 = vector.broadcast %cst_52 : f32 to vector<1x32xf32>
    %100 = arith.addf %96, %99 : vector<1x32xf32>
    %101 = math.rsqrt %100 : vector<1x32xf32>
    %102 = vector.broadcast %101 : vector<1x32xf32> to vector<8x32xf32>
    %103 = arith.mulf %98, %102 : vector<8x32xf32>
    %c0_53 = arith.constant 0 : index
    %c6144 = arith.constant 6144 : index
    %104 = vector.load %arg3[%c0_53, %c6144] : memref<1x8576xf32, #tpu.memory_space<vmem>>, vector<1x32xf32>
    %105 = vector.broadcast %104 : vector<1x32xf32> to vector<8x32xf32>
    %106 = arith.mulf %103, %105 : vector<8x32xf32>
    %c0_54 = arith.constant 0 : index
    %c6272 = arith.constant 6272 : index
    %107 = vector.load %arg3[%c0_54, %c6272] : memref<1x8576xf32, #tpu.memory_space<vmem>>, vector<1x32xf32>
    %108 = vector.broadcast %107 : vector<1x32xf32> to vector<8x32xf32>
    %109 = arith.addf %106, %108 : vector<8x32xf32>
    %c0_55 = arith.constant 0 : index
    %c640 = arith.constant 640 : index
    %110 = vector.load %arg13[%c0_55, %c640] : memref<8x768xf32, #tpu.memory_space<vmem>>, vector<8x32xf32>
    tpu.vector_store %arg13[%c0_55, %c640], %109 {strides = array<i32>} : memref<8x768xf32, #tpu.memory_space<vmem>>, vector<8x32xf32>,
    %111 = vector.extract_strided_slice %0 {offsets = [0, 0], sizes = [8, 1], strides = [1, 1]} : vector<8x2xf32> to vector<8x1xf32>
    %112 = vector.broadcast %111 : vector<8x1xf32> to vector<8x32xf32>
    %113 = arith.mulf %54, %112 : vector<8x32xf32>
    %114 = vector.extract_strided_slice %0 {offsets = [0, 1], sizes = [8, 1], strides = [1, 1]} : vector<8x2xf32> to vector<8x1xf32>
    %115 = vector.broadcast %114 : vector<8x1xf32> to vector<8x32xf32>
    %116 = arith.mulf %109, %115 : vector<8x32xf32>
    %117 = arith.addf %113, %116 : vector<8x32xf32>
    %cst_56 = arith.constant dense<0.000000e+00> : vector<8xf32>
    %118 = vector.multi_reduction <add>, %0, %cst_56 [1] : vector<8x2xf32> to vector<8xf32>
    %119 = vector.shape_cast %118 : vector<8xf32> to vector<8x1xf32>
    %cst_57 = arith.constant 1.000000e+00 : f32
    %120 = vector.broadcast %cst_57 : f32 to vector<8x1xf32>
    %121 = arith.divf %120, %119 : vector<8x1xf32>
    %122 = vector.broadcast %121 : vector<8x1xf32> to vector<8x32xf32>
    %123 = arith.mulf %122, %117 : vector<8x32xf32>
    %c0_58 = arith.constant 0 : index
    %c384 = arith.constant 384 : index
    %124 = vector.load %arg13[%c0_58, %c384] : memref<8x768xf32, #tpu.memory_space<vmem>>, vector<8x32xf32>
    tpu.vector_store %arg13[%c0_58, %c384], %123 {strides = array<i32>} : memref<8x768xf32, #tpu.memory_space<vmem>>, vector<8x32xf32>,
    %c128_59 = arith.constant 128 : index
    %c0_60 = arith.constant 0 : index
    %125 = vector.load %arg4[%c128_59, %c0_60] : memref<544x64xbf16, #tpu.memory_space<vmem>>, vector<32x32xbf16>
    %126 = arith.truncf %54 : vector<8x32xf32> to vector<8x32xbf16>
    %cst_61 = arith.constant dense<0.000000e+00> : vector<8x32xf32>
    %127 = tpu.matmul %126, %125, %cst_61 {dimension_numbers = #tpu.dot_dimension_numbers<[1], [0], [0], [1], [0, 0, 1, 1], [], []>} : vector<8x32xbf16>, vector<32x32xbf16>, vector<8x32xf32> -> vector<8x32xf32>
    %c0_62 = arith.constant 0 : index
    %c2176 = arith.constant 2176 : index
    %128 = vector.load %arg3[%c0_62, %c2176] : memref<1x8576xf32, #tpu.memory_space<vmem>>, vector<1x32xf32>
    %129 = vector.broadcast %128 : vector<1x32xf32> to vector<8x32xf32>
    %130 = arith.addf %127, %129 : vector<8x32xf32>
    %cst_63 = arith.constant 0.000000e+00 : f32
    %131 = vector.broadcast %cst_63 : f32 to vector<8x32xf32>
    %132 = arith.maximumf %130, %131 : vector<8x32xf32>
    %133 = arith.truncf %132 : vector<8x32xf32> to vector<8x32xbf16>
    %c0_64 = arith.constant 0 : index
    %c0_65 = arith.constant 0 : index
    %134 = vector.load %arg7[%c0_64, %c0_65] : memref<32x1500xbf16, #tpu.memory_space<vmem>>, vector<32x1500xbf16>
    %cst_66 = arith.constant dense<0.000000e+00> : vector<8x1500xf32>
    %135 = tpu.matmul %133, %134, %cst_66 {dimension_numbers = #tpu.dot_dimension_numbers<[1], [0], [0], [1], [0, 0, 1, 1], [], []>} : vector<8x32xbf16>, vector<32x1500xbf16>, vector<8x1500xf32> -> vector<8x1500xf32>
    %c0_67 = arith.constant 0 : index
    %c2304 = arith.constant 2304 : index
    %136 = vector.load %arg3[%c0_67, %c2304] : memref<1x8576xf32, #tpu.memory_space<vmem>>, vector<1x1500xf32>
    %137 = vector.broadcast %136 : vector<1x1500xf32> to vector<8x1500xf32>
    %138 = arith.addf %135, %137 : vector<8x1500xf32>
    %cst_68 = arith.constant 0.000000e+00 : f32
    %139 = vector.broadcast %cst_68 : f32 to vector<8x1500xf32>
    %140 = arith.maximumf %138, %139 : vector<8x1500xf32>
    %141 = arith.truncf %140 : vector<8x1500xf32> to vector<8x1500xbf16>
    %c0_69 = arith.constant 0 : index
    %c0_70 = arith.constant 0 : index
    %142 = vector.load %arg8[%c0_69, %c0_70] : memref<1500x51xbf16, #tpu.memory_space<vmem>>, vector<1500x51xbf16>
    %cst_71 = arith.constant dense<0.000000e+00> : vector<8x51xf32>
    %143 = tpu.matmul %141, %142, %cst_71 {dimension_numbers = #tpu.dot_dimension_numbers<[1], [0], [0], [1], [0, 0, 1, 1], [], []>} : vector<8x1500xbf16>, vector<1500x51xbf16>, vector<8x51xf32> -> vector<8x51xf32>
    %c0_72 = arith.constant 0 : index
    %c3840 = arith.constant 3840 : index
    %144 = vector.load %arg3[%c0_72, %c3840] : memref<1x8576xf32, #tpu.memory_space<vmem>>, vector<1x51xf32>
    %145 = vector.broadcast %144 : vector<1x51xf32> to vector<8x51xf32>
    %146 = arith.addf %143, %145 : vector<8x51xf32>
    %cst_73 = arith.constant 0.000000e+00 : f32
    %147 = vector.broadcast %cst_73 : f32 to vector<8x51xf32>
    %148 = arith.maximumf %146, %147 : vector<8x51xf32>
    %c160 = arith.constant 160 : index
    %c0_74 = arith.constant 0 : index
    %149 = vector.load %arg4[%c160, %c0_74] : memref<544x64xbf16, #tpu.memory_space<vmem>>, vector<51x51xbf16>
    %150 = arith.truncf %148 : vector<8x51xf32> to vector<8x51xbf16>
    %cst_75 = arith.constant dense<0.000000e+00> : vector<8x51xf32>
    %151 = tpu.matmul %150, %149, %cst_75 {dimension_numbers = #tpu.dot_dimension_numbers<[1], [0], [0], [1], [0, 0, 1, 1], [], []>} : vector<8x51xbf16>, vector<51x51xbf16>, vector<8x51xf32> -> vector<8x51xf32>
    %c0_76 = arith.constant 0 : index
    %c3968 = arith.constant 3968 : index
    %152 = vector.load %arg3[%c0_76, %c3968] : memref<1x8576xf32, #tpu.memory_space<vmem>>, vector<1x51xf32>
    %153 = vector.broadcast %152 : vector<1x51xf32> to vector<8x51xf32>
    %154 = arith.addf %151, %153 : vector<8x51xf32>
    %cst_77 = arith.constant 0.000000e+00 : f32
    %155 = vector.broadcast %cst_77 : f32 to vector<8x51xf32>
    %156 = arith.maximumf %154, %155 : vector<8x51xf32>
    %c224 = arith.constant 224 : index
    %c0_78 = arith.constant 0 : index
    %157 = vector.load %arg4[%c224, %c0_78] : memref<544x64xbf16, #tpu.memory_space<vmem>>, vector<51x64xbf16>
    %158 = arith.truncf %156 : vector<8x51xf32> to vector<8x51xbf16>
    %cst_79 = arith.constant dense<0.000000e+00> : vector<8x64xf32>
    %159 = tpu.matmul %158, %157, %cst_79 {dimension_numbers = #tpu.dot_dimension_numbers<[1], [0], [0], [1], [0, 0, 1, 1], [], []>} : vector<8x51xbf16>, vector<51x64xbf16>, vector<8x64xf32> -> vector<8x64xf32>
    %c0_80 = arith.constant 0 : index
    %c4096 = arith.constant 4096 : index
    %160 = vector.load %arg3[%c0_80, %c4096] : memref<1x8576xf32, #tpu.memory_space<vmem>>, vector<1x64xf32>
    %161 = vector.broadcast %160 : vector<1x64xf32> to vector<8x64xf32>
    %162 = arith.addf %159, %161 : vector<8x64xf32>
    %c0_81 = arith.constant 0 : index
    %c0_82 = arith.constant 0 : index
    %163 = vector.load %arg13[%c0_81, %c0_82] : memref<8x768xf32, #tpu.memory_space<vmem>>, vector<8x64xf32>
    tpu.vector_store %arg13[%c0_81, %c0_82], %162 {strides = array<i32>} : memref<8x768xf32, #tpu.memory_space<vmem>>, vector<8x64xf32>,
    %c384_83 = arith.constant 384 : index
    %c0_84 = arith.constant 0 : index
    %164 = vector.load %arg4[%c384_83, %c0_84] : memref<544x64xbf16, #tpu.memory_space<vmem>>, vector<32x32xbf16>
    %165 = arith.truncf %109 : vector<8x32xf32> to vector<8x32xbf16>
    %cst_85 = arith.constant dense<0.000000e+00> : vector<8x32xf32>
    %166 = tpu.matmul %165, %164, %cst_85 {dimension_numbers = #tpu.dot_dimension_numbers<[1], [0], [0], [1], [0, 0, 1, 1], [], []>} : vector<8x32xbf16>, vector<32x32xbf16>, vector<8x32xf32> -> vector<8x32xf32>
    %c0_86 = arith.constant 0 : index
    %c6400 = arith.constant 6400 : index
    %167 = vector.load %arg3[%c0_86, %c6400] : memref<1x8576xf32, #tpu.memory_space<vmem>>, vector<1x32xf32>
    %168 = vector.broadcast %167 : vector<1x32xf32> to vector<8x32xf32>
    %169 = arith.addf %166, %168 : vector<8x32xf32>
    %cst_87 = arith.constant 0.000000e+00 : f32
    %170 = vector.broadcast %cst_87 : f32 to vector<8x32xf32>
    %171 = arith.maximumf %169, %170 : vector<8x32xf32>
    %172 = arith.truncf %171 : vector<8x32xf32> to vector<8x32xbf16>
    %c0_88 = arith.constant 0 : index
    %c0_89 = arith.constant 0 : index
    %173 = vector.load %arg11[%c0_88, %c0_89] : memref<32x1500xbf16, #tpu.memory_space<vmem>>, vector<32x1500xbf16>
    %cst_90 = arith.constant dense<0.000000e+00> : vector<8x1500xf32>
    %174 = tpu.matmul %172, %173, %cst_90 {dimension_numbers = #tpu.dot_dimension_numbers<[1], [0], [0], [1], [0, 0, 1, 1], [], []>} : vector<8x32xbf16>, vector<32x1500xbf16>, vector<8x1500xf32> -> vector<8x1500xf32>
    %c0_91 = arith.constant 0 : index
    %c6528 = arith.constant 6528 : index
    %175 = vector.load %arg3[%c0_91, %c6528] : memref<1x8576xf32, #tpu.memory_space<vmem>>, vector<1x1500xf32>
    %176 = vector.broadcast %175 : vector<1x1500xf32> to vector<8x1500xf32>
    %177 = arith.addf %174, %176 : vector<8x1500xf32>
    %cst_92 = arith.constant 0.000000e+00 : f32
    %178 = vector.broadcast %cst_92 : f32 to vector<8x1500xf32>
    %179 = arith.maximumf %177, %178 : vector<8x1500xf32>
    %180 = arith.truncf %179 : vector<8x1500xf32> to vector<8x1500xbf16>
    %c0_93 = arith.constant 0 : index
    %c0_94 = arith.constant 0 : index
    %181 = vector.load %arg12[%c0_93, %c0_94] : memref<1500x38xbf16, #tpu.memory_space<vmem>>, vector<1500x38xbf16>
    %cst_95 = arith.constant dense<0.000000e+00> : vector<8x38xf32>
    %182 = tpu.matmul %180, %181, %cst_95 {dimension_numbers = #tpu.dot_dimension_numbers<[1], [0], [0], [1], [0, 0, 1, 1], [], []>} : vector<8x1500xbf16>, vector<1500x38xbf16>, vector<8x38xf32> -> vector<8x38xf32>
    %c0_96 = arith.constant 0 : index
    %c8064 = arith.constant 8064 : index
    %183 = vector.load %arg3[%c0_96, %c8064] : memref<1x8576xf32, #tpu.memory_space<vmem>>, vector<1x38xf32>
    %184 = vector.broadcast %183 : vector<1x38xf32> to vector<8x38xf32>
    %185 = arith.addf %182, %184 : vector<8x38xf32>
    %cst_97 = arith.constant 0.000000e+00 : f32
    %186 = vector.broadcast %cst_97 : f32 to vector<8x38xf32>
    %187 = arith.maximumf %185, %186 : vector<8x38xf32>
    %c416 = arith.constant 416 : index
    %c0_98 = arith.constant 0 : index
    %188 = vector.load %arg4[%c416, %c0_98] : memref<544x64xbf16, #tpu.memory_space<vmem>>, vector<38x38xbf16>
    %189 = arith.truncf %187 : vector<8x38xf32> to vector<8x38xbf16>
    %cst_99 = arith.constant dense<0.000000e+00> : vector<8x38xf32>
    %190 = tpu.matmul %189, %188, %cst_99 {dimension_numbers = #tpu.dot_dimension_numbers<[1], [0], [0], [1], [0, 0, 1, 1], [], []>} : vector<8x38xbf16>, vector<38x38xbf16>, vector<8x38xf32> -> vector<8x38xf32>
    %c0_100 = arith.constant 0 : index
    %c8192 = arith.constant 8192 : index
    %191 = vector.load %arg3[%c0_100, %c8192] : memref<1x8576xf32, #tpu.memory_space<vmem>>, vector<1x38xf32>
    %192 = vector.broadcast %191 : vector<1x38xf32> to vector<8x38xf32>
    %193 = arith.addf %190, %192 : vector<8x38xf32>
    %cst_101 = arith.constant 0.000000e+00 : f32
    %194 = vector.broadcast %cst_101 : f32 to vector<8x38xf32>
    %195 = arith.maximumf %193, %194 : vector<8x38xf32>
    %c464 = arith.constant 464 : index
    %c0_102 = arith.constant 0 : index
    %196 = vector.load %arg4[%c464, %c0_102] : memref<544x64xbf16, #tpu.memory_space<vmem>>, vector<38x48xbf16>
    %197 = arith.truncf %195 : vector<8x38xf32> to vector<8x38xbf16>
    %cst_103 = arith.constant dense<0.000000e+00> : vector<8x48xf32>
    %198 = tpu.matmul %197, %196, %cst_103 {dimension_numbers = #tpu.dot_dimension_numbers<[1], [0], [0], [1], [0, 0, 1, 1], [], []>} : vector<8x38xbf16>, vector<38x48xbf16>, vector<8x48xf32> -> vector<8x48xf32>
    %c0_104 = arith.constant 0 : index
    %c8320 = arith.constant 8320 : index
    %199 = vector.load %arg3[%c0_104, %c8320] : memref<1x8576xf32, #tpu.memory_space<vmem>>, vector<1x48xf32>
    %200 = vector.broadcast %199 : vector<1x48xf32> to vector<8x48xf32>
    %201 = arith.addf %198, %200 : vector<8x48xf32>
    %c0_105 = arith.constant 0 : index
    %c128_106 = arith.constant 128 : index
    %202 = vector.load %arg13[%c0_105, %c128_106] : memref<8x768xf32, #tpu.memory_space<vmem>>, vector<8x48xf32>
    tpu.vector_store %arg13[%c0_105, %c128_106], %201 {strides = array<i32>} : memref<8x768xf32, #tpu.memory_space<vmem>>, vector<8x48xf32>,
    %cst_107 = arith.constant 0.000000e+00 : f32
    %203 = vector.broadcast %cst_107 : f32 to vector<8x32xf32>
    %204 = arith.maximumf %123, %203 : vector<8x32xf32>
    %c512_108 = arith.constant 512 : index
    %c0_109 = arith.constant 0 : index
    %205 = vector.load %arg4[%c512_108, %c0_109] : memref<544x64xbf16, #tpu.memory_space<vmem>>, vector<32x16xbf16>
    %206 = arith.truncf %204 : vector<8x32xf32> to vector<8x32xbf16>
    %cst_110 = arith.constant dense<0.000000e+00> : vector<8x16xf32>
    %207 = tpu.matmul %206, %205, %cst_110 {dimension_numbers = #tpu.dot_dimension_numbers<[1], [0], [0], [1], [0, 0, 1, 1], [], []>} : vector<8x32xbf16>, vector<32x16xbf16>, vector<8x16xf32> -> vector<8x16xf32>
    %c0_111 = arith.constant 0 : index
    %c8448 = arith.constant 8448 : index
    %208 = vector.load %arg3[%c0_111, %c8448] : memref<1x8576xf32, #tpu.memory_space<vmem>>, vector<1x16xf32>
    %209 = vector.broadcast %208 : vector<1x16xf32> to vector<8x16xf32>
    %210 = arith.addf %207, %209 : vector<8x16xf32>
    %c0_112 = arith.constant 0 : index
    %c256_113 = arith.constant 256 : index
    %211 = vector.load %arg13[%c0_112, %c256_113] : memref<8x768xf32, #tpu.memory_space<vmem>>, vector<8x16xf32>
    tpu.vector_store %arg13[%c0_112, %c256_113], %210 {strides = array<i32>} : memref<8x768xf32, #tpu.memory_space<vmem>>, vector<8x16xf32>,
    return
  }
}

</mosaic_0001>

<bundles_post_ra>
// kernel: forward.1
= control target key start
LH: loop header
LB: loop body
LE: loop exit
PB: predicated region body
PF: predicated region fallthrough
CT: control target
= control target key end

     0   :  { %v8975_v0 = vmov 0.0   ;;  %vm8976_vm0 = vmmov 0   ;;  %vm86_vm1 = vcmask 523264   ;;  %vm171_vm2 = vcmask 1040384   ;;  %s11203_s4 = inlined_call_operand.vmem [shape: bf16[544,64], index: 4, kind: input, shape index: {}]   ;;  %s11204_s0 = inlined_call_operand.vmem [shape: bf16[8,64], index: 0, kind: input, shape index: {}]   ;;  %s11205_s5 = inlined_call_operand.vmem [shape: bf16[51,1500], index: 5, kind: input, shape index: {}]   ;;  %s11206_s3 = inlined_call_operand.vmem [shape: f32[1,8576], index: 3, kind: input, shape index: {}]   ;;  %s11207_s6 = inlined_call_operand.vmem [shape: bf16[1500,32], index: 6, kind: input, shape index: {}]   ;;  %s11208_s2 = inlined_call_operand.vmem [shape: f32[8,2], index: 2, kind: input, shape index: {}]   ;;  %s11209_s1 = inlined_call_operand.vmem [shape: bf16[8,48], index: 1, kind: input, shape index: {}]   ;;  %s11210_s9 = inlined_call_operand.vmem [shape: bf16[38,1500], index: 9, kind: input, shape index: {}]   ;;  %s11211_s13 = inlined_call_operand.vmem [shape: f32[8,768], index: 13, kind: output, shape index: {}]   ;;  %s11212_s10 = inlined_call_operand.vmem [shape: bf16[1500,32], index: 10, kind: input, shape index: {}]   ;;  %s11213_s7 = inlined_call_operand.vmem [shape: bf16[32,1500], index: 7, kind: input, shape index: {}]   ;;  %s11214_s8 = inlined_call_operand.vmem [shape: bf16[1500,51], index: 8, kind: input, shape index: {}]   ;;  %s11215_s11 = inlined_call_operand.vmem [shape: bf16[32,1500], index: 11, kind: input, shape index: {}]   ;;  %s11216_s12 = inlined_call_operand.vmem [shape: bf16[1500,38], index: 12, kind: input, shape index: {}]  }
   0x1   :  { %8252 = vmatprep.subr.bf16.mxu0 %v8975_v0  ;;  %v8372_v1 = vld [vmem:[%s11203_s4] sm:$0xff]   ;;  %8260 = vmatprep.mubr.msk.bf16.mxu0 %vm8976_vm0, %v8975_v0  ;;  %v8373_v2 = vld [vmem:[%s11203_s4 + $0x8] sm:$0xff]   ;;  %v8374_v4 = vld [vmem:[%s11203_s4 + $0x10] sm:$0xff]   ;;  %vm172_vm3 = vcmask 1041408   ;;  %v8977_v10 = vmov 65535   ;;  %vm167_vm4 = vcmask 416768  }
   0x2   :  { %8264 = vmatprep.subr.bf16.mxu1 %v8975_v0  ;;  %8272 = vmatprep.mubr.msk.bf16.mxu1 %vm8976_vm0, %v8975_v0  ;;  %v8376_v3 = vld [vmem:[%s11203_s4 + $0x20] sm:$0xff]   ;;  %v8377_v5 = vld [vmem:[%s11203_s4 + $0x28] sm:$0xff]   ;;  %v8375_v6 = vld [vmem:[%s11203_s4 + $0x18] sm:$0xff]   ;;  %v173_v11 = vsel %vm171_vm2, 4294967295, %v8977_v10  ;;  %v8978_v46 = vmov 0   ;;  %vm3653_vm5 = vcmask 15360  }
   0x3   :  { %8253 = vmatpush3.bf16.msra.mxu0 %v8372_v1  ;;  %8265 = vmatpush3.bf16.msra.mxu1 %v8376_v3  ;;  %v46_v7 = vld [vmem:[%s11204_s0] sm:$0xf]  ;;  %v8378_v8 = vld [vmem:[%s11203_s4 + $0x30] sm:$0xff]   ;;  %v8379_v9 = vld [vmem:[%s11203_s4 + $0x38] ss:$0 sps:$4 sm:$0x33]  }
   0x4   :  { %8254 = vmatprep.subr.bf16.mxu0 %v8975_v0  ;;  %8266 = vmatprep.subr.bf16.mxu1 %v8975_v0  ;;  %v9090_v12 = vsel %vm172_vm3, %v173_v11, 0  ;;  %v8380_v14 = vld [vmem:[%s11205_s5] ss:$48 sps:$4 sm:$0xff]   ;;  %v8382_v15 = vld [vmem:[%s11205_s5 + $0x4] ss:$48 sps:$4 sm:$0xff]   ;;  %vm1603_vm6 = vcmask 752640  }
   0x5   :  { %v176_v13 = vand.u32 %v8379_v9, %v9090_v12  ;;  %v8385_v16 = vld [vmem:[%s11205_s5 + $0xc] ss:$48 sps:$4 sm:$0xff]   ;;  %v8388_v17 = vld [vmem:[%s11205_s5 + $0x64] ss:$48 sps:$4 sm:$0xff]   ;;  %v8386_v18 = vld [vmem:[%s11205_s5 + $0x60] ss:$48 sps:$4 sm:$0xff]   ;;  %8369 = vset.pattern.permute.xlu0 %v8978_v46 }
   0x6   :  { %v8394_v19 = vld [vmem:[%s11205_s5 + $0xc4] ss:$48 sps:$4 sm:$0xff]   ;;  %v8392_v20 = vld [vmem:[%s11205_s5 + $0xc0] ss:$48 sps:$4 sm:$0xff]   ;;  %v8383_v28 = vld [vmem:[%s11205_s5 + $0x8] ss:$48 sps:$4 sm:$0xff]  }
   0x7   :  { %8255 = vmatpush3.bf16.msra.mxu0 %v8373_v2  ;;  %8267 = vmatpush3.bf16.msra.mxu1 %v8377_v5  ;;  %v7161_v21 = vld [vmem:[%s11206_s3] ss:$0 sm:$0xff]  ;;  %v8391_v30 = vld [vmem:[%s11205_s5 + $0x6c] ss:$48 sps:$4 sm:$0xff]   ;;  %v8389_v31 = vld [vmem:[%s11205_s5 + $0x68] ss:$48 sps:$4 sm:$0xff]  }
   0x8   :  { %8256 = vmatprep.subr.bf16.mxu0 %v8975_v0  ;;  %8268 = vmatprep.subr.bf16.mxu1 %v8975_v0  ;;  %v8397_v32 = vld [vmem:[%s11205_s5 + $0xcc] ss:$48 sps:$4 sm:$0xff]   ;;  %v8395_v33 = vld [vmem:[%s11205_s5 + $0xc8] ss:$48 sps:$4 sm:$0xff]   ;;  %v256_v34 = vld [vmem:[%s11205_s5 + $0x120] sm:$0x33] }
   0x9   :  { %v257_v35 = vld [vmem:[%s11205_s5 + $0x128] sm:$0x33]  ;;  %v7210_v36 = vcombine.high %v256_v34, %v256_v34  ;;  %v7209_v38 = vcombine.low %v256_v34, %v256_v34  ;;  %v8404_v44 = vld [vmem:[%s11205_s5 + $0x14] ss:$48 sps:$4 sm:$0xff]   ;;  %v7167_v47 = vld [vmem:[%s11206_s3 + $0x1] ss:$0 sm:$0xff] }
   0xa   :  { %v7212_v37 = vcombine.high %v257_v35, %v257_v35  ;;  %v7211_v39 = vcombine.low %v257_v35, %v257_v35  ;;  %v8407_v45 = vld [vmem:[%s11205_s5 + $0x1c] ss:$48 sps:$4 sm:$0xff]   ;;  %v8402_v54 = vld [vmem:[%s11205_s5 + $0x10] ss:$48 sps:$4 sm:$0xff]   ;;  %v8405_v55 = vld [vmem:[%s11205_s5 + $0x18] ss:$48 sps:$4 sm:$0xff]  }
   0xb   :  { %8257 = vmatpush3.bf16.msra.mxu0 %v8374_v4  ;;  %8269 = vmatpush3.bf16.msra.mxu1 %v8378_v8  ;;  %v543_v40 = vand.u32 %v7210_v36, %v9090_v12  ;;  %v540_v42 = vand.u32 %v7209_v38, %v9090_v12  ;;  %v8410_v57 = vld [vmem:[%s11205_s5 + $0x74] ss:$48 sps:$4 sm:$0xff]   ;;  %v8413_v58 = vld [vmem:[%s11205_s5 + $0x7c] ss:$48 sps:$4 sm:$0xff]   ;;  %v8408_v61 = vld [vmem:[%s11205_s5 + $0x70] ss:$48 sps:$4 sm:$0xff]  }
   0xc   :  { %8258 = vmatprep.subr.bf16.mxu0 %v8975_v0  ;;  %8270 = vmatprep.subr.bf16.mxu1 %v8975_v0  ;;  %v549_v41 = vand.u32 %v7212_v37, %v9090_v12  ;;  %v546_v43 = vand.u32 %v7211_v39, %v9090_v12  ;;  %v258_v59 = vld [vmem:[%s11205_s5 + $0x130] sm:$0x33]  ;;  %v259_v60 = vld [vmem:[%s11205_s5 + $0x138] sm:$0x33]  ;;  %v8446_v35 = vld [vmem:[%s11207_s6 + $0x40] sm:$0xff]   ;;  %vm1923_vm7 = vcmask 392192  }
   0xd   :  { %v8411_v62 = vld [vmem:[%s11205_s5 + $0x78] ss:$48 sps:$4 sm:$0xff]   ;;  %v8416_v63 = vld [vmem:[%s11205_s5 + $0xd4] ss:$48 sps:$4 sm:$0xff]   ;;  %v8419_v1 = vld [vmem:[%s11205_s5 + $0xdc] ss:$48 sps:$4 sm:$0xff]   ;;  %v7214_v2 = vcombine.high %v258_v59, %v258_v59  ;;  %v7216_v3 = vcombine.high %v259_v60, %v259_v60 }
   0xe   :  { %v8414_v4 = vld [vmem:[%s11205_s5 + $0xd0] ss:$48 sps:$4 sm:$0xff]   ;;  %v8417_v5 = vld [vmem:[%s11205_s5 + $0xd8] ss:$48 sps:$4 sm:$0xff]   ;;  %vm1607_vm8 = vcmask 1045504   ;;  %vm2000_vm9 = vcmask 1042432  }
   0xf   :  { %8259 = vmatpush3.bf16.msra.mxu0 %v8375_v6  ;;  %8271 = vmatpush3.bf16.msra.mxu1 %v176_v13  ;;  %v7213_v6 = vcombine.low %v258_v59, %v258_v59  ;;  %v555_v8 = vand.u32 %v7214_v2, %v9090_v12  ;;  %v561_v9 = vand.u32 %v7216_v3, %v9090_v12  ;;  %v8426_v13 = vld [vmem:[%s11205_s5 + $0x24] ss:$48 sps:$4 sm:$0xff]   ;;  %v8450_v39 = vld [vmem:[%s11207_s6 + $0x48] sm:$0xff]   ;;  %v8475_v2 = vld [vmem:[%s11207_s6 + $0xf8] sm:$0xff]   ;;  %vm1996_vm10 = vcmask 310272  }
  0x10   :  { %575 = vmatprep.subr.bf16.mxu0 %v8382_v15  ;;  %616 = vmatprep.subr.bf16.mxu1 %v8385_v16  ;;  %v8424_v15 = vld [vmem:[%s11205_s5 + $0x20] ss:$48 sps:$4 sm:$0xff]   ;;  %v8427_v16 = vld [vmem:[%s11205_s5 + $0x28] ss:$48 sps:$4 sm:$0xff]   ;;  %vm1851_vm11 = vcmask 261120   ;;  %vm7155_vm12 = vcmask 130048  }
  0x11   :  { %v552_v10 = vand.u32 %v7213_v6, %v9090_v12  ;;  %v8447_v36 = vld [vmem:[%s11207_s6 + $0xc0] sm:$0xff]   ;;  %v8469_v59 = vld [vmem:[%s11207_s6 + $0xa8] sm:$0xff]   ;;  %v8476_v3 = vld [vmem:[%s11207_s6 + $0x38] sm:$0xff]  }
  0x12   :  { %8261 = vmatmul.mubr.msk.bf16.vlgmr.msra.gmra.mrb[0].mxu0 %vm86_vm1, %v46_v7  ;;  %v7215_v7 = vcombine.low %v259_v60, %v259_v60  ;;  %v8448_v37 = vld [vmem:[%s11207_s6] sm:$0xff]   ;;  %v8470_v60 = vld [vmem:[%s11207_s6 + $0x70] sm:$0xff]  }
  0x13   :  { %576 = vmatpush1.bf16.msra.mxu0 %v8380_v14  ;;  %607 = vmatprep.mubr.bf16.mxu0 %v8978_v46  ;;  %v8429_v14 = vld [vmem:[%s11205_s5 + $0x2c] ss:$48 sps:$4 sm:$0xff]   ;;  %v8449_v38 = vld [vmem:[%s11207_s6 + $0x80] sm:$0xff]  }
  0x14   :  { %577 = vmatprep.subr.bf16.mxu0 %v8388_v17  ;;  %v558_v11 = vand.u32 %v7215_v7, %v9090_v12  ;;  %v8432_v17 = vld [vmem:[%s11205_s5 + $0x84] ss:$48 sps:$4 sm:$0xff]  }
  0x15   :  { %v8479_v6 = vld [vmem:[%s11207_s6 + $0x1c0] sm:$0xff]  }
  0x16   :  { %v45_v7 = vld [vmem:[%s11208_s2] sm:$0xff] }
  0x17   :  { %578 = vmatpush1.bf16.msra.mxu0 %v8386_v18  ;;  %v8435_v18 = vld [vmem:[%s11205_s5 + $0x8c] ss:$48 sps:$4 sm:$0xff]  }
  0x18   :  { %579 = vmatprep.subr.bf16.mxu0 %v8394_v19  ;;  %v260_v19 = vld [vmem:[%s11205_s5 + $0x140] sm:$0x33] }
  0x1b   :  { %580 = vmatpush1.bf16.msra.mxu0 %v8392_v20  ;;  %v261_v20 = vld [vmem:[%s11205_s5 + $0x148] sm:$0x33] }
  0x1c   :  { %581 = vmatprep.subr.bf16.mxu0 %v543_v40  ;;  %v8451_v40 = vld [vmem:[%s11207_s6 + $0xc8] sm:$0xff]  }
  0x1f   :  { %582 = vmatpush1.bf16.msra.mxu0 %v540_v42  ;;  %v8453_v42 = vld [vmem:[%s11207_s6 + $0x88] sm:$0xff]  }
  0x20   :  { %657 = vmatprep.subr.bf16.mxu0 %v8404_v44  ;;  %v8455_v44 = vld [vmem:[%s11207_s6 + $0xd0] sm:$0xff]  }
  0xe5   :  { %v124_v22 = vpop.f32.mrb[0].mxu0 }
  0xe6   :  { %v125_v23 = vadd.f32 %v7161_v21, %v124_v22  ;;  %v8262_v24 = vpop.f32.mrb[1].mxu0  ;;  %v8430_v21 = vld [vmem:[%s11205_s5 + $0x80] ss:$48 sps:$4 sm:$0xff]   ;;  %v8433_v22 = vld [vmem:[%s11205_s5 + $0x88] ss:$48 sps:$4 sm:$0xff]  }
  0xe7   :  { %v127_v25 = vpop.f32.mrb[2].mxu0  ;;  %v8441_v24 = vld [vmem:[%s11205_s5 + $0xec] ss:$48 sps:$4 sm:$0xff]  }
  0xe8   :  { %v130_v26 = vmax.f32 %v125_v23, 0.0  ;;  %v8263_v27 = vpop.f32.mrb[3].mxu0  ;;  %v8438_v23 = vld [vmem:[%s11205_s5 + $0xe4] ss:$48 sps:$4 sm:$0xff]   ;;  %v7218_v25 = vcombine.high %v260_v19, %v260_v19 }
  0xe9   :  { %v8436_v27 = vld [vmem:[%s11205_s5 + $0xe0] ss:$48 sps:$4 sm:$0xff]  }
  0xea   :  { %v138_v29 = vpack.c.bf16 %v130_v26, %v130_v26  ;;  %v7220_v26 = vcombine.high %v261_v20, %v261_v20 }
  0xec   :  { %8273 = vmatmul.mubr.msk.bf16.vlgmr.msra.gmra.mrb[0].mxu1 %vm167_vm4, %v138_v29  ;;  %v7217_v29 = vcombine.low %v260_v19, %v260_v19 }
  0xed   :  { %617 = vmatpush1.bf16.msra.mxu1 %v8383_v28  ;;  %648 = vmatprep.mubr.bf16.mxu1 %v8978_v46  ;;  %v8439_v28 = vld [vmem:[%s11205_s5 + $0xe8] ss:$48 sps:$4 sm:$0xff]  }
  0xee   :  { %618 = vmatprep.subr.bf16.mxu1 %v8391_v30  ;;  %v7219_v30 = vcombine.low %v261_v20, %v261_v20 }
  0xf0   :  { %v570_v34 = vand.u32 %v7219_v30, %v9090_v12 }
  0xf1   :  { %619 = vmatpush1.bf16.msra.mxu1 %v8389_v31  ;;  %v567_v31 = vand.u32 %v7218_v25, %v9090_v12 }
  0xf2   :  { %620 = vmatprep.subr.bf16.mxu1 %v8397_v32  ;;  %v573_v32 = vand.u32 %v7220_v26, %v9090_v12 }
  0xf5   :  { %621 = vmatpush1.bf16.msra.mxu1 %v8395_v33  ;;  %v564_v33 = vand.u32 %v7217_v29, %v9090_v12 }
  0xf6   :  { %622 = vmatprep.subr.bf16.mxu1 %v549_v41  ;;  %v8452_v41 = vld [vmem:[%s11207_s6 + $0x8] sm:$0xff]  }
  0xf9   :  { %623 = vmatpush1.bf16.msra.mxu1 %v546_v43  ;;  %v8454_v43 = vld [vmem:[%s11207_s6 + $0x50] sm:$0xff]  }
  0xfa   :  { %698 = vmatprep.subr.bf16.mxu1 %v8407_v45  ;;  %v8456_v45 = vld [vmem:[%s11207_s6 + $0x10] sm:$0xff]  }
 0x1bf   :  { %v212_v48 = vpop.f32.mrb[0].mxu1 }
 0x1c0   :  { %v213_v49 = vadd.f32 %v7167_v47, %v212_v48  ;;  %v8274_v50 = vpop.f32.mrb[1].mxu1  ;;  %v8457_v47 = vld [vmem:[%s11207_s6 + $0x90] sm:$0xff]   ;;  %v8458_v48 = vld [vmem:[%s11207_s6 + $0x58] sm:$0xff]  }
 0x1c1   :  { %v215_v51 = vpop.f32.mrb[2].mxu1  ;;  %v8460_v50 = vld [vmem:[%s11207_s6 + $0x18] sm:$0xff]  }
 0x1c2   :  { %v218_v52 = vmax.f32 %v213_v49, 0.0  ;;  %v8275_v53 = vpop.f32.mrb[3].mxu1  ;;  %v8459_v49 = vld [vmem:[%s11207_s6 + $0xd8] sm:$0xff]  }
 0x1c3   :  { %v8461_v51 = vld [vmem:[%s11207_s6 + $0x98] sm:$0xff]   ;;  %v8463_v53 = vld [vmem:[%s11207_s6 + $0xe0] sm:$0xff]  }
 0x1c4   :  { %v9161_v56 = vpack.c.bf16 %v218_v52, %v218_v52  ;;  %v8462_v52 = vld [vmem:[%s11207_s6 + $0x60] sm:$0xff]  }
 0x1c6   :  { %7221 = vmatmul.mubr.msk.bf16.vlgmr.msra.gmra.mrb[4].mxu0 %vm167_vm4, %v9161_v56  ;;  %7222 = vmatmul.mubr.msk.bf16.vlgmr.msra.gmra.mrb[4].mxu1 %vm167_vm4, %v9161_v56 }
 0x1c7   :  { %658 = vmatpush1.bf16.msra.mxu0 %v8402_v54  ;;  %699 = vmatpush1.bf16.msra.mxu1 %v8405_v55  ;;  %v8464_v54 = vld [vmem:[%s11207_s6 + $0x20] sm:$0xff]  }
 0x1c8   :  { %659 = vmatprep.subr.bf16.mxu0 %v8410_v57  ;;  %700 = vmatprep.subr.bf16.mxu1 %v8413_v58  ;;  %v8465_v55 = vld [vmem:[%s11207_s6 + $0xa0] sm:$0xff]   ;;  %v8467_v57 = vld [vmem:[%s11207_s6 + $0xe8] sm:$0xff]  }
 0x1c9   :  { %689 = vmatprep.mubr.bf16.mxu0 %v8978_v46  ;;  %730 = vmatprep.mubr.bf16.mxu1 %v8978_v46  ;;  %v8468_v58 = vld [vmem:[%s11207_s6 + $0x28] sm:$0xff]  }
 0x1cb   :  { %660 = vmatpush1.bf16.msra.mxu0 %v8408_v61  ;;  %701 = vmatpush1.bf16.msra.mxu1 %v8411_v62  ;;  %v8471_v61 = vld [vmem:[%s11207_s6 + $0xf0] sm:$0xff]  }
 0x1cc   :  { %661 = vmatprep.subr.bf16.mxu0 %v8416_v63  ;;  %702 = vmatprep.subr.bf16.mxu1 %v8419_v1  ;;  %v8472_v62 = vld [vmem:[%s11207_s6 + $0x30] sm:$0xff]   ;;  %v8474_v1 = vld [vmem:[%s11207_s6 + $0x78] sm:$0xff]  }
 0x1cd   :  { %v8473_v63 = vld [vmem:[%s11207_s6 + $0xb0] sm:$0xff]  }
 0x1cf   :  { %662 = vmatpush1.bf16.msra.mxu0 %v8414_v4  ;;  %703 = vmatpush1.bf16.msra.mxu1 %v8417_v5  ;;  %v8477_v4 = vld [vmem:[%s11207_s6 + $0xb8] sm:$0xff]   ;;  %v8478_v5 = vld [vmem:[%s11207_s6 + $0x140] sm:$0xff]  }
 0x1d0   :  { %663 = vmatprep.subr.bf16.mxu0 %v555_v8  ;;  %704 = vmatprep.subr.bf16.mxu1 %v561_v9  ;;  %v3654_v8 = vsel %vm3653_vm5, %v45_v7, 0.0  ;;  %v266_v9 = vlaneseq }
 0x1d1   :  { %3655 = vadd.xlane.f32.xlu0 %v3654_v8  ;;  %v8495_v8 = vld [vmem:[%s11207_s6 + $0x1e0] sm:$0xff]  }
 0x1d3   :  { %664 = vmatpush1.bf16.msra.mxu0 %v552_v10  ;;  %705 = vmatpush1.bf16.msra.mxu1 %v558_v11  ;;  %v9364_v10 = vshrl.u32 %v266_v9, 7 }
 0x1d4   :  { %739 = vmatprep.subr.bf16.mxu0 %v8426_v13  ;;  %780 = vmatprep.subr.bf16.mxu1 %v8429_v14  ;;  %v9375_v14 = vld [vmem:[%s11206_s3 + $0x2] sm:$0xff] }
 0x1d5   :  { %v9367_v11 = vsub.s32 0, %v9364_v10  ;;  %v9370_v13 = vsub.s32 2, %v9364_v10 }
 0x1d6   :  { %7223 = vmatmul.mubr.msk.bf16.vlgmr.msra.gmra.mrb[8].mxu0 %vm167_vm4, %v9161_v56  ;;  %7224 = vmatmul.mubr.msk.bf16.vlgmr.msra.gmra.mrb[8].mxu1 %vm167_vm4, %v9161_v56 }
 0x1d7   :  { %740 = vmatpush1.bf16.msra.mxu0 %v8424_v15  ;;  %781 = vmatpush1.bf16.msra.mxu1 %v8427_v16  ;;  %v9378_v15 = vsub.s32 1, %v9364_v10  ;;  %v9381_v16 = vsub.s32 3, %v9364_v10 }
 0x1d8   :  { %741 = vmatprep.subr.bf16.mxu0 %v8432_v17  ;;  %782 = vmatprep.subr.bf16.mxu1 %v8435_v18  ;;  %v269_v17 = vrot.slane %v9375_v14, %v9367_v11  ;;  %v277_v18 = vrot.slane %v9375_v14, %v9370_v13 }
 0x1d9   :  { %771 = vmatprep.mubr.bf16.mxu0 %v8978_v46  ;;  %812 = vmatprep.mubr.bf16.mxu1 %v8978_v46  ;;  %v273_v19 = vrot.slane %v9375_v14, %v9378_v15  ;;  %v281_v20 = vrot.slane %v9375_v14, %v9381_v16 }
 0x1db   :  { %742 = vmatpush1.bf16.msra.mxu0 %v8430_v21  ;;  %783 = vmatpush1.bf16.msra.mxu1 %v8433_v22 }
 0x1dc   :  { %743 = vmatprep.subr.bf16.mxu0 %v8438_v23  ;;  %784 = vmatprep.subr.bf16.mxu1 %v8441_v24 }
 0x1df   :  { %744 = vmatpush1.bf16.msra.mxu0 %v8436_v27  ;;  %785 = vmatpush1.bf16.msra.mxu1 %v8439_v28 }
 0x1e0   :  { %745 = vmatprep.subr.bf16.mxu0 %v567_v31  ;;  %786 = vmatprep.subr.bf16.mxu1 %v573_v32 }
 0x1e3   :  { %746 = vmatpush1.bf16.msra.mxu0 %v564_v33  ;;  %787 = vmatpush1.bf16.msra.mxu1 %v570_v34 }
 0x1e4   :  { %7777 = vmatprep.subr.bf16.mxu0 %v8446_v35  ;;  %7799 = vmatprep.subr.bf16.mxu1 %v8447_v36 }
 0x1e6   :  { %7225 = vmatmul.mubr.msk.bf16.vlgmr.msra.gmra.mrb[12].mxu0 %vm167_vm4, %v9161_v56  ;;  %7226 = vmatmul.mubr.msk.bf16.vlgmr.msra.gmra.mrb[12].mxu1 %vm167_vm4, %v9161_v56  ;;  %v8466_v56 = vld [vmem:[%s11207_s6 + $0x68] sm:$0xff]  }
 0x1e7   :  { %7778 = vmatpush3.bf16.msra.mxu0 %v8448_v37  ;;  %7800 = vmatpush3.bf16.msra.mxu1 %v8449_v38 }
 0x1e8   :  { %7779 = vmatprep.subr.bf16.mxu0 %v8450_v39  ;;  %7801 = vmatprep.subr.bf16.mxu1 %v8451_v40  ;;  %v8480_v39 = vld [vmem:[%s11207_s6 + $0x100] sm:$0xff]  }
 0x1e9   :  { %3643 = vperm.xlu0 %8369, %v45_v7   ;;  %v8481_v40 = vld [vmem:[%s11207_s6 + $0x180] sm:$0xff]  }
 0x1ea   :  { %v8494_v7 = vld [vmem:[%s11207_s6 + $0x160] sm:$0xff]  }
 0x1eb   :  { %7780 = vmatpush3.bf16.msra.mxu0 %v8452_v41  ;;  %7802 = vmatpush3.bf16.msra.mxu1 %v8453_v42 }
 0x1ec   :  { %7781 = vmatprep.subr.bf16.mxu0 %v8454_v43  ;;  %7803 = vmatprep.subr.bf16.mxu1 %v8455_v44  ;;  %v8482_v43 = vld [vmem:[%s11207_s6 + $0x148] sm:$0xff]  }
 0x1ed   :  { %v8483_v44 = vld [vmem:[%s11207_s6 + $0x1c8] sm:$0xff]  }
 0x1ef   :  { %7782 = vmatpush3.bf16.msra.mxu0 %v8456_v45  ;;  %7804 = vmatpush3.bf16.msra.mxu1 %v8457_v47  ;;  %v8484_v45 = vld [vmem:[%s11207_s6 + $0x108] sm:$0xff]  }
 0x1f0   :  { %7783 = vmatprep.subr.bf16.mxu0 %v8458_v48  ;;  %7805 = vmatprep.subr.bf16.mxu1 %v8459_v49  ;;  %v8485_v47 = vld [vmem:[%s11207_s6 + $0x188] sm:$0xff]   ;;  %v9410_v48 = vsub.s32 5, %v9364_v10  ;;  %v9413_v49 = vsub.s32 7, %v9364_v10 }
 0x1f3   :  { %7784 = vmatpush3.bf16.msra.mxu0 %v8460_v50  ;;  %7806 = vmatpush3.bf16.msra.mxu1 %v8461_v51  ;;  %v8486_v50 = vld [vmem:[%s11207_s6 + $0x150] sm:$0xff]  }
 0x1f4   :  { %7785 = vmatprep.subr.bf16.mxu0 %v8462_v52  ;;  %7807 = vmatprep.subr.bf16.mxu1 %v8463_v53  ;;  %v8487_v51 = vld [vmem:[%s11207_s6 + $0x1d0] sm:$0xff]   ;;  %v289_v52 = vrot.slane %v9375_v14, %v9410_v48  ;;  %v297_v53 = vrot.slane %v9375_v14, %v9413_v49 }
 0x1f7   :  { %7786 = vmatpush3.bf16.msra.mxu0 %v8464_v54  ;;  %7808 = vmatpush3.bf16.msra.mxu1 %v8465_v55  ;;  %v8488_v54 = vld [vmem:[%s11207_s6 + $0x110] sm:$0xff]  }
 0x1f8   :  { %7787 = vmatprep.subr.bf16.mxu0 %v8466_v56  ;;  %7809 = vmatprep.subr.bf16.mxu1 %v8467_v57  ;;  %v8489_v55 = vld [vmem:[%s11207_s6 + $0x190] sm:$0xff]   ;;  %v8490_v56 = vld [vmem:[%s11207_s6 + $0x158] sm:$0xff]  }
 0x1f9   :  { %v8491_v57 = vld [vmem:[%s11207_s6 + $0x1d8] sm:$0xff]  }
 0x1fb   :  { %7788 = vmatpush3.bf16.msra.mxu0 %v8468_v58  ;;  %7810 = vmatpush3.bf16.msra.mxu1 %v8469_v59 }
 0x1fc   :  { %7789 = vmatprep.subr.bf16.mxu0 %v8470_v60  ;;  %7811 = vmatprep.subr.bf16.mxu1 %v8471_v61 }
 0x1ff   :  { %7790 = vmatpush3.bf16.msra.mxu0 %v8472_v62  ;;  %7812 = vmatpush3.bf16.msra.mxu1 %v8473_v63 }
 0x200   :  { %7791 = vmatprep.subr.bf16.mxu0 %v8474_v1  ;;  %7813 = vmatprep.subr.bf16.mxu1 %v8475_v2 }
 0x203   :  { %7792 = vmatpush3.bf16.msra.mxu0 %v8476_v3  ;;  %7814 = vmatpush3.bf16.msra.mxu1 %v8477_v4  ;;  %v8492_v3 = vld [vmem:[%s11207_s6 + $0x118] sm:$0xff]  }
 0x204   :  { %7821 = vmatprep.subr.bf16.mxu0 %v8478_v5  ;;  %7843 = vmatprep.subr.bf16.mxu1 %v8479_v6  ;;  %v8493_v4 = vld [vmem:[%s11207_s6 + $0x198] sm:$0xff]  }
 0x299   :  { %v609_v21 = vpop.f32.mrb[4].mxu0  ;;  %v650_v22 = vpop.f32.mrb[4].mxu1 }
 0x29a   :  { %v610_v23 = vadd.f32 %v609_v21, %v269_v17  ;;  %v651_v24 = vadd.f32 %v650_v22, %v277_v18  ;;  %v611_v25 = vpop.f32.mrb[5].mxu0  ;;  %v652_v26 = vpop.f32.mrb[5].mxu1  ;;  %v8497_v21 = vld [vmem:[%s11207_s6 + $0x1a0] sm:$0xff]   ;;  %v9456_v22 = vsub.s32 4, %v9364_v10 }
 0x29b   :  { %v612_v27 = vadd.f32 %v611_v25, %v273_v19  ;;  %v653_v28 = vadd.f32 %v652_v26, %v281_v20  ;;  %v613_v29 = vpop.f32.mrb[6].mxu0  ;;  %v654_v30 = vpop.f32.mrb[6].mxu1  ;;  %v8496_v20 = vld [vmem:[%s11207_s6 + $0x120] sm:$0xff]   ;;  %v8499_v25 = vld [vmem:[%s11207_s6 + $0x1e8] sm:$0xff]  }
 0x29c   :  { %v821_v31 = vmax.f32 %v610_v23, 0.0  ;;  %v823_v32 = vmax.f32 %v651_v24, 0.0  ;;  %v614_v33 = vpop.f32.mrb[7].mxu0  ;;  %v655_v34 = vpop.f32.mrb[7].mxu1  ;;  %v9459_v23 = vsub.s32 6, %v9364_v10  ;;  %v8498_v24 = vld [vmem:[%s11207_s6 + $0x168] sm:$0xff]  }
 0x29d   :  { %v822_v35 = vmax.f32 %v612_v27, 0.0  ;;  %v824_v36 = vmax.f32 %v653_v28, 0.0  ;;  %v8500_v26 = vld [vmem:[%s11207_s6 + $0x128] sm:$0xff]   ;;  %v285_v27 = vrot.slane %v9375_v14, %v9456_v22  ;;  %v8502_v30 = vld [vmem:[%s11207_s6 + $0x170] sm:$0xff]  }
 0x29e   :  { %v833_v41 = vpack.c.bf16 %v821_v31, %v821_v31  ;;  %v835_v42 = vpack.c.bf16 %v823_v32, %v823_v32  ;;  %v8501_v10 = vld [vmem:[%s11207_s6 + $0x1a8] sm:$0xff]   ;;  %v293_v28 = vrot.slane %v9375_v14, %v9459_v23  ;;  %v8503_v31 = vld [vmem:[%s11207_s6 + $0x1f0] sm:$0xff]  }
 0x29f   :  { %v834_v37 = vpack.c.bf16 %v822_v35, %v822_v35  ;;  %v836_v38 = vpack.c.bf16 %v824_v36, %v824_v36  ;;  %v9480_v29 = vld [vmem:[%s11206_s3 + $0xa] sm:$0xf]  ;;  %v8504_v33 = vld [vmem:[%s11207_s6 + $0x130] sm:$0xff]  }
 0x2a0   :  { %v305_v14 = vrot.slane %v9480_v29, %v9378_v15  ;;  %v313_v32 = vrot.slane %v9480_v29, %v9381_v16  ;;  %v8505_v34 = vld [vmem:[%s11207_s6 + $0x1b0] sm:$0xff]  }
 0x2a1   :  { %1643 = vmatprep.mubr.bf16.mxu0 %v834_v37  ;;  %1683 = vmatprep.mubr.bf16.mxu1 %v836_v38  ;;  %v8506_v37 = vld [vmem:[%s11207_s6 + $0x178] sm:$0xff]  }
 0x2a2   :  { %1644 = vmatmul.mubr.bf16.vlgmr.msra.gmra.mrb[16].mxu0 %v833_v41  ;;  %1684 = vmatmul.mubr.bf16.vlgmr.msra.gmra.mrb[16].mxu1 %v835_v42  ;;  %v8507_v38 = vld [vmem:[%s11207_s6 + $0x1f8] sm:$0xff]  }
 0x2a3   :  { %7822 = vmatpush3.bf16.msra.mxu0 %v8480_v39  ;;  %7844 = vmatpush3.bf16.msra.mxu1 %v8481_v40 }
 0x2a4   :  { %7823 = vmatprep.subr.bf16.mxu0 %v8482_v43  ;;  %7845 = vmatprep.subr.bf16.mxu1 %v8483_v44 }
 0x2a7   :  { %7824 = vmatpush3.bf16.msra.mxu0 %v8484_v45  ;;  %7846 = vmatpush3.bf16.msra.mxu1 %v8485_v47 }
 0x2a8   :  { %7825 = vmatprep.subr.bf16.mxu0 %v8486_v50  ;;  %7847 = vmatprep.subr.bf16.mxu1 %v8487_v51  ;;  %v8508_v50 = vld [vmem:[%s11207_s6 + $0x138] sm:$0xff]  }
 0x2a9   :  { %v691_v58 = vpop.f32.mrb[8].mxu0  ;;  %v732_v59 = vpop.f32.mrb[8].mxu1  ;;  %v8509_v51 = vld [vmem:[%s11207_s6 + $0x1b8] sm:$0xff]  }
 0x2aa   :  { %v693_v60 = vpop.f32.mrb[9].mxu0  ;;  %v734_v61 = vpop.f32.mrb[9].mxu1  ;;  %v692_v35 = vadd.f32 %v691_v58, %v285_v27  ;;  %v733_v36 = vadd.f32 %v732_v59, %v293_v28  ;;  %v8511_v59 = vld [vmem:[%s11207_s6 + $0x200] sm:$0xff]   ;;  %v8529_v27 = vld [vmem:[%s11207_s6 + $0x230] sm:$0xff]  }
 0x2ab   :  { %v694_v62 = vadd.f32 %v693_v60, %v289_v52  ;;  %v735_v63 = vadd.f32 %v734_v61, %v297_v53  ;;  %v695_v1 = vpop.f32.mrb[10].mxu0  ;;  %v736_v2 = vpop.f32.mrb[10].mxu1  ;;  %7826 = vmatpush3.bf16.msra.mxu0 %v8488_v54  ;;  %7848 = vmatpush3.bf16.msra.mxu1 %v8489_v55 }
 0x2ac   :  { %v696_v5 = vpop.f32.mrb[11].mxu0  ;;  %v737_v6 = vpop.f32.mrb[11].mxu1  ;;  %7827 = vmatprep.subr.bf16.mxu0 %v8490_v56  ;;  %7849 = vmatprep.subr.bf16.mxu1 %v8491_v57  ;;  %v825_v52 = vmax.f32 %v692_v35, 0.0  ;;  %v827_v53 = vmax.f32 %v733_v36, 0.0  ;;  %v8510_v56 = vld [vmem:[%s11207_s6 + $0x240] sm:$0xff]   ;;  %v8513_v1 = vld [vmem:[%s11207_s6 + $0x248] sm:$0xff]  }
 0x2ad   :  { %v826_v9 = vmax.f32 %v694_v62, 0.0  ;;  %v828_v17 = vmax.f32 %v735_v63, 0.0  ;;  %v8512_v62 = vld [vmem:[%s11207_s6 + $0x280] sm:$0xff]   ;;  %v8516_v5 = vld [vmem:[%s11207_s6 + $0x250] sm:$0xff]  }
 0x2ae   :  { %v837_v60 = vpack.c.bf16 %v825_v52, %v825_v52  ;;  %v839_v61 = vpack.c.bf16 %v827_v53, %v827_v53  ;;  %v8517_v6 = vld [vmem:[%s11207_s6 + $0x210] sm:$0xff]   ;;  %v8534_v36 = vld [vmem:[%s11207_s6 + $0x2c0] sm:$0xff]  }
 0x2af   :  { %v838_v18 = vpack.c.bf16 %v826_v9, %v826_v9  ;;  %v840_v19 = vpack.c.bf16 %v828_v17, %v828_v17  ;;  %7828 = vmatpush3.bf16.msra.mxu0 %v8492_v3  ;;  %7850 = vmatpush3.bf16.msra.mxu1 %v8493_v4  ;;  %v8514_v3 = vld [vmem:[%s11207_s6 + $0x208] sm:$0xff]   ;;  %v8520_v9 = vld [vmem:[%s11207_s6 + $0x218] sm:$0xff]   ;;  %v8544_v53 = vld [vmem:[%s11203_s4 + $0xb0] sm:$0xff]  }
 0x2b0   :  { %7829 = vmatprep.subr.bf16.mxu0 %v8494_v7  ;;  %7851 = vmatprep.subr.bf16.mxu1 %v8495_v8  ;;  %v8515_v4 = vld [vmem:[%s11207_s6 + $0x288] sm:$0xff]   ;;  %v8518_v7 = vld [vmem:[%s11207_s6 + $0x290] sm:$0xff]   ;;  %v8519_v8 = vld [vmem:[%s11207_s6 + $0x258] sm:$0xff]  }
 0x2b1   :  { %1723 = vmatprep.mubr.bf16.mxu0 %v838_v18  ;;  %1763 = vmatprep.mubr.bf16.mxu1 %v840_v19  ;;  %v8521_v17 = vld [vmem:[%s11207_s6 + $0x298] sm:$0xff]   ;;  %v8522_v18 = vld [vmem:[%s11207_s6 + $0x260] sm:$0xff]  }
 0x2b2   :  { %v8523_v19 = vld [vmem:[%s11207_s6 + $0x220] sm:$0xff]  }
 0x2b3   :  { %7830 = vmatpush3.bf16.msra.mxu0 %v8496_v20  ;;  %7852 = vmatpush3.bf16.msra.mxu1 %v8497_v21  ;;  %v8524_v20 = vld [vmem:[%s11207_s6 + $0x2a0] sm:$0xff]   ;;  %v8525_v21 = vld [vmem:[%s11207_s6 + $0x268] sm:$0xff]  }
 0x2b4   :  { %7831 = vmatprep.subr.bf16.mxu0 %v8498_v24  ;;  %7853 = vmatprep.subr.bf16.mxu1 %v8499_v25  ;;  %v8526_v24 = vld [vmem:[%s11207_s6 + $0x228] sm:$0xff]   ;;  %v301_v25 = vrot.slane %v9480_v29, %v9367_v11 }
 0x2b7   :  { %7832 = vmatpush3.bf16.msra.mxu0 %v8500_v26  ;;  %7854 = vmatpush3.bf16.msra.mxu1 %v8501_v10  ;;  %v8527_v26 = vld [vmem:[%s11207_s6 + $0x2a8] sm:$0xff]   ;;  %v8528_v10 = vld [vmem:[%s11207_s6 + $0x270] sm:$0xff]  }
 0x2b8   :  { %7833 = vmatprep.subr.bf16.mxu0 %v8502_v30  ;;  %7855 = vmatprep.subr.bf16.mxu1 %v8503_v31  ;;  %v8530_v30 = vld [vmem:[%s11207_s6 + $0x2b0] sm:$0xff]   ;;  %v8531_v31 = vld [vmem:[%s11207_s6 + $0x278] sm:$0xff]  }
 0x2b9   :  { %v9504_v39 = vpop.f32.mrb[12].mxu0  ;;  %v9506_v40 = vpop.f32.mrb[12].mxu1 }
 0x2ba   :  { %v775_v41 = vpop.f32.mrb[13].mxu0  ;;  %v816_v42 = vpop.f32.mrb[13].mxu1  ;;  %v774_v28 = vadd.f32 %v9504_v39, %v301_v25  ;;  %v8539_v39 = vld [vmem:[%s11203_s4 + $0xa0] sm:$0xff]  }
 0x2bb   :  { %v776_v43 = vadd.f32 %v775_v41, %v305_v14  ;;  %v817_v44 = vadd.f32 %v816_v42, %v313_v32  ;;  %v777_v45 = vpop.f32.mrb[14].mxu0  ;;  %v818_v47 = vpop.f32.mrb[14].mxu1  ;;  %7834 = vmatpush3.bf16.msra.mxu0 %v8504_v33  ;;  %7856 = vmatpush3.bf16.msra.mxu1 %v8505_v34  ;;  %v8532_v14 = vld [vmem:[%s11207_s6 + $0x238] sm:$0xff]   ;;  %v8535_v34 = vld [vmem:[%s11203_s4 + $0x90] sm:$0xff]   ;;  %v1891_v42 = vld [vmem:[%s11209_s1] sm:$0xf] }
 0x2bc   :  { %v778_v54 = vpop.f32.mrb[15].mxu0  ;;  %v819_v55 = vpop.f32.mrb[15].mxu1  ;;  %7835 = vmatprep.subr.bf16.mxu0 %v8506_v37  ;;  %7857 = vmatprep.subr.bf16.mxu1 %v8507_v38  ;;  %v829_v32 = vmax.f32 %v774_v28, 0.0  ;;  %v8533_v33 = vld [vmem:[%s11207_s6 + $0x2b8] sm:$0xff]   ;;  %v8536_v38 = vld [vmem:[%s11207_s6 + $0x2c8] sm:$0xff]   ;;  %v8538_v41 = vld [vmem:[%s11207_s6 + $0x2d0] sm:$0xff]  }
 0x2bd   :  { %v830_v57 = vmax.f32 %v776_v43, 0.0  ;;  %v832_v58 = vmax.f32 %v817_v44, 0.0  ;;  %v8537_v37 = vld [vmem:[%s11203_s4 + $0x98] sm:$0xff]   ;;  %v309_v44 = vrot.slane %v9480_v29, %v9370_v13  ;;  %v8541_v45 = vld [vmem:[%s11207_s6 + $0x2e0] sm:$0xff]   ;;  %v8542_v29 = vld [vmem:[%s11207_s6 + $0x2e8] sm:$0x3f]  }
 0x2be   :  { %v841_v35 = vpack.c.bf16 %v829_v32, %v829_v32  ;;  %v8540_v43 = vld [vmem:[%s11207_s6 + $0x2d8] sm:$0xff]  }
 0x2bf   :  { %7836 = vmatpush3.bf16.msra.mxu0 %v8508_v50  ;;  %7858 = vmatpush3.bf16.msra.mxu1 %v8509_v51  ;;  %v842_v63 = vpack.c.bf16 %v830_v57, %v830_v57  ;;  %v844_v2 = vpack.c.bf16 %v832_v58, %v832_v58  ;;  %v815_v47 = vadd.f32 %v9506_v40, %v309_v44  ;;  %v1609_v51 = vsel %vm1607_vm8, %v8542_v29, 0  ;;  %v8543_v40 = vld [vmem:[%s11203_s4 + $0xa8] sm:$0xff]   ;;  %v8545_v54 = vld [vmem:[%s11203_s4 + $0xb8] ss:$0 sps:$4 sm:$0x77]  }
 0x2c0   :  { %7865 = vmatprep.subr.bf16.mxu0 %v8510_v56  ;;  %1811 = vmatprep.subr.bf16.mxu1 %v8978_v46  ;;  %v2002_v55 = vsel %vm2000_vm9, %v8545_v54, 0  ;;  %v7227_v58 = vld [vmem:[%s11206_s3 + $0xe] ss:$0 sm:$0xff]  ;;  %v8554_v29 = vld [vmem:[%s11210_s9 + $0x64] ss:$48 sps:$4 sm:$0xff]  }
 0x2c1   :  { %v831_v50 = vmax.f32 %v815_v47, 0.0 }
 0x2c2   :  { %1724 = vmatmul.mubr.bf16.vlgmr.msra.gmra.mrb[20].mxu0 %v837_v60  ;;  %1764 = vmatmul.mubr.bf16.vlgmr.msra.gmra.mrb[20].mxu1 %v839_v61 }
 0x2c3   :  { %7866 = vmatpush3.bf16.msra.mxu0 %v8511_v59  ;;  %1803 = vmatprep.mubr.bf16.mxu0 %v842_v63  ;;  %v843_v52 = vpack.c.bf16 %v831_v50, %v831_v50  ;;  %v8552_v50 = vld [vmem:[%s11210_s9 + $0x60] ss:$48 sps:$4 sm:$0xff]  }
 0x2c4   :  { %1812 = vmatpush1.bf16.msra.mxu1 %v8512_v62  ;;  %7322 = vmatprep.mubr.msk.bf16.mxu1 %vm1603_vm6, %v844_v2 }
 0x2c5   :  { %7867 = vmatprep.subr.bf16.mxu0 %v8513_v1  ;;  %1813 = vmatprep.subr.bf16.mxu1 %v8978_v46 }
 0x2c7   :  { %7868 = vmatpush3.bf16.msra.mxu0 %v8514_v3 }
 0x2c8   :  { %1814 = vmatpush1.bf16.msra.mxu1 %v8515_v4  ;;  %7869 = vmatprep.subr.bf16.mxu0 %v8516_v5 }
 0x2c9   :  { %1815 = vmatprep.subr.bf16.mxu1 %v8978_v46 }
 0x2cb   :  { %7870 = vmatpush3.bf16.msra.mxu0 %v8517_v6  ;;  %v8548_v6 = vld [vmem:[%s11210_s9 + $0x4] ss:$48 sps:$4 sm:$0xff]  }
 0x2cc   :  { %1816 = vmatpush1.bf16.msra.mxu1 %v8518_v7  ;;  %7871 = vmatprep.subr.bf16.mxu0 %v8519_v8  ;;  %v8549_v7 = vld [vmem:[%s11210_s9 + $0x8] ss:$48 sps:$4 sm:$0xff]   ;;  %v8551_v8 = vld [vmem:[%s11210_s9 + $0xc] ss:$48 sps:$4 sm:$0xff]  }
 0x2cd   :  { %1817 = vmatprep.subr.bf16.mxu1 %v8978_v46 }
 0x2cf   :  { %7872 = vmatpush3.bf16.msra.mxu0 %v8520_v9  ;;  %v8555_v9 = vld [vmem:[%s11210_s9 + $0x68] ss:$48 sps:$4 sm:$0xff]  }
 0x2d0   :  { %1818 = vmatpush1.bf16.msra.mxu1 %v8521_v17  ;;  %7873 = vmatprep.subr.bf16.mxu0 %v8522_v18  ;;  %v8557_v17 = vld [vmem:[%s11210_s9 + $0x6c] ss:$48 sps:$4 sm:$0xff]  }
 0x2d1   :  { %1819 = vmatprep.subr.bf16.mxu1 %v8978_v46 }
 0x2d3   :  { %7874 = vmatpush3.bf16.msra.mxu0 %v8523_v19 }
 0x2d4   :  { %1820 = vmatpush1.bf16.msra.mxu1 %v8524_v20  ;;  %7875 = vmatprep.subr.bf16.mxu0 %v8525_v21 }
 0x2d5   :  { %1821 = vmatprep.subr.bf16.mxu1 %v8978_v46 }
 0x2d7   :  { %7876 = vmatpush3.bf16.msra.mxu0 %v8526_v24 }
 0x2d8   :  { %1822 = vmatpush1.bf16.msra.mxu1 %v8527_v26  ;;  %7877 = vmatprep.subr.bf16.mxu0 %v8528_v10 }
 0x2d9   :  { %1823 = vmatprep.subr.bf16.mxu1 %v8978_v46 }
 0x2db   :  { %7878 = vmatpush3.bf16.msra.mxu0 %v8529_v27 }
 0x2dc   :  { %1824 = vmatpush1.bf16.msra.mxu1 %v8530_v30  ;;  %7879 = vmatprep.subr.bf16.mxu0 %v8531_v31 }
 0x2dd   :  { %1825 = vmatprep.subr.bf16.mxu1 %v8978_v46 }
 0x2df   :  { %7880 = vmatpush3.bf16.msra.mxu0 %v8532_v14 }
 0x2e0   :  { %1826 = vmatpush1.bf16.msra.mxu1 %v8533_v33  ;;  %8276 = vmatprep.subr.bf16.mxu0 %v8975_v0 }
 0x2e1   :  { %1827 = vmatprep.subr.bf16.mxu1 %v8978_v46 }
 0x2e2   :  { %1804 = vmatmul.mubr.bf16.vlgmr.msra.gmra.mrb[24].mxu0 %v841_v35 }
 0x2e3   :  { %8277 = vmatpush3.bf16.msra.mxu0 %v8535_v34  ;;  %8282 = vmatprep.mubr.msk.bf16.mxu0 %vm8976_vm0, %v8975_v0 }
 0x2e4   :  { %1828 = vmatpush1.bf16.msra.mxu1 %v8534_v36  ;;  %8278 = vmatprep.subr.bf16.mxu0 %v8975_v0 }
 0x2e5   :  { %1829 = vmatprep.subr.bf16.mxu1 %v8978_v46 }
 0x2e7   :  { %8279 = vmatpush3.bf16.msra.mxu0 %v8537_v37  ;;  %v7325_v37 = vld [vmem:[%s11206_s3 + $0x21] ss:$0 sm:$0xff] }
 0x2e8   :  { %1830 = vmatpush1.bf16.msra.mxu1 %v8536_v38  ;;  %8280 = vmatprep.subr.bf16.mxu0 %v8975_v0 }
 0x2e9   :  { %1831 = vmatprep.subr.bf16.mxu1 %v8978_v46 }
 0x2eb   :  { %8281 = vmatpush3.bf16.msra.mxu0 %v8539_v39 }
 0x2ec   :  { %1832 = vmatpush1.bf16.msra.mxu1 %v8538_v41  ;;  %8286 = vmatprep.subr.bf16.mxu0 %v8975_v0 }
 0x2ed   :  { %1833 = vmatprep.subr.bf16.mxu1 %v8978_v46 }
 0x2ee   :  { %8283 = vmatmul.mubr.msk.bf16.vlgmr.msra.gmra.mrb[28].mxu0 %vm1923_vm7, %v1891_v42 }
 0x2ef   :  { %8292 = vmatprep.mubr.msk.bf16.mxu0 %vm8976_vm0, %v8975_v0  ;;  %8287 = vmatpush3.bf16.msra.mxu0 %v8543_v40 }
 0x2f0   :  { %1834 = vmatpush1.bf16.msra.mxu1 %v8540_v43  ;;  %8288 = vmatprep.subr.bf16.mxu0 %v8975_v0 }
 0x2f1   :  { %1835 = vmatprep.subr.bf16.mxu1 %v8978_v46 }
 0x2f3   :  { %8289 = vmatpush3.bf16.msra.mxu0 %v8544_v53 }
 0x2f4   :  { %1836 = vmatpush1.bf16.msra.mxu1 %v8541_v45  ;;  %8290 = vmatprep.subr.bf16.mxu0 %v8975_v0  ;;  %v8546_v45 = vld [vmem:[%s11210_s9] ss:$48 sps:$4 sm:$0xff]  }
 0x2f5   :  { %1837 = vmatprep.subr.bf16.mxu1 %v8978_v46 }
 0x2f7   :  { %8291 = vmatpush3.bf16.msra.mxu0 %v2002_v55 }
 0x2f8   :  { %1838 = vmatpush1.bf16.msra.mxu1 %v1609_v51  ;;  %2329 = vmatprep.subr.bf16.mxu0 %v8548_v6 }
 0x2f9   :  { %2370 = vmatprep.subr.bf16.mxu1 %v8551_v8 }
 0x2fb   :  { %1844 = vmatmul.mubr.bf16.vlgmr.msra.gmra.mrb[24].mxu1 %v843_v52 }
 0x2fc   :  { %2402 = vmatprep.mubr.bf16.mxu1 %v8978_v46  ;;  %2371 = vmatpush1.bf16.msra.mxu1 %v8549_v7 }
 0x2fd   :  { %2372 = vmatprep.subr.bf16.mxu1 %v8557_v17 }
 0x300   :  { %2373 = vmatpush1.bf16.msra.mxu1 %v8555_v9 }
 0x375   :  { %v7793_v56 = vpop.f32.mrb[16].mxu0  ;;  %v7815_v57 = vpop.f32.mrb[16].mxu1 }
 0x376   :  { %v7794_v59 = vpop.f32.mrb[17].mxu0  ;;  %v7816_v60 = vpop.f32.mrb[17].mxu1 }
 0x377   :  { %v7795_v61 = vadd.f32 %v7794_v59, %v7793_v56  ;;  %v7817_v62 = vadd.f32 %v7816_v60, %v7815_v57  ;;  %v7796_v63 = vpop.f32.mrb[18].mxu0  ;;  %v7818_v1 = vpop.f32.mrb[18].mxu1 }
 0x378   :  { %v7797_v2 = vpop.f32.mrb[19].mxu0  ;;  %v7819_v3 = vpop.f32.mrb[19].mxu1 }
 0x379   :  { %v1646_v4 = vadd.f32 %v7795_v61, %v7227_v58 }
 0x37b   :  { %v1686_v5 = vadd.f32 %v7817_v62, %v1646_v4 }
 0x395   :  { %v7837_v18 = vpop.f32.mrb[20].mxu0  ;;  %v7859_v19 = vpop.f32.mrb[20].mxu1 }
 0x396   :  { %v7838_v20 = vpop.f32.mrb[21].mxu0  ;;  %v7860_v21 = vpop.f32.mrb[21].mxu1 }
 0x397   :  { %v7839_v24 = vadd.f32 %v7838_v20, %v7837_v18  ;;  %v7861_v25 = vadd.f32 %v7860_v21, %v7859_v19  ;;  %v7840_v26 = vpop.f32.mrb[22].mxu0  ;;  %v7862_v10 = vpop.f32.mrb[22].mxu1  ;;  %v7323_v19 = vld [vmem:[%s11206_s3 + $0xf] ss:$0 sm:$0xff]  ;;  %v7324_v21 = vld [vmem:[%s11206_s3 + $0x10] ss:$0 sm:$0xff] }
 0x398   :  { %v7841_v27 = vpop.f32.mrb[23].mxu0  ;;  %v7863_v28 = vpop.f32.mrb[23].mxu1  ;;  %v2070_v26 = vld [vmem:[%s11210_s9 + $0xc0] sm:$0x77]  ;;  %v2071_v10 = vld [vmem:[%s11210_s9 + $0xc8] sm:$0x77] }
 0x399   :  { %v1726_v30 = vadd.f32 %v7839_v24, %v1686_v5  ;;  %v7360_v27 = vcombine.high %v2070_v26, %v2070_v26  ;;  %v7362_v28 = vcombine.high %v2071_v10, %v2071_v10 }
 0x39b   :  { %v1766_v31 = vadd.f32 %v7861_v25, %v1726_v30  ;;  %v7359_v30 = vcombine.low %v2070_v26, %v2070_v26  ;;  %7373 = vmatprep.subr.msk.bf16.mxu1 %vm2000_vm9, %v7362_v28  ;;  %v8598_v26 = vld [vmem:[%s11212_s10 + $0x48] sm:$0xff]  }
 0x39c   :  { %v8601_v28 = vld [vmem:[%s11212_s10 + $0x88] sm:$0xff]  }
 0x3b5   :  { %v7881_v14 = vpop.f32.mrb[24].mxu0 }
 0x3b6   :  { %v7882_v32 = vpop.f32.mrb[25].mxu0 }
 0x3b7   :  { %v7883_v33 = vadd.f32 %v7882_v32, %v7881_v14  ;;  %v7884_v34 = vpop.f32.mrb[26].mxu0  ;;  %v2294_v14 = vsel %vm2000_vm9, %v7359_v30, 0  ;;  %v8602_v30 = vld [vmem:[%s11212_s10 + $0x50] sm:$0xff]  }
 0x3b8   :  { %v7885_v35 = vpop.f32.mrb[27].mxu0  ;;  %v8567_v34 = vld [vmem:[%s11210_s9 + $0x1c] ss:$48 sps:$4 sm:$0xff]  }
 0x3b9   :  { %v1806_v36 = vadd.f32 %v7883_v33, %v1766_v31  ;;  %v7361_v31 = vcombine.low %v2071_v10, %v2071_v10  ;;  %v8564_v33 = vld [vmem:[%s11210_s9 + $0x14] ss:$48 sps:$4 sm:$0xff]   ;;  %v7330_v35 = vld [vmem:[%s11206_s3 + $0x22] ss:$0 sm:$0xff]  ;;  %v8599_v10 = vld [vmem:[%s11212_s10 + $0xc8] sm:$0xff]  }
 0x3bb   :  { %v2300_v32 = vsel %vm2000_vm9, %v7361_v31, 0  ;;  %v8603_v31 = vld [vmem:[%s11212_s10 + $0xd0] sm:$0xff]  }
 0x3bc   :  { %2375 = vmatpush1.bf16.msra.mxu1 %v2300_v32  ;;  %v8605_v32 = vld [vmem:[%s11212_s10 + $0x90] sm:$0xff]  }
 0x3bd   :  { %2452 = vmatprep.subr.bf16.mxu1 %v8567_v34  ;;  %v8607_v34 = vld [vmem:[%s11212_s10 + $0xd8] sm:$0xff]  }
 0x3c1   :  { %v1961_v38 = vpop.f32.mrb[28].mxu0 }
 0x3c2   :  { %v1962_v39 = vadd.f32 %v7325_v37, %v1961_v38  ;;  %v8284_v41 = vpop.f32.mrb[29].mxu0 }
 0x3c3   :  { %v1964_v42 = vpop.f32.mrb[30].mxu0 }
 0x3c4   :  { %v1967_v43 = vmax.f32 %v1962_v39, 0.0  ;;  %v8285_v44 = vpop.f32.mrb[31].mxu0 }
 0x3c5   :  { %v8565_v44 = vld [vmem:[%s11210_s9 + $0x18] ss:$48 sps:$4 sm:$0xff]  }
 0x3c6   :  { %v1973_v47 = vpack.c.bf16 %v1967_v43, %v1967_v43  ;;  %v8562_v43 = vld [vmem:[%s11210_s9 + $0x10] ss:$48 sps:$4 sm:$0xff]  }
 0x3c8   :  { %8293 = vmatmul.mubr.msk.bf16.vlgmr.msra.gmra.mrb[32].mxu0 %vm1996_vm10, %v1973_v47  ;;  %v8570_v47 = vld [vmem:[%s11210_s9 + $0x74] ss:$48 sps:$4 sm:$0xff]  }
 0x3c9   :  { %2330 = vmatpush1.bf16.msra.mxu0 %v8546_v45  ;;  %2361 = vmatprep.mubr.bf16.mxu0 %v8978_v46 }
 0x3ca   :  { %2331 = vmatprep.subr.bf16.mxu0 %v8554_v29  ;;  %v8573_v29 = vld [vmem:[%s11210_s9 + $0x7c] ss:$48 sps:$4 sm:$0xff]  }
 0x3cd   :  { %2332 = vmatpush1.bf16.msra.mxu0 %v8552_v50  ;;  %v2072_v50 = vld [vmem:[%s11210_s9 + $0xd0] sm:$0x77] }
 0x3ce   :  { %v1845_v51 = vpop.f32.mrb[24].mxu1  ;;  %7371 = vmatprep.subr.msk.bf16.mxu0 %vm2000_vm9, %v7360_v27  ;;  %v8600_v27 = vld [vmem:[%s11212_s10 + $0x8] sm:$0xff]  }
 0x3cf   :  { %v1846_v52 = vadd.f32 %v1845_v51, %v1806_v36  ;;  %v1847_v40 = vpop.f32.mrb[25].mxu1  ;;  %v2073_v51 = vld [vmem:[%s11210_s9 + $0xd8] sm:$0x77] }
 0x3d0   :  { %v1848_v53 = vpop.f32.mrb[26].mxu1  ;;  %v8571_v40 = vld [vmem:[%s11210_s9 + $0x78] ss:$48 sps:$4 sm:$0xff]  }
 0x3d1   :  { %v1852_v54 = vsel %vm1851_vm11, %v1846_v52, 0.0  ;;  %v1849_v55 = vpop.f32.mrb[27].mxu1  ;;  %2334 = vmatpush1.bf16.msra.mxu0 %v2294_v14  ;;  %v7364_v53 = vcombine.high %v2072_v50, %v2072_v50  ;;  %v8604_v14 = vld [vmem:[%s11212_s10 + $0x10] sm:$0xff]  }
 0x3d2   :  { %v1853_v56 = vrot.slane %v1852_v54, 4  ;;  %2411 = vmatprep.subr.bf16.mxu0 %v8564_v33  ;;  %v7363_v55 = vcombine.low %v2072_v50, %v2072_v50  ;;  %v8606_v33 = vld [vmem:[%s11212_s10 + $0x58] sm:$0xff]   ;;  %v8620_v50 = vld [vmem:[%s11212_s10 + $0x30] sm:$0xff]  }
 0x3d4   :  { %v1854_v57 = vadd.f32 %v1853_v56, %v1852_v54  ;;  %v7366_v54 = vcombine.high %v2073_v51, %v2073_v51  ;;  %v7365_v56 = vcombine.low %v2073_v51, %v2073_v51  ;;  %v8621_v51 = vld [vmem:[%s11212_s10 + $0xb0] sm:$0xff]  }
 0x3d6   :  { %v1855_v58 = vrot.slane %v1854_v57, 2 }
 0x3d8   :  { %v1856_v59 = vadd.f32 %v1855_v58, %v1854_v57  ;;  %v2306_v57 = vsel %vm2000_vm9, %v7363_v55, 0  ;;  %v2312_v58 = vsel %vm2000_vm9, %v7365_v56, 0  ;;  %v8626_v55 = vld [vmem:[%s11212_s10 + $0x140] sm:$0xff]  }
 0x3d9   :  { %v8627_v56 = vld [vmem:[%s11212_s10 + $0x1c0] sm:$0xff]  }
 0x3da   :  { %v1857_v60 = vrot.slane %v1856_v59, 1 }
 0x3dc   :  { %v1858_v61 = vadd.f32 %v1857_v60, %v1856_v59  ;;  %v8580_v59 = vld [vmem:[%s11210_s9 + $0x24] ss:$48 sps:$4 sm:$0xff]   ;;  %v8583_v60 = vld [vmem:[%s11210_s9 + $0x2c] ss:$48 sps:$4 sm:$0xff]  }
 0x3de   :  { %v1860_v62 = vmul.f32 0.125, %v1858_v61  ;;  %v8578_v61 = vld [vmem:[%s11210_s9 + $0x20] ss:$48 sps:$4 sm:$0xff]  }
 0x3e0   :  { %v1861_v63 = vsub.f32 %v1846_v52, %v1860_v62  ;;  %v8568_v52 = vld [vmem:[%s11210_s9 + $0x70] ss:$48 sps:$4 sm:$0xff]   ;;  %v8581_v62 = vld [vmem:[%s11210_s9 + $0x28] ss:$48 sps:$4 sm:$0xff]  }
 0x3e2   :  { %v1862_v1 = vmul.f32 %v1861_v63, %v1861_v63 }
 0x3e4   :  { %v1863_v2 = vsel %vm1851_vm11, %v1862_v1, 0.0  ;;  %v8589_v1 = vld [vmem:[%s11210_s9 + $0x8c] ss:$48 sps:$4 sm:$0xff]  }
 0x3e5   :  { %v1864_v3 = vrot.slane %v1863_v2, 4 }
 0x3e7   :  { %v1865_v4 = vadd.f32 %v1864_v3, %v1863_v2  ;;  %v2074_v2 = vld [vmem:[%s11210_s9 + $0xe0] sm:$0x77]  ;;  %v2075_v3 = vld [vmem:[%s11210_s9 + $0xe8] sm:$0x77] }
 0x3e9   :  { %v1866_v5 = vrot.slane %v1865_v4, 2 }
 0x3eb   :  { %v1867_v6 = vadd.f32 %v1866_v5, %v1865_v4  ;;  %v8584_v4 = vld [vmem:[%s11210_s9 + $0x80] ss:$48 sps:$4 sm:$0xff]   ;;  %v8587_v5 = vld [vmem:[%s11210_s9 + $0x88] ss:$48 sps:$4 sm:$0xff]  }
 0x3ed   :  { %v1868_v7 = vrot.slane %v1867_v6, 1 }
 0x3ef   :  { %v1869_v8 = vadd.f32 %v1868_v7, %v1867_v6  ;;  %v7368_v6 = vcombine.high %v2074_v2, %v2074_v2  ;;  %v7370_v7 = vcombine.high %v2075_v3, %v2075_v3 }
 0x3f1   :  { %v1870_v9 = vmul.f32 0.125, %v1869_v8  ;;  %v7367_v8 = vcombine.low %v2074_v2, %v2074_v2 }
 0x3f3   :  { %v1871_v17 = vadd.f32 1e-05, %v1870_v9  ;;  %v7369_v9 = vcombine.low %v2075_v3, %v2075_v3 }
 0x3f5   :  { %8968 = vrsqrt.f32 %v1871_v17  ;;  %v2318_v17 = vsel %vm2000_vm9, %v7367_v8, 0 }
 0x3ff   :  { %v8969_v18 = vpop.eup %8968 }
 0x400   :  { %v1873_v20 = vmul.f32 %v8969_v18, %v1861_v63  ;;  %v8586_v63 = vld [vmem:[%s11210_s9 + $0x84] ss:$48 sps:$4 sm:$0xff]   ;;  %v2324_v18 = vsel %vm2000_vm9, %v7369_v9, 0 }
 0x402   :  { %v1881_v24 = vmul.f32 %v7323_v19, %v1873_v20  ;;  %v8594_v19 = vld [vmem:[%s11212_s10 + $0x40] sm:$0xff]  }
 0x403   :  { %v8595_v20 = vld [vmem:[%s11212_s10 + $0xc0] sm:$0xff]  }
 0x404   :  { %v9700_v25 = vadd.f32 %v7324_v21, %v1881_v24  ;;  %v8596_v21 = vld [vmem:[%s11212_s10] sm:$0xff]  }
 0x405   :  { %v8597_v24 = vld [vmem:[%s11212_s10 + $0x80] sm:$0xff]  }
 0x406   :  { %1890 = vst.msk [vmem:[%s11211_s13 + $0x20] sm:$0xff] %vm1851_vm11, %v9700_v25 }
 0x49b   :  { %v2038_v36 = vpop.f32.mrb[32].mxu0 }
 0x49c   :  { %v2039_v37 = vadd.f32 %v7330_v35, %v2038_v36  ;;  %v8294_v38 = vpop.f32.mrb[33].mxu0  ;;  %v8608_v35 = vld [vmem:[%s11212_s10 + $0x18] sm:$0xff]  }
 0x49d   :  { %v2041_v39 = vpop.f32.mrb[34].mxu0  ;;  %v8609_v36 = vld [vmem:[%s11212_s10 + $0x98] sm:$0xff]   ;;  %v8611_v38 = vld [vmem:[%s11212_s10 + $0xe0] sm:$0xff]  }
 0x49e   :  { %v2044_v41 = vmax.f32 %v2039_v37, 0.0  ;;  %v8295_v42 = vpop.f32.mrb[35].mxu0  ;;  %v8610_v37 = vld [vmem:[%s11212_s10 + $0x60] sm:$0xff]  }
 0x49f   :  { %v8612_v39 = vld [vmem:[%s11212_s10 + $0x20] sm:$0xff]   ;;  %v8614_v42 = vld [vmem:[%s11212_s10 + $0x68] sm:$0xff]  }
 0x4a0   :  { %v9732_v45 = vpack.c.bf16 %v2044_v41, %v2044_v41  ;;  %v8613_v41 = vld [vmem:[%s11212_s10 + $0xa0] sm:$0xff]  }
 0x4a2   :  { %7372 = vmatmul.mubr.msk.bf16.vlgmr.msra.gmra.mrb[36].mxu0 %vm1996_vm10, %v9732_v45  ;;  %7374 = vmatmul.mubr.msk.bf16.vlgmr.msra.gmra.mrb[28].mxu1 %vm1996_vm10, %v9732_v45 }
 0x4a3   :  { %2412 = vmatpush1.bf16.msra.mxu0 %v8562_v43  ;;  %2453 = vmatpush1.bf16.msra.mxu1 %v8565_v44  ;;  %v8615_v43 = vld [vmem:[%s11212_s10 + $0xe8] sm:$0xff]  }
 0x4a4   :  { %2413 = vmatprep.subr.bf16.mxu0 %v8570_v47  ;;  %2454 = vmatprep.subr.bf16.mxu1 %v8573_v29  ;;  %v8616_v44 = vld [vmem:[%s11212_s10 + $0x28] sm:$0xff]   ;;  %v8618_v47 = vld [vmem:[%s11212_s10 + $0x70] sm:$0xff]  }
 0x4a5   :  { %2443 = vmatprep.mubr.bf16.mxu0 %v8978_v46  ;;  %2484 = vmatprep.mubr.bf16.mxu1 %v8978_v46  ;;  %v8619_v29 = vld [vmem:[%s11212_s10 + $0xf0] sm:$0xff]  }
 0x4a7   :  { %2414 = vmatpush1.bf16.msra.mxu0 %v8568_v52  ;;  %2455 = vmatpush1.bf16.msra.mxu1 %v8571_v40  ;;  %v8622_v52 = vld [vmem:[%s11212_s10 + $0x78] sm:$0xff]  }
 0x4a8   :  { %7375 = vmatprep.subr.msk.bf16.mxu0 %vm2000_vm9, %v7364_v53  ;;  %7377 = vmatprep.subr.msk.bf16.mxu1 %vm2000_vm9, %v7366_v54  ;;  %v8623_v40 = vld [vmem:[%s11212_s10 + $0xf8] sm:$0xff]  }
 0x4a9   :  { %v8624_v53 = vld [vmem:[%s11212_s10 + $0x38] sm:$0xff]  }
 0x4aa   :  { %v8625_v54 = vld [vmem:[%s11212_s10 + $0xb8] sm:$0xff]  }
 0x4ab   :  { %2416 = vmatpush1.bf16.msra.mxu0 %v2306_v57  ;;  %2457 = vmatpush1.bf16.msra.mxu1 %v2312_v58  ;;  %v9911_v57 = vld [vmem:[%s11206_s3 + $0x23] sm:$0xff] }
 0x4ac   :  { %2493 = vmatprep.subr.bf16.mxu0 %v8580_v59  ;;  %2534 = vmatprep.subr.bf16.mxu1 %v8583_v60  ;;  %v2083_v58 = vrot.slane %v9911_v57, %v9367_v11  ;;  %v2091_v59 = vrot.slane %v9911_v57, %v9370_v13  ;;  %v2087_v60 = vrot.slane %v9911_v57, %v9378_v15 }
 0x4ae   :  { %7376 = vmatmul.mubr.msk.bf16.vlgmr.msra.gmra.mrb[40].mxu0 %vm1996_vm10, %v9732_v45  ;;  %7378 = vmatmul.mubr.msk.bf16.vlgmr.msra.gmra.mrb[32].mxu1 %vm1996_vm10, %v9732_v45 }
 0x4af   :  { %2494 = vmatpush1.bf16.msra.mxu0 %v8578_v61  ;;  %2535 = vmatpush1.bf16.msra.mxu1 %v8581_v62  ;;  %v2095_v61 = vrot.slane %v9911_v57, %v9381_v16 }
 0x4b0   :  { %2495 = vmatprep.subr.bf16.mxu0 %v8586_v63  ;;  %2536 = vmatprep.subr.bf16.mxu1 %v8589_v1 }
 0x4b1   :  { %2525 = vmatprep.mubr.bf16.mxu0 %v8978_v46  ;;  %2566 = vmatprep.mubr.bf16.mxu1 %v8978_v46 }
 0x4b3   :  { %2496 = vmatpush1.bf16.msra.mxu0 %v8584_v4  ;;  %2537 = vmatpush1.bf16.msra.mxu1 %v8587_v5 }
 0x4b4   :  { %7379 = vmatprep.subr.msk.bf16.mxu0 %vm2000_vm9, %v7368_v6  ;;  %7381 = vmatprep.subr.msk.bf16.mxu1 %vm2000_vm9, %v7370_v7 }
 0x4b7   :  { %2498 = vmatpush1.bf16.msra.mxu0 %v2318_v17  ;;  %2539 = vmatpush1.bf16.msra.mxu1 %v2324_v18 }
 0x4b8   :  { %7895 = vmatprep.subr.bf16.mxu0 %v8594_v19  ;;  %7917 = vmatprep.subr.bf16.mxu1 %v8595_v20 }
 0x4ba   :  { %7380 = vmatmul.mubr.msk.bf16.vlgmr.msra.gmra.mrb[44].mxu0 %vm1996_vm10, %v9732_v45  ;;  %7382 = vmatmul.mubr.msk.bf16.vlgmr.msra.gmra.mrb[36].mxu1 %vm1996_vm10, %v9732_v45  ;;  %v8617_v45 = vld [vmem:[%s11212_s10 + $0xa8] sm:$0xff]  }
 0x4bb   :  { %7896 = vmatpush3.bf16.msra.mxu0 %v8596_v21  ;;  %7918 = vmatpush3.bf16.msra.mxu1 %v8597_v24 }
 0x4bc   :  { %7897 = vmatprep.subr.bf16.mxu0 %v8598_v26  ;;  %7919 = vmatprep.subr.bf16.mxu1 %v8599_v10  ;;  %v8628_v10 = vld [vmem:[%s11212_s10 + $0x100] sm:$0xff]  }
 0x4bf   :  { %7898 = vmatpush3.bf16.msra.mxu0 %v8600_v27  ;;  %7920 = vmatpush3.bf16.msra.mxu1 %v8601_v28  ;;  %v8629_v27 = vld [vmem:[%s11212_s10 + $0x180] sm:$0xff]  }
 0x4c0   :  { %7899 = vmatprep.subr.bf16.mxu0 %v8602_v30  ;;  %7921 = vmatprep.subr.bf16.mxu1 %v8603_v31  ;;  %v8630_v31 = vld [vmem:[%s11212_s10 + $0x148] sm:$0xff]  }
 0x4c3   :  { %7900 = vmatpush3.bf16.msra.mxu0 %v8604_v14  ;;  %7922 = vmatpush3.bf16.msra.mxu1 %v8605_v32  ;;  %v8631_v14 = vld [vmem:[%s11212_s10 + $0x1c8] sm:$0xff]   ;;  %v2103_v32 = vrot.slane %v9911_v57, %v9410_v48 }
 0x4c4   :  { %7901 = vmatprep.subr.bf16.mxu0 %v8606_v33  ;;  %7923 = vmatprep.subr.bf16.mxu1 %v8607_v34  ;;  %v2111_v33 = vrot.slane %v9911_v57, %v9413_v49  ;;  %v8632_v34 = vld [vmem:[%s11212_s10 + $0x108] sm:$0xff]  }
 0x4c7   :  { %7902 = vmatpush3.bf16.msra.mxu0 %v8608_v35  ;;  %7924 = vmatpush3.bf16.msra.mxu1 %v8609_v36  ;;  %v8633_v35 = vld [vmem:[%s11212_s10 + $0x188] sm:$0xff]   ;;  %v8634_v36 = vld [vmem:[%s11212_s10 + $0x150] sm:$0xff]  }
 0x4c8   :  { %7903 = vmatprep.subr.bf16.mxu0 %v8610_v37  ;;  %7925 = vmatprep.subr.bf16.mxu1 %v8611_v38  ;;  %v8635_v37 = vld [vmem:[%s11212_s10 + $0x1d0] sm:$0xff]  }
 0x4cb   :  { %7904 = vmatpush3.bf16.msra.mxu0 %v8612_v39  ;;  %7926 = vmatpush3.bf16.msra.mxu1 %v8613_v41 }
 0x4cc   :  { %7905 = vmatprep.subr.bf16.mxu0 %v8614_v42  ;;  %7927 = vmatprep.subr.bf16.mxu1 %v8615_v43 }
 0x4cf   :  { %7906 = vmatpush3.bf16.msra.mxu0 %v8616_v44  ;;  %7928 = vmatpush3.bf16.msra.mxu1 %v8617_v45 }
 0x4d0   :  { %7907 = vmatprep.subr.bf16.mxu0 %v8618_v47  ;;  %7929 = vmatprep.subr.bf16.mxu1 %v8619_v29  ;;  %v8636_v29 = vld [vmem:[%s11212_s10 + $0x110] sm:$0xff]  }
 0x4d3   :  { %7908 = vmatpush3.bf16.msra.mxu0 %v8620_v50  ;;  %7930 = vmatpush3.bf16.msra.mxu1 %v8621_v51  ;;  %v8637_v50 = vld [vmem:[%s11212_s10 + $0x190] sm:$0xff]  }
 0x4d4   :  { %7909 = vmatprep.subr.bf16.mxu0 %v8622_v52  ;;  %7931 = vmatprep.subr.bf16.mxu1 %v8623_v40  ;;  %v8638_v40 = vld [vmem:[%s11212_s10 + $0x158] sm:$0xff]  }
 0x4d7   :  { %7910 = vmatpush3.bf16.msra.mxu0 %v8624_v53  ;;  %7932 = vmatpush3.bf16.msra.mxu1 %v8625_v54  ;;  %v8639_v53 = vld [vmem:[%s11212_s10 + $0x1d8] sm:$0xff]  }
 0x4d8   :  { %7939 = vmatprep.subr.bf16.mxu0 %v8626_v55  ;;  %7961 = vmatprep.subr.bf16.mxu1 %v8627_v56 }
 0x575   :  { %v2363_v62 = vpop.f32.mrb[36].mxu0  ;;  %v2404_v63 = vpop.f32.mrb[28].mxu1 }
 0x576   :  { %v2364_v1 = vadd.f32 %v2363_v62, %v2083_v58  ;;  %v2405_v2 = vadd.f32 %v2404_v63, %v2091_v59  ;;  %v2365_v3 = vpop.f32.mrb[37].mxu0  ;;  %v2406_v4 = vpop.f32.mrb[29].mxu1  ;;  %v8640_v59 = vld [vmem:[%s11212_s10 + $0x118] sm:$0xff]   ;;  %v8643_v62 = vld [vmem:[%s11212_s10 + $0x1e0] sm:$0xff]  }
 0x577   :  { %v2366_v5 = vadd.f32 %v2365_v3, %v2087_v60  ;;  %v2407_v6 = vadd.f32 %v2406_v4, %v2095_v61  ;;  %v2367_v7 = vpop.f32.mrb[38].mxu0  ;;  %v2408_v8 = vpop.f32.mrb[30].mxu1  ;;  %v8641_v60 = vld [vmem:[%s11212_s10 + $0x198] sm:$0xff]   ;;  %v8642_v61 = vld [vmem:[%s11212_s10 + $0x160] sm:$0xff]   ;;  %v8647_v3 = vld [vmem:[%s11212_s10 + $0x1e8] sm:$0xff]  }
 0x578   :  { %v2575_v9 = vmax.f32 %v2364_v1, 0.0  ;;  %v2577_v17 = vmax.f32 %v2405_v2, 0.0  ;;  %v2368_v18 = vpop.f32.mrb[39].mxu0  ;;  %v2409_v19 = vpop.f32.mrb[31].mxu1  ;;  %v8644_v63 = vld [vmem:[%s11212_s10 + $0x120] sm:$0xff]   ;;  %v8646_v2 = vld [vmem:[%s11212_s10 + $0x168] sm:$0xff]  }
 0x579   :  { %v2576_v20 = vmax.f32 %v2366_v5, 0.0  ;;  %v2578_v21 = vmax.f32 %v2407_v6, 0.0  ;;  %v8645_v1 = vld [vmem:[%s11212_s10 + $0x1a0] sm:$0xff]   ;;  %v9996_v6 = vld [vmem:[%s11206_s3 + $0x2b] sm:$0xf] }
 0x57a   :  { %v2587_v28 = vpack.c.bf16 %v2575_v9, %v2575_v9  ;;  %v2589_v30 = vpack.c.bf16 %v2577_v17, %v2577_v17  ;;  %v8648_v18 = vld [vmem:[%s11212_s10 + $0x128] sm:$0xff]  }
 0x57b   :  { %v2588_v24 = vpack.c.bf16 %v2576_v20, %v2576_v20  ;;  %v2590_v26 = vpack.c.bf16 %v2578_v21, %v2578_v21  ;;  %v8649_v19 = vld [vmem:[%s11212_s10 + $0x1a8] sm:$0xff]   ;;  %v2099_v20 = vrot.slane %v9911_v57, %v9456_v22  ;;  %v2107_v21 = vrot.slane %v9911_v57, %v9459_v23  ;;  %v8652_v57 = vld [vmem:[%s11212_s10 + $0x130] sm:$0xff]  }
 0x57d   :  { %3395 = vmatprep.mubr.bf16.mxu0 %v2588_v24  ;;  %3435 = vmatprep.mubr.bf16.mxu1 %v2590_v26 }
 0x57e   :  { %3396 = vmatmul.mubr.bf16.vlgmr.msra.gmra.mrb[48].mxu0 %v2587_v28  ;;  %3436 = vmatmul.mubr.bf16.vlgmr.msra.gmra.mrb[40].mxu1 %v2589_v30  ;;  %v2119_v28 = vrot.slane %v9996_v6, %v9378_v15  ;;  %v2127_v30 = vrot.slane %v9996_v6, %v9381_v16 }
 0x57f   :  { %7940 = vmatpush3.bf16.msra.mxu0 %v8628_v10  ;;  %7962 = vmatpush3.bf16.msra.mxu1 %v8629_v27  ;;  %v8650_v10 = vld [vmem:[%s11212_s10 + $0x170] sm:$0xff]  }
 0x580   :  { %7941 = vmatprep.subr.bf16.mxu0 %v8630_v31  ;;  %7963 = vmatprep.subr.bf16.mxu1 %v8631_v14  ;;  %v8651_v27 = vld [vmem:[%s11212_s10 + $0x1f0] sm:$0xff]  }
 0x581   :  { %v9949_v38 = vpop.f32.mrb[40].mxu0  ;;  %v9951_v39 = vpop.f32.mrb[32].mxu1  ;;  %v8653_v31 = vld [vmem:[%s11212_s10 + $0x1b0] sm:$0xff]  }
 0x582   :  { %v2447_v41 = vpop.f32.mrb[41].mxu0  ;;  %v2488_v42 = vpop.f32.mrb[33].mxu1  ;;  %v2446_v14 = vadd.f32 %v9949_v38, %v2099_v20  ;;  %v8657_v38 = vld [vmem:[%s11212_s10 + $0x1b8] sm:$0xff]  }
 0x583   :  { %v2448_v43 = vadd.f32 %v2447_v41, %v2103_v32  ;;  %v2489_v44 = vadd.f32 %v2488_v42, %v2111_v33  ;;  %v2449_v45 = vpop.f32.mrb[42].mxu0  ;;  %v2490_v47 = vpop.f32.mrb[34].mxu1  ;;  %7942 = vmatpush3.bf16.msra.mxu0 %v8632_v34  ;;  %7964 = vmatpush3.bf16.msra.mxu1 %v8633_v35  ;;  %v2487_v32 = vadd.f32 %v9951_v39, %v2107_v21  ;;  %v8654_v33 = vld [vmem:[%s11212_s10 + $0x178] sm:$0xff]   ;;  %v8658_v42 = vld [vmem:[%s11212_s10 + $0x240] sm:$0xff]  }
 0x584   :  { %v2450_v51 = vpop.f32.mrb[43].mxu0  ;;  %v2491_v52 = vpop.f32.mrb[35].mxu1  ;;  %7943 = vmatprep.subr.bf16.mxu0 %v8634_v36  ;;  %7965 = vmatprep.subr.bf16.mxu1 %v8635_v37  ;;  %v8655_v34 = vld [vmem:[%s11212_s10 + $0x1f8] sm:$0xff]   ;;  %v2579_v39 = vmax.f32 %v2446_v14, 0.0  ;;  %v8659_v45 = vld [vmem:[%s11212_s10 + $0x200] sm:$0xff]  }
 0x585   :  { %v2580_v54 = vmax.f32 %v2448_v43, 0.0  ;;  %v2582_v55 = vmax.f32 %v2489_v44, 0.0  ;;  %v8656_v37 = vld [vmem:[%s11212_s10 + $0x138] sm:$0xff]   ;;  %v2581_v41 = vmax.f32 %v2487_v32, 0.0  ;;  %v8661_v52 = vld [vmem:[%s11212_s10 + $0x248] sm:$0xff]   ;;  %v2123_v32 = vrot.slane %v9996_v6, %v9370_v13 }
 0x586   :  { %v2591_v47 = vpack.c.bf16 %v2579_v39, %v2579_v39  ;;  %v8679_v20 = vld [vmem:[%s11212_s10 + $0x278] sm:$0xff]   ;;  %v8690_v39 = vld [vmem:[%s11213_s7] ss:$48 sps:$4 sm:$0xff]  }
 0x587   :  { %v2592_v56 = vpack.c.bf16 %v2580_v54, %v2580_v54  ;;  %v2594_v58 = vpack.c.bf16 %v2582_v55, %v2582_v55  ;;  %7944 = vmatpush3.bf16.msra.mxu0 %v8636_v29  ;;  %7966 = vmatpush3.bf16.msra.mxu1 %v8637_v50  ;;  %v2593_v29 = vpack.c.bf16 %v2581_v41, %v2581_v41  ;;  %v8660_v50 = vld [vmem:[%s11212_s10 + $0x280] sm:$0xff]   ;;  %v8663_v54 = vld [vmem:[%s11212_s10 + $0x288] sm:$0xff]   ;;  %v8664_v55 = vld [vmem:[%s11212_s10 + $0x250] sm:$0xff]  }
 0x588   :  { %7945 = vmatprep.subr.bf16.mxu0 %v8638_v40  ;;  %7967 = vmatprep.subr.bf16.mxu1 %v8639_v53  ;;  %v8662_v53 = vld [vmem:[%s11212_s10 + $0x208] sm:$0xff]   ;;  %v8680_v21 = vld [vmem:[%s11212_s10 + $0x238] sm:$0xff]   ;;  %v8692_v41 = vld [vmem:[%s11213_s7 + $0x4] ss:$48 sps:$4 sm:$0xff]  }
 0x589   :  { %3475 = vmatprep.mubr.bf16.mxu0 %v2592_v56  ;;  %3515 = vmatprep.mubr.bf16.mxu1 %v2594_v58  ;;  %v8665_v56 = vld [vmem:[%s11212_s10 + $0x210] sm:$0xff]   ;;  %v8687_v14 = vld [vmem:[%s11212_s10 + $0x2d8] sm:$0xff]  }
 0x58a   :  { %v8666_v58 = vld [vmem:[%s11212_s10 + $0x290] sm:$0xff]  }
 0x58b   :  { %7946 = vmatpush3.bf16.msra.mxu0 %v8640_v59  ;;  %7968 = vmatpush3.bf16.msra.mxu1 %v8641_v60  ;;  %v8667_v59 = vld [vmem:[%s11212_s10 + $0x258] sm:$0xff]  }
 0x58c   :  { %7947 = vmatprep.subr.bf16.mxu0 %v8642_v61  ;;  %7969 = vmatprep.subr.bf16.mxu1 %v8643_v62  ;;  %v8668_v60 = vld [vmem:[%s11212_s10 + $0x218] sm:$0xff]   ;;  %v8670_v62 = vld [vmem:[%s11212_s10 + $0x260] sm:$0xff]  }
 0x58d   :  { %v9989_v4 = vpop.f32.mrb[44].mxu0  ;;  %v9991_v5 = vpop.f32.mrb[36].mxu1  ;;  %v8669_v61 = vld [vmem:[%s11212_s10 + $0x298] sm:$0xff]  }
 0x58e   :  { %v2529_v7 = vpop.f32.mrb[45].mxu0  ;;  %v2570_v8 = vpop.f32.mrb[37].mxu1 }
 0x58f   :  { %v2531_v9 = vpop.f32.mrb[46].mxu0  ;;  %v2572_v17 = vpop.f32.mrb[38].mxu1  ;;  %7948 = vmatpush3.bf16.msra.mxu0 %v8644_v63  ;;  %7970 = vmatpush3.bf16.msra.mxu1 %v8645_v1  ;;  %v2530_v35 = vadd.f32 %v2529_v7, %v2119_v28  ;;  %v2571_v36 = vadd.f32 %v2570_v8, %v2127_v30  ;;  %v8671_v63 = vld [vmem:[%s11212_s10 + $0x220] sm:$0xff]   ;;  %v2115_v7 = vrot.slane %v9996_v6, %v9367_v11  ;;  %v8675_v8 = vld [vmem:[%s11212_s10 + $0x2a8] sm:$0xff]  }
 0x590   :  { %v2532_v24 = vpop.f32.mrb[47].mxu0  ;;  %v2573_v26 = vpop.f32.mrb[39].mxu1  ;;  %7949 = vmatprep.subr.bf16.mxu0 %v8646_v2  ;;  %7971 = vmatprep.subr.bf16.mxu1 %v8647_v3  ;;  %v8672_v1 = vld [vmem:[%s11212_s10 + $0x2a0] sm:$0xff]   ;;  %v8673_v2 = vld [vmem:[%s11212_s10 + $0x268] sm:$0xff]   ;;  %v8676_v9 = vld [vmem:[%s11212_s10 + $0x270] sm:$0xff]  }
 0x591   :  { %v2584_v43 = vmax.f32 %v2530_v35, 0.0  ;;  %v2586_v44 = vmax.f32 %v2571_v36, 0.0  ;;  %v8674_v3 = vld [vmem:[%s11212_s10 + $0x228] sm:$0xff]   ;;  %v8677_v17 = vld [vmem:[%s11212_s10 + $0x230] sm:$0xff]   ;;  %v8683_v26 = vld [vmem:[%s11203_s4 + $0x40] sm:$0xff]  }
 0x592   :  { %v8685_v28 = vld [vmem:[%s11203_s4 + $0x48] sm:$0xff]  }
 0x593   :  { %7950 = vmatpush3.bf16.msra.mxu0 %v8648_v18  ;;  %7972 = vmatpush3.bf16.msra.mxu1 %v8649_v19  ;;  %v2596_v51 = vpack.c.bf16 %v2584_v43, %v2584_v43  ;;  %v2598_v40 = vpack.c.bf16 %v2586_v44, %v2586_v44  ;;  %v2528_v18 = vadd.f32 %v9989_v4, %v2115_v7  ;;  %v8678_v19 = vld [vmem:[%s11212_s10 + $0x2b0] sm:$0xff]   ;;  %v8681_v4 = vld [vmem:[%s11212_s10 + $0x2b8] sm:$0xff]   ;;  %v8684_v30 = vld [vmem:[%s11212_s10 + $0x2c8] sm:$0xff]  }
 0x594   :  { %7951 = vmatprep.subr.bf16.mxu0 %v8650_v10  ;;  %7973 = vmatprep.subr.bf16.mxu1 %v8651_v27  ;;  %v8682_v27 = vld [vmem:[%s11212_s10 + $0x2c0] sm:$0xff]   ;;  %v8689_v35 = vld [vmem:[%s11212_s10 + $0x2e8] sm:$0x3f]  }
 0x595   :  { %v2583_v24 = vmax.f32 %v2528_v18, 0.0  ;;  %v3361_v6 = vsel %vm1607_vm8, %v8689_v35, 0  ;;  %v8695_v43 = vld [vmem:[%s11213_s7 + $0x1c] ss:$48 sps:$4 sm:$0xff]   ;;  %v8698_v44 = vld [vmem:[%s11213_s7 + $0x64] ss:$48 sps:$4 sm:$0xff]  }
 0x596   :  { %v8702_v35 = vld [vmem:[%s11213_s7 + $0x8] ss:$48 sps:$4 sm:$0xff]  }
 0x597   :  { %7952 = vmatpush3.bf16.msra.mxu0 %v8652_v57  ;;  %7974 = vmatpush3.bf16.msra.mxu1 %v8653_v31  ;;  %v2595_v10 = vpack.c.bf16 %v2583_v24, %v2583_v24  ;;  %v3665_v57 = vpack.c.bf16 %v9700_v25, %v9700_v25  ;;  %v8686_v31 = vld [vmem:[%s11212_s10 + $0x2d0] sm:$0xff]  }
 0x598   :  { %7953 = vmatprep.subr.bf16.mxu0 %v8654_v33  ;;  %7975 = vmatprep.subr.bf16.mxu1 %v8655_v34  ;;  %v8688_v33 = vld [vmem:[%s11212_s10 + $0x2e0] sm:$0xff]   ;;  %v2569_v34 = vadd.f32 %v9991_v5, %v2123_v32 }
 0x599   :  { %v8974_v5 = vld [vmem:[%s11208_s2] sm:$0xff] }
 0x59a   :  { %v2585_v36 = vmax.f32 %v2569_v34, 0.0 }
 0x59b   :  { %7954 = vmatpush3.bf16.msra.mxu0 %v8656_v37  ;;  %7976 = vmatpush3.bf16.msra.mxu1 %v8657_v38  ;;  %v8979_v38 = vmov 1  }
 0x59c   :  { %7983 = vmatprep.subr.bf16.mxu0 %v8658_v42  ;;  %3563 = vmatprep.subr.bf16.mxu1 %v8978_v46  ;;  %v2597_v37 = vpack.c.bf16 %v2585_v36, %v2585_v36  ;;  %v8693_v42 = vld [vmem:[%s11213_s7 + $0x18] ss:$48 sps:$4 sm:$0xff]  }
 0x59d   :  { %8370 = vset.pattern.permute.xlu1 %v8979_v38  ;;  %8371 = vset.pattern.permute.xlu0 %v8979_v38  ;;  %v8705_v36 = vld [vmem:[%s11213_s7 + $0x28] ss:$48 sps:$4 sm:$0xff]   ;;  %v8710_v38 = vld [vmem:[%s11213_s7 + $0x6c] ss:$48 sps:$4 sm:$0xff]  }
 0x59e   :  { %3476 = vmatmul.mubr.bf16.vlgmr.msra.gmra.mrb[52].mxu0 %v2591_v47  ;;  %3516 = vmatmul.mubr.bf16.vlgmr.msra.gmra.mrb[44].mxu1 %v2593_v29  ;;  %v8696_v47 = vld [vmem:[%s11213_s7 + $0x60] ss:$48 sps:$4 sm:$0xff]   ;;  %v8699_v29 = vld [vmem:[%s11213_s7 + $0x78] ss:$48 sps:$4 sm:$0xff]  }
 0x59f   :  { %7984 = vmatpush3.bf16.msra.mxu0 %v8659_v45  ;;  %3555 = vmatprep.mubr.bf16.mxu0 %v2596_v51  ;;  %v8701_v45 = vld [vmem:[%s11213_s7 + $0x7c] ss:$48 sps:$4 sm:$0xff]  }
 0x5a0   :  { %3564 = vmatpush1.bf16.msra.mxu1 %v8660_v50  ;;  %7478 = vmatprep.mubr.msk.bf16.mxu1 %vm1603_vm6, %v2598_v40  ;;  %v8704_v50 = vld [vmem:[%s11213_s7 + $0xc] ss:$48 sps:$4 sm:$0xff]  }
 0x5a1   :  { %7985 = vmatprep.subr.bf16.mxu0 %v8661_v52  ;;  %3565 = vmatprep.subr.bf16.mxu1 %v8978_v46  ;;  %v8707_v51 = vld [vmem:[%s11213_s7 + $0x2c] ss:$48 sps:$4 sm:$0xff]  }
 0x5a2   :  { %3648 = vperm.xlu1 %8370, %v8974_v5   ;;  %v8713_v5 = vld [vmem:[%s11213_s7 + $0x8c] ss:$48 sps:$4 sm:$0xff]  }
 0x5a3   :  { %7986 = vmatpush3.bf16.msra.mxu0 %v8662_v53  ;;  %v7383_v53 = vld [vmem:[%s11206_s3 + $0x2f] ss:$0 sm:$0xff] }
 0x5a4   :  { %3566 = vmatpush1.bf16.msra.mxu1 %v8663_v54  ;;  %7987 = vmatprep.subr.bf16.mxu0 %v8664_v55 }
 0x5a5   :  { %3567 = vmatprep.subr.bf16.mxu1 %v8978_v46 }
 0x5a7   :  { %7988 = vmatpush3.bf16.msra.mxu0 %v8665_v56 }
 0x5a8   :  { %3568 = vmatpush1.bf16.msra.mxu1 %v8666_v58  ;;  %7989 = vmatprep.subr.bf16.mxu0 %v8667_v59 }
 0x5a9   :  { %3569 = vmatprep.subr.bf16.mxu1 %v8978_v46 }
 0x5ab   :  { %7990 = vmatpush3.bf16.msra.mxu0 %v8668_v60 }
 0x5ac   :  { %3570 = vmatpush1.bf16.msra.mxu1 %v8669_v61  ;;  %7991 = vmatprep.subr.bf16.mxu0 %v8670_v62 }
 0x5ad   :  { %3571 = vmatprep.subr.bf16.mxu1 %v8978_v46 }
 0x5af   :  { %7992 = vmatpush3.bf16.msra.mxu0 %v8671_v63 }
 0x5b0   :  { %3572 = vmatpush1.bf16.msra.mxu1 %v8672_v1  ;;  %7993 = vmatprep.subr.bf16.mxu0 %v8673_v2 }
 0x5b1   :  { %3573 = vmatprep.subr.bf16.mxu1 %v8978_v46 }
 0x5b3   :  { %7994 = vmatpush3.bf16.msra.mxu0 %v8674_v3 }
 0x5b4   :  { %3574 = vmatpush1.bf16.msra.mxu1 %v8675_v8  ;;  %7995 = vmatprep.subr.bf16.mxu0 %v8676_v9 }
 0x5b5   :  { %3575 = vmatprep.subr.bf16.mxu1 %v8978_v46 }
 0x5b7   :  { %7996 = vmatpush3.bf16.msra.mxu0 %v8677_v17 }
 0x5b8   :  { %3576 = vmatpush1.bf16.msra.mxu1 %v8678_v19  ;;  %7997 = vmatprep.subr.bf16.mxu0 %v8679_v20 }
 0x5b9   :  { %3577 = vmatprep.subr.bf16.mxu1 %v8978_v46 }
 0x5bb   :  { %7998 = vmatpush3.bf16.msra.mxu0 %v8680_v21 }
 0x5bc   :  { %3578 = vmatpush1.bf16.msra.mxu1 %v8681_v4  ;;  %8296 = vmatprep.subr.bf16.mxu0 %v8975_v0 }
 0x5bd   :  { %3579 = vmatprep.subr.bf16.mxu1 %v8978_v46 }
 0x5be   :  { %3556 = vmatmul.mubr.bf16.vlgmr.msra.gmra.mrb[56].mxu0 %v2595_v10 }
 0x5bf   :  { %8297 = vmatpush3.bf16.msra.mxu0 %v8683_v26  ;;  %8300 = vmatprep.mubr.msk.bf16.mxu0 %vm8976_vm0, %v8975_v0 }
 0x5c0   :  { %3580 = vmatpush1.bf16.msra.mxu1 %v8682_v27  ;;  %8298 = vmatprep.subr.bf16.mxu0 %v8975_v0 }
 0x5c1   :  { %3581 = vmatprep.subr.bf16.mxu1 %v8978_v46 }
 0x5c3   :  { %8299 = vmatpush3.bf16.msra.mxu0 %v8685_v28 }
 0x5c4   :  { %3582 = vmatpush1.bf16.msra.mxu1 %v8684_v30  ;;  %3941 = vmatprep.subr.bf16.mxu0 %v8692_v41  ;;  %v8708_v41 = vld [vmem:[%s11213_s7 + $0x68] ss:$48 sps:$4 sm:$0xff]  }
 0x5c5   :  { %3583 = vmatprep.subr.bf16.mxu1 %v8978_v46 }
 0x5c6   :  { %8301 = vmatmul.mubr.msk.bf16.vlgmr.msra.gmra.mrb[60].mxu0 %vm1851_vm11, %v3665_v57  ;;  %v7481_v57 = vld [vmem:[%s11206_s3 + $0x11] ss:$0 sm:$0xff] }
 0x5c7   :  { %3973 = vmatprep.mubr.bf16.mxu0 %v8978_v46  ;;  %3942 = vmatpush1.bf16.msra.mxu0 %v8690_v39 }
 0x5c8   :  { %3584 = vmatpush1.bf16.msra.mxu1 %v8686_v31  ;;  %3943 = vmatprep.subr.bf16.mxu0 %v8698_v44  ;;  %v8731_v44 = vld [vmem:[%s11214_s8 + $0xc0] sm:$0xff]  }
 0x5c9   :  { %3585 = vmatprep.subr.bf16.mxu1 %v8978_v46 }
 0x5cb   :  { %3944 = vmatpush1.bf16.msra.mxu0 %v8696_v47  ;;  %v8719_v47 = vld [vmem:[%s11213_s7 + $0x74] ss:$48 sps:$4 sm:$0xff]  }
 0x5cc   :  { %3586 = vmatpush1.bf16.msra.mxu1 %v8687_v14  ;;  %3982 = vmatprep.subr.bf16.mxu0 %v8704_v50  ;;  %v8735_v50 = vld [vmem:[%s11214_s8 + $0xc8] sm:$0xff]  }
 0x5cd   :  { %3587 = vmatprep.subr.bf16.mxu1 %v8978_v46 }
 0x5d0   :  { %3588 = vmatpush1.bf16.msra.mxu1 %v8688_v33 }
 0x5d1   :  { %3589 = vmatprep.subr.bf16.mxu1 %v8978_v46 }
 0x5d4   :  { %3590 = vmatpush1.bf16.msra.mxu1 %v3361_v6 }
 0x5d5   :  { %4064 = vmatprep.subr.bf16.mxu1 %v8695_v43  ;;  %v8716_v43 = vld [vmem:[%s11213_s7 + $0x14] ss:$48 sps:$4 sm:$0xff]  }
 0x5d7   :  { %3596 = vmatmul.mubr.bf16.vlgmr.msra.gmra.mrb[48].mxu1 %v2597_v37 }
 0x5d8   :  { %4096 = vmatprep.mubr.bf16.mxu1 %v8978_v46  ;;  %4065 = vmatpush1.bf16.msra.mxu1 %v8693_v42  ;;  %v8711_v42 = vld [vmem:[%s11213_s7 + $0x88] ss:$48 sps:$4 sm:$0xff]  }
 0x5d9   :  { %4066 = vmatprep.subr.bf16.mxu1 %v8701_v45  ;;  %v8714_v45 = vld [vmem:[%s11213_s7 + $0x10] ss:$48 sps:$4 sm:$0xff]  }
 0x5dc   :  { %4067 = vmatpush1.bf16.msra.mxu1 %v8699_v29  ;;  %v8733_v29 = vld [vmem:[%s11214_s8 + $0x80] sm:$0xff]  }
 0x5dd   :  { %4146 = vmatprep.subr.bf16.mxu1 %v8707_v51  ;;  %v8717_v51 = vld [vmem:[%s11213_s7 + $0x70] ss:$48 sps:$4 sm:$0xff]  }
 0x651   :  { %v7911_v52 = vpop.f32.mrb[48].mxu0  ;;  %v7933_v40 = vpop.f32.mrb[40].mxu1 }
 0x652   :  { %v7912_v54 = vpop.f32.mrb[49].mxu0  ;;  %v7934_v55 = vpop.f32.mrb[41].mxu1 }
 0x653   :  { %v7913_v56 = vadd.f32 %v7912_v54, %v7911_v52  ;;  %v7935_v58 = vadd.f32 %v7934_v55, %v7933_v40  ;;  %v7914_v59 = vpop.f32.mrb[50].mxu0  ;;  %v7936_v60 = vpop.f32.mrb[42].mxu1  ;;  %v8722_v52 = vld [vmem:[%s11213_s7 + $0x24] ss:$48 sps:$4 sm:$0xff]  }
 0x654   :  { %v7915_v61 = vpop.f32.mrb[51].mxu0  ;;  %v7937_v62 = vpop.f32.mrb[43].mxu1  ;;  %v8725_v60 = vld [vmem:[%s11213_s7 + $0x84] ss:$48 sps:$4 sm:$0xff]  }
 0x655   :  { %v3398_v63 = vadd.f32 %v7913_v56, %v7383_v53  ;;  %v8737_v53 = vld [vmem:[%s11214_s8 + $0x88] sm:$0xff]   ;;  %v8720_v56 = vld [vmem:[%s11213_s7 + $0x20] ss:$48 sps:$4 sm:$0xff]  }
 0x656   :  { %v8741_v61 = vld [vmem:[%s11214_s8 + $0x90] sm:$0xff]  }
 0x657   :  { %v3438_v1 = vadd.f32 %v7935_v58, %v3398_v63  ;;  %v8739_v58 = vld [vmem:[%s11214_s8 + $0xd0] sm:$0xff]  }
 0x671   :  { %v7955_v2 = vpop.f32.mrb[52].mxu0  ;;  %v7977_v3 = vpop.f32.mrb[44].mxu1 }
 0x672   :  { %v7956_v7 = vpop.f32.mrb[53].mxu0  ;;  %v7978_v8 = vpop.f32.mrb[45].mxu1 }
 0x673   :  { %v7957_v9 = vadd.f32 %v7956_v7, %v7955_v2  ;;  %v7979_v17 = vadd.f32 %v7978_v8, %v7977_v3  ;;  %v7958_v18 = vpop.f32.mrb[54].mxu0  ;;  %v7980_v19 = vpop.f32.mrb[46].mxu1  ;;  %v8743_v2 = vld [vmem:[%s11214_s8 + $0xd8] sm:$0xff]   ;;  %v8723_v3 = vld [vmem:[%s11213_s7 + $0x80] ss:$48 sps:$4 sm:$0xff]  }
 0x674   :  { %v7959_v20 = vpop.f32.mrb[55].mxu0  ;;  %v7981_v21 = vpop.f32.mrb[47].mxu1  ;;  %v8726_v8 = vld [vmem:[%s11214_s8 + $0x40] sm:$0xff]  }
 0x675   :  { %v3478_v24 = vadd.f32 %v7957_v9, %v3438_v1  ;;  %v8727_v19 = vld [vmem:[%s11214_s8] sm:$0xff]   ;;  %v8728_v21 = vld [vmem:[%s11214_s8 + $0x48] sm:$0xff]  }
 0x677   :  { %v3518_v4 = vadd.f32 %v7979_v17, %v3478_v24  ;;  %v8745_v17 = vld [vmem:[%s11214_s8 + $0x98] sm:$0xff]  }
 0x691   :  { %v7999_v26 = vpop.f32.mrb[56].mxu0 }
 0x692   :  { %v8000_v10 = vpop.f32.mrb[57].mxu0 }
 0x693   :  { %v8001_v27 = vadd.f32 %v8000_v10, %v7999_v26  ;;  %v8002_v28 = vpop.f32.mrb[58].mxu0  ;;  %v8730_v10 = vld [vmem:[%s11214_s8 + $0x50] sm:$0xff]  }
 0x694   :  { %v8003_v30 = vpop.f32.mrb[59].mxu0  ;;  %v8732_v28 = vld [vmem:[%s11214_s8 + $0x10] sm:$0xff]  }
 0x695   :  { %v3558_v31 = vadd.f32 %v8001_v27, %v3518_v4  ;;  %v8729_v4 = vld [vmem:[%s11214_s8 + $0x8] sm:$0xff]  }
 0x699   :  { %v3722_v14 = vpop.f32.mrb[60].mxu0 }
 0x69a   :  { %v3723_v32 = vadd.f32 %v7481_v57, %v3722_v14  ;;  %v8302_v33 = vpop.f32.mrb[61].mxu0  ;;  %v8734_v57 = vld [vmem:[%s11214_s8 + $0x58] sm:$0xff]  }
 0x69b   :  { %v3725_v34 = vpop.f32.mrb[62].mxu0  ;;  %v8738_v33 = vld [vmem:[%s11214_s8 + $0x60] sm:$0xff]  }
 0x69c   :  { %v3728_v6 = vmax.f32 %v3723_v32, 0.0  ;;  %v8303_v37 = vpop.f32.mrb[63].mxu0  ;;  %v8736_v32 = vld [vmem:[%s11214_s8 + $0x18] sm:$0xff]  }
 0x69e   :  { %v10216_v39 = vpack.c.bf16 %v3728_v6, %v3728_v6  ;;  %v8742_v6 = vld [vmem:[%s11214_s8 + $0x68] sm:$0xff]  }
 0x6a0   :  { %7509 = vmatmul.mubr.msk.bf16.vlgmr.msra.gmra.mrb[64].mxu0 %vm1851_vm11, %v10216_v39  ;;  %7512 = vmatmul.mubr.msk.bf16.vlgmr.msra.gmra.mrb[52].mxu1 %vm1851_vm11, %v10216_v39 }
 0x6a1   :  { %3983 = vmatpush1.bf16.msra.mxu0 %v8702_v35  ;;  %4147 = vmatpush1.bf16.msra.mxu1 %v8705_v36  ;;  %v8740_v36 = vld [vmem:[%s11214_s8 + $0x20] sm:$0xff]  }
 0x6a2   :  { %3984 = vmatprep.subr.bf16.mxu0 %v8710_v38  ;;  %4148 = vmatprep.subr.bf16.mxu1 %v8713_v5  ;;  %v8744_v5 = vld [vmem:[%s11214_s8 + $0x28] sm:$0xff]  }
 0x6a3   :  { %4014 = vmatprep.mubr.bf16.mxu0 %v8978_v46  ;;  %4178 = vmatprep.mubr.bf16.mxu1 %v8978_v46 }
 0x6a5   :  { %3985 = vmatpush1.bf16.msra.mxu0 %v8708_v41  ;;  %4149 = vmatpush1.bf16.msra.mxu1 %v8711_v42 }
 0x6a6   :  { %4023 = vmatprep.subr.bf16.mxu0 %v8716_v43  ;;  %8030 = vmatprep.subr.bf16.mxu1 %v8731_v44  ;;  %v3656_v43 = vpop.xlane.xlu0 %3655 }
 0x6a8   :  { %7510 = vmatmul.mubr.msk.bf16.vlgmr.msra.gmra.mrb[68].mxu0 %vm1851_vm11, %v10216_v39  ;;  %7514 = vmatmul.mubr.msk.bf16.vlgmr.msra.gmra.mrb[56].mxu1 %vm1851_vm11, %v10216_v39 }
 0x6a9   :  { %4024 = vmatpush1.bf16.msra.mxu0 %v8714_v45  ;;  %4055 = vmatprep.mubr.bf16.mxu0 %v8978_v46  ;;  %v7479_v45 = vld [vmem:[%s11206_s3 + $0x30] ss:$0 sm:$0xff] }
 0x6aa   :  { %v3597_v40 = vpop.f32.mrb[48].mxu1  ;;  %4025 = vmatprep.subr.bf16.mxu0 %v8719_v47  ;;  %8031 = vmatpush3.bf16.msra.mxu1 %v8733_v29  ;;  %v7480_v29 = vld [vmem:[%s11206_s3 + $0x31] ss:$0 sm:$0xff] }
 0x6ab   :  { %v3598_v54 = vadd.f32 %v3597_v40, %v3558_v31  ;;  %v3599_v55 = vpop.f32.mrb[49].mxu1  ;;  %8032 = vmatprep.subr.bf16.mxu1 %v8735_v50 }
 0x6ac   :  { %v3600_v59 = vpop.f32.mrb[50].mxu1 }
 0x6ad   :  { %v3603_v62 = vsel %vm1851_vm11, %v3598_v54, 0.0  ;;  %v3601_v63 = vpop.f32.mrb[51].mxu1  ;;  %4026 = vmatpush1.bf16.msra.mxu0 %v8717_v51  ;;  %v3644_v51 = vpop.permute.xlu0 %3643  ;;  %v8747_v59 = vld [vmem:[%s11214_s8 + $0xe0] sm:$0xff]  }
 0x6ae   :  { %v3604_v1 = vrot.slane %v3603_v62, 4  ;;  %4105 = vmatprep.subr.bf16.mxu0 %v8722_v52  ;;  %8033 = vmatpush3.bf16.msra.mxu1 %v8737_v53  ;;  %v3649_v52 = vpop.permute.xlu1 %3648  ;;  %v3646_v53 = vmul.f32 %v3644_v51, %v9700_v25  ;;  %v8746_v25 = vld [vmem:[%s11214_s8 + $0x70] sm:$0xff]   ;;  %v8751_v63 = vld [vmem:[%s11214_s8 + $0xe8] sm:$0xff]  }
 0x6af   :  { %8034 = vmatprep.subr.bf16.mxu1 %v8739_v58  ;;  %v8761_v51 = vld [vmem:[%s11214_s8 + $0x108] sm:$0xff]  }
 0x6b0   :  { %v3605_v7 = vadd.f32 %v3604_v1, %v3603_v62  ;;  %7511 = vmatmul.mubr.msk.bf16.vlgmr.msra.gmra.mrb[72].mxu0 %vm1851_vm11, %v10216_v39  ;;  %v8750_v62 = vld [vmem:[%s11214_s8 + $0x78] sm:$0xff]  }
 0x6b1   :  { %4106 = vmatpush1.bf16.msra.mxu0 %v8720_v56  ;;  %4137 = vmatprep.mubr.bf16.mxu0 %v8978_v46  ;;  %v8752_v1 = vld [vmem:[%s11214_s8 + $0x38] sm:$0xff]  }
 0x6b2   :  { %v3606_v9 = vrot.slane %v3605_v7, 2  ;;  %4107 = vmatprep.subr.bf16.mxu0 %v8725_v60  ;;  %8035 = vmatpush3.bf16.msra.mxu1 %v8741_v61  ;;  %v8748_v60 = vld [vmem:[%s11214_s8 + $0x30] sm:$0xff]   ;;  %v8749_v61 = vld [vmem:[%s11214_s8 + $0xa0] sm:$0xff]  }
 0x6b3   :  { %8036 = vmatprep.subr.bf16.mxu1 %v8743_v2  ;;  %v8753_v2 = vld [vmem:[%s11214_s8 + $0xa8] sm:$0xff]  }
 0x6b4   :  { %v3607_v18 = vadd.f32 %v3606_v9, %v3605_v7  ;;  %v8755_v7 = vld [vmem:[%s11214_s8 + $0x140] sm:$0xff]   ;;  %v8758_v9 = vld [vmem:[%s11214_s8 + $0xf8] sm:$0xff]  }
 0x6b5   :  { %4108 = vmatpush1.bf16.msra.mxu0 %v8723_v3  ;;  %v8754_v3 = vld [vmem:[%s11214_s8 + $0xf0] sm:$0xff]  }
 0x6b6   :  { %v3608_v20 = vrot.slane %v3607_v18, 1  ;;  %8008 = vmatprep.subr.bf16.mxu0 %v8726_v8  ;;  %8037 = vmatpush3.bf16.msra.mxu1 %v8745_v17  ;;  %v8756_v8 = vld [vmem:[%s11214_s8 + $0xb0] sm:$0xff]   ;;  %v8760_v17 = vld [vmem:[%s11214_s8 + $0xb8] sm:$0xff]  }
 0x6b7   :  { %8038 = vmatprep.subr.bf16.mxu1 %v8747_v59 }
 0x6b8   :  { %v3609_v24 = vadd.f32 %v3608_v20, %v3607_v18  ;;  %7513 = vmatmul.mubr.msk.bf16.vlgmr.msra.gmra.mrb[76].mxu0 %vm1851_vm11, %v10216_v39  ;;  %v8763_v18 = vld [vmem:[%s11214_s8 + $0x1c0] sm:$0xff]  }
 0x6b9   :  { %8009 = vmatpush3.bf16.msra.mxu0 %v8727_v19  ;;  %v10393_v19 = vld [vmem:[%s11206_s3 + $0x12] sm:$0xff] }
 0x6ba   :  { %v3610_v26 = vmul.f32 0.125, %v3609_v24  ;;  %8010 = vmatprep.subr.bf16.mxu0 %v8728_v21  ;;  %8039 = vmatpush3.bf16.msra.mxu1 %v8749_v61  ;;  %v3761_v20 = vrot.slane %v10393_v19, %v9367_v11  ;;  %v3765_v21 = vrot.slane %v10393_v19, %v9378_v15  ;;  %v8764_v61 = vld [vmem:[%s11214_s8 + $0x110] sm:$0xff]  }
 0x6bb   :  { %8040 = vmatprep.subr.bf16.mxu1 %v8751_v63 }
 0x6bc   :  { %v3611_v27 = vsub.f32 %v3598_v54, %v3610_v26 }
 0x6bd   :  { %8011 = vmatpush3.bf16.msra.mxu0 %v8729_v4 }
 0x6be   :  { %v3612_v30 = vmul.f32 %v3611_v27, %v3611_v27  ;;  %8012 = vmatprep.subr.bf16.mxu0 %v8730_v10  ;;  %8041 = vmatpush3.bf16.msra.mxu1 %v8753_v2 }
 0x6bf   :  { %8042 = vmatprep.subr.bf16.mxu1 %v8754_v3  ;;  %v8767_v3 = vld [vmem:[%s11214_s8 + $0x1c8] sm:$0xff]  }
 0x6c0   :  { %v3613_v31 = vsel %vm1851_vm11, %v3612_v30, 0.0 }
 0x6c1   :  { %v3614_v14 = vrot.slane %v3613_v31, 4  ;;  %8013 = vmatpush3.bf16.msra.mxu0 %v8732_v28 }
 0x6c2   :  { %8014 = vmatprep.subr.bf16.mxu0 %v8734_v57  ;;  %8043 = vmatpush3.bf16.msra.mxu1 %v8756_v8 }
 0x6c3   :  { %v3615_v34 = vadd.f32 %v3614_v14, %v3613_v31  ;;  %8044 = vmatprep.subr.bf16.mxu1 %v8758_v9 }
 0x6c5   :  { %v3616_v35 = vrot.slane %v3615_v34, 2  ;;  %8015 = vmatpush3.bf16.msra.mxu0 %v8736_v32 }
 0x6c6   :  { %8016 = vmatprep.subr.bf16.mxu0 %v8738_v33  ;;  %8045 = vmatpush3.bf16.msra.mxu1 %v8760_v17 }
 0x6c7   :  { %v3617_v37 = vadd.f32 %v3616_v35, %v3615_v34  ;;  %8074 = vmatprep.subr.bf16.mxu1 %v8763_v18  ;;  %v3789_v34 = vrot.slane %v10393_v19, %v9413_v49  ;;  %v3769_v35 = vrot.slane %v10393_v19, %v9370_v13  ;;  %v8768_v18 = vld [vmem:[%s11214_s8 + $0x118] sm:$0xff]  }
 0x6c9   :  { %v3618_v38 = vrot.slane %v3617_v37, 1  ;;  %8017 = vmatpush3.bf16.msra.mxu0 %v8740_v36 }
 0x6ca   :  { %8018 = vmatprep.subr.bf16.mxu0 %v8742_v6  ;;  %v3773_v6 = vrot.slane %v10393_v19, %v9381_v16 }
 0x6cb   :  { %v3619_v39 = vadd.f32 %v3618_v38, %v3617_v37  ;;  %v8757_v37 = vld [vmem:[%s11214_s8 + $0x100] sm:$0xff]  }
 0x6cd   :  { %v3620_v41 = vmul.f32 0.125, %v3619_v39  ;;  %8019 = vmatpush3.bf16.msra.mxu0 %v8744_v5  ;;  %v8759_v5 = vld [vmem:[%s11214_s8 + $0x148] sm:$0xff]  }
 0x6ce   :  { %8020 = vmatprep.subr.bf16.mxu0 %v8746_v25 }
 0x6cf   :  { %v3621_v42 = vadd.f32 1e-05, %v3620_v41 }
 0x6d1   :  { %8970 = vrsqrt.f32 %v3621_v42  ;;  %8021 = vmatpush3.bf16.msra.mxu0 %v8748_v60  ;;  %v3781_v60 = vrot.slane %v10393_v19, %v9410_v48 }
 0x6d2   :  { %8972 = vrcp.f32 %v3656_v43  ;;  %8022 = vmatprep.subr.bf16.mxu0 %v8750_v62  ;;  %v8765_v62 = vld [vmem:[%s11214_s8 + $0x180] sm:$0xff]  }
 0x6d5   :  { %8023 = vmatpush3.bf16.msra.mxu0 %v8752_v1  ;;  %v8766_v1 = vld [vmem:[%s11214_s8 + $0x158] sm:$0xff]  }
 0x6d6   :  { %8052 = vmatprep.subr.bf16.mxu0 %v8755_v7 }
 0x6db   :  { %v8971_v44 = vpop.eup %8970 }
 0x6dc   :  { %v3623_v47 = vmul.f32 %v8971_v44, %v3611_v27  ;;  %v8973_v55 = vpop.eup %8972 }
 0x6de   :  { %v3631_v50 = vmul.f32 %v7479_v45, %v3623_v47 }
 0x6e0   :  { %v10332_v40 = vadd.f32 %v7480_v29, %v3631_v50 }
 0x6e2   :  { %3640 = vst.msk [vmem:[%s11211_s13 + $0x28] sm:$0xff] %vm1851_vm11, %v10332_v40  ;;  %v3651_v54 = vmul.f32 %v3649_v52, %v10332_v40 }
 0x6e4   :  { %v3652_v56 = vadd.f32 %v3651_v54, %v3646_v53 }
 0x6e6   :  { %v10341_v58 = vmul.f32 %v8973_v55, %v3652_v56  ;;  %v8762_v55 = vld [vmem:[%s11214_s8 + $0x150] sm:$0xff]  }
 0x6e8   :  { %3660 = vst.msk [vmem:[%s11211_s13 + $0x18] sm:$0xff] %vm1851_vm11, %v10341_v58 }
 0x773   :  { %v3975_v24 = vpop.f32.mrb[64].mxu0  ;;  %v10399_v4 = vpop.f32.mrb[52].mxu1 }
 0x774   :  { %v3976_v26 = vadd.f32 %v3975_v24, %v3761_v20  ;;  %v3977_v10 = vpop.f32.mrb[65].mxu0  ;;  %v4100_v27 = vpop.f32.mrb[53].mxu1  ;;  %v8769_v20 = vld [vmem:[%s11214_s8 + $0x188] sm:$0xff]   ;;  %v8770_v24 = vld [vmem:[%s11214_s8 + $0x160] sm:$0xff]  }
 0x775   :  { %v3978_v28 = vadd.f32 %v3977_v10, %v3765_v21  ;;  %v3979_v30 = vpop.f32.mrb[66].mxu0  ;;  %v4102_v57 = vpop.f32.mrb[54].mxu1  ;;  %v4101_v42 = vadd.f32 %v4100_v27, %v3789_v34  ;;  %v8776_v34 = vld [vmem:[%s11214_s8 + $0x128] sm:$0xff]  }
 0x776   :  { %v4187_v31 = vmax.f32 %v3976_v26, 0.0  ;;  %v3980_v14 = vpop.f32.mrb[67].mxu0  ;;  %v4103_v32 = vpop.f32.mrb[55].mxu1  ;;  %v8771_v26 = vld [vmem:[%s11214_s8 + $0x1d0] sm:$0xff]   ;;  %v8774_v57 = vld [vmem:[%s11214_s8 + $0x168] sm:$0xff]  }
 0x777   :  { %v4188_v33 = vmax.f32 %v3978_v28, 0.0  ;;  %v4194_v25 = vmax.f32 %v4101_v42, 0.0  ;;  %v8772_v28 = vld [vmem:[%s11214_s8 + $0x120] sm:$0xff]   ;;  %v8773_v30 = vld [vmem:[%s11214_s8 + $0x190] sm:$0xff]  }
 0x778   :  { %v4199_v38 = vpack.c.bf16 %v4187_v31, %v4187_v31  ;;  %v8775_v31 = vld [vmem:[%s11214_s8 + $0x1d8] sm:$0xff]   ;;  %v8780_v42 = vld [vmem:[%s11214_s8 + $0x130] sm:$0xff]  }
 0x779   :  { %v4200_v36 = vpack.c.bf16 %v4188_v33, %v4188_v33  ;;  %v4206_v7 = vpack.c.bf16 %v4194_v25, %v4194_v25 }
 0x77b   :  { %v4016_v39 = vpop.f32.mrb[68].mxu0  ;;  %v10413_v41 = vpop.f32.mrb[56].mxu1  ;;  %5007 = vmatprep.mubr.bf16.mxu0 %v4200_v36  ;;  %v3777_v36 = vrot.slane %v10393_v19, %v9456_v22 }
 0x77c   :  { %v4017_v43 = vadd.f32 %v4016_v39, %v3769_v35  ;;  %v4018_v44 = vpop.f32.mrb[69].mxu0  ;;  %v10415_v45 = vpop.f32.mrb[57].mxu1  ;;  %5008 = vmatmul.mubr.bf16.vlgmr.msra.gmra.mrb[80].mxu0 %v4199_v38  ;;  %v8777_v35 = vld [vmem:[%s11214_s8 + $0x198] sm:$0xff]   ;;  %v8779_v38 = vld [vmem:[%s11214_s8 + $0x1e0] sm:$0xff]  }
 0x77d   :  { %v4019_v47 = vadd.f32 %v4018_v44, %v3773_v6  ;;  %8053 = vmatpush3.bf16.msra.mxu0 %v8757_v37  ;;  %v4020_v29 = vpop.f32.mrb[70].mxu0  ;;  %v4184_v50 = vpop.f32.mrb[58].mxu1  ;;  %v8778_v37 = vld [vmem:[%s11214_s8 + $0x170] sm:$0xff]  }
 0x77e   :  { %v4189_v52 = vmax.f32 %v4017_v43, 0.0  ;;  %v4021_v53 = vpop.f32.mrb[71].mxu0  ;;  %v4185_v54 = vpop.f32.mrb[59].mxu1  ;;  %8054 = vmatprep.subr.bf16.mxu0 %v8759_v5  ;;  %v10480_v5 = vld [vmem:[%s11206_s3 + $0x1a] sm:$0xf]  ;;  %v8781_v43 = vld [vmem:[%s11214_s8 + $0x1a0] sm:$0xff]  }
 0x77f   :  { %v4190_v56 = vmax.f32 %v4019_v47, 0.0  ;;  %v3797_v39 = vrot.slane %v10480_v5, %v9378_v15  ;;  %v8782_v47 = vld [vmem:[%s11214_s8 + $0x178] sm:$0xff]   ;;  %v8783_v29 = vld [vmem:[%s11214_s8 + $0x1e8] sm:$0xff]   ;;  %v3785_v53 = vrot.slane %v10393_v19, %v9459_v23  ;;  %v3805_v25 = vrot.slane %v10480_v5, %v9381_v16  ;;  %v8788_v19 = vld [vmem:[%s11214_s8 + $0x1b0] sm:$0xff]  }
 0x780   :  { %v4201_v63 = vpack.c.bf16 %v4189_v52, %v4189_v52  ;;  %v8785_v52 = vld [vmem:[%s11214_s8 + $0x1a8] sm:$0xff]  }
 0x781   :  { %v4202_v59 = vpack.c.bf16 %v4190_v56, %v4190_v56  ;;  %8055 = vmatpush3.bf16.msra.mxu0 %v8761_v51  ;;  %v8784_v51 = vld [vmem:[%s11214_s8 + $0x138] sm:$0xff]   ;;  %v8787_v56 = vld [vmem:[%s11214_s8 + $0x240] sm:$0xff]  }
 0x782   :  { %8056 = vmatprep.subr.bf16.mxu0 %v8762_v55  ;;  %v8786_v55 = vld [vmem:[%s11214_s8 + $0x1f0] sm:$0xff]  }
 0x783   :  { %v4057_v2 = vpop.f32.mrb[72].mxu0  ;;  %5047 = vmatprep.mubr.bf16.mxu1 %v4202_v59 }
 0x784   :  { %v4059_v8 = vpop.f32.mrb[73].mxu0  ;;  %5048 = vmatmul.mubr.bf16.vlgmr.msra.gmra.mrb[60].mxu1 %v4201_v63  ;;  %v4058_v44 = vadd.f32 %v4057_v2, %v3777_v36  ;;  %v8790_v63 = vld [vmem:[%s11214_s8 + $0x1f8] sm:$0xff]   ;;  %v4183_v2 = vadd.f32 %v10415_v45, %v3805_v25  ;;  %v8808_v36 = vld [vmem:[%s11214_s8 + $0x2a0] sm:$0xff]  }
 0x785   :  { %v4060_v9 = vadd.f32 %v4059_v8, %v3781_v60  ;;  %8057 = vmatpush3.bf16.msra.mxu0 %v8764_v61  ;;  %8075 = vmatpush3.bf16.msra.mxu1 %v8765_v62  ;;  %v4061_v17 = vpop.f32.mrb[74].mxu0  ;;  %v8789_v60 = vld [vmem:[%s11214_s8 + $0x200] sm:$0xff]   ;;  %v4099_v61 = vadd.f32 %v10399_v4, %v3785_v53  ;;  %v8792_v4 = vld [vmem:[%s11214_s8 + $0x1b8] sm:$0xff]  }
 0x786   :  { %5127 = vmatprep.mubr.bf16.mxu1 %v4206_v7  ;;  %v4062_v21 = vpop.f32.mrb[75].mxu0  ;;  %8058 = vmatprep.subr.bf16.mxu0 %v8766_v1  ;;  %v4191_v54 = vmax.f32 %v4058_v44, 0.0  ;;  %v8791_v1 = vld [vmem:[%s11214_s8 + $0x248] sm:$0xff]   ;;  %v4198_v45 = vmax.f32 %v4183_v2, 0.0  ;;  %v8795_v17 = vld [vmem:[%s11214_s8 + $0x210] sm:$0xff]   ;;  %v8813_v44 = vld [vmem:[%s11214_s8 + $0x2b8] sm:$0xff]  }
 0x787   :  { %v4192_v10 = vmax.f32 %v4060_v9, 0.0  ;;  %8076 = vmatprep.subr.bf16.mxu1 %v8767_v3  ;;  %v8793_v7 = vld [vmem:[%s11214_s8 + $0x208] sm:$0xff]   ;;  %v4193_v8 = vmax.f32 %v4099_v61, 0.0  ;;  %v8794_v9 = vld [vmem:[%s11214_s8 + $0x250] sm:$0xff]   ;;  %v8797_v21 = vld [vmem:[%s11214_s8 + $0x258] sm:$0xff]  }
 0x788   :  { %v4203_v62 = vpack.c.bf16 %v4191_v54, %v4191_v54  ;;  %v8818_v53 = vld [vmem:[%s11214_s8 + $0x2e0] sm:$0xff]   ;;  %v8823_v61 = vld [vmem:[%s11203_s4 + $0x58] sm:$0xff]  }
 0x789   :  { %v4204_v27 = vpack.c.bf16 %v4192_v10, %v4192_v10  ;;  %8059 = vmatpush3.bf16.msra.mxu0 %v8768_v18  ;;  %8077 = vmatpush3.bf16.msra.mxu1 %v8769_v20  ;;  %v8796_v18 = vld [vmem:[%s11214_s8 + $0x280] sm:$0xff]   ;;  %v4205_v20 = vpack.c.bf16 %v4193_v8, %v4193_v8  ;;  %v8799_v10 = vld [vmem:[%s11214_s8 + $0x288] sm:$0xff]  }
 0x78a   :  { %8060 = vmatprep.subr.bf16.mxu0 %v8770_v24  ;;  %8078 = vmatprep.subr.bf16.mxu1 %v8771_v26  ;;  %v4210_v24 = vpack.c.bf16 %v4198_v45, %v4198_v45  ;;  %v8798_v26 = vld [vmem:[%s11214_s8 + $0x218] sm:$0xff]   ;;  %v8820_v25 = vld [vmem:[%s11203_s4 + $0xc0] sm:$0xff]  }
 0x78b   :  { %v10461_v14 = vpop.f32.mrb[76].mxu0  ;;  %5087 = vmatprep.mubr.bf16.mxu0 %v4204_v27  ;;  %v8800_v27 = vld [vmem:[%s11214_s8 + $0x260] sm:$0xff]   ;;  %v8826_v2 = vld [vmem:[%s11215_s11 + $0x8] ss:$48 sps:$4 sm:$0xff]  }
 0x78c   :  { %v4141_v32 = vpop.f32.mrb[77].mxu0 }
 0x78d   :  { %8061 = vmatpush3.bf16.msra.mxu0 %v8772_v28  ;;  %8079 = vmatpush3.bf16.msra.mxu1 %v8773_v30  ;;  %v4143_v33 = vpop.f32.mrb[78].mxu0  ;;  %v4142_v50 = vadd.f32 %v4141_v32, %v3797_v39  ;;  %v8801_v28 = vld [vmem:[%s11214_s8 + $0x220] sm:$0xff]   ;;  %v8802_v30 = vld [vmem:[%s11214_s8 + $0x290] sm:$0xff]   ;;  %v8805_v32 = vld [vmem:[%s11214_s8 + $0x298] sm:$0xff]  }
 0x78e   :  { %v4144_v6 = vpop.f32.mrb[79].mxu0  ;;  %8062 = vmatprep.subr.bf16.mxu0 %v8774_v57  ;;  %8080 = vmatprep.subr.bf16.mxu1 %v8775_v31  ;;  %v8803_v57 = vld [vmem:[%s11214_s8 + $0x268] sm:$0xff]   ;;  %v3793_v33 = vrot.slane %v10480_v5, %v9367_v11 }
 0x78f   :  { %v4196_v59 = vmax.f32 %v4142_v50, 0.0  ;;  %v8804_v31 = vld [vmem:[%s11214_s8 + $0x228] sm:$0xff]   ;;  %v8816_v50 = vld [vmem:[%s11214_s8 + $0x2d0] sm:$0xff]  }
 0x790   :  { %v4140_v6 = vadd.f32 %v10461_v14, %v3793_v33  ;;  %v8811_v39 = vld [vmem:[%s11214_s8 + $0x2a8] sm:$0xff]   ;;  %v8812_v14 = vld [vmem:[%s11214_s8 + $0x2b0] sm:$0xff]  }
 0x791   :  { %8063 = vmatpush3.bf16.msra.mxu0 %v8776_v34  ;;  %8081 = vmatpush3.bf16.msra.mxu1 %v8777_v35  ;;  %v4208_v3 = vpack.c.bf16 %v4196_v59, %v4196_v59  ;;  %v8806_v34 = vld [vmem:[%s11214_s8 + $0x270] sm:$0xff]  }
 0x792   :  { %8064 = vmatprep.subr.bf16.mxu0 %v8778_v37  ;;  %8082 = vmatprep.subr.bf16.mxu1 %v8779_v38  ;;  %v8807_v35 = vld [vmem:[%s11214_s8 + $0x230] sm:$0xff]   ;;  %v8809_v37 = vld [vmem:[%s11214_s8 + $0x278] sm:$0xff]  }
 0x793   :  { %v8810_v38 = vld [vmem:[%s11214_s8 + $0x238] sm:$0xff]  }
 0x795   :  { %8065 = vmatpush3.bf16.msra.mxu0 %v8780_v42  ;;  %8083 = vmatpush3.bf16.msra.mxu1 %v8781_v43  ;;  %v4195_v42 = vmax.f32 %v4140_v6, 0.0 }
 0x796   :  { %8066 = vmatprep.subr.bf16.mxu0 %v8782_v47  ;;  %8084 = vmatprep.subr.bf16.mxu1 %v8783_v29  ;;  %v8814_v47 = vld [vmem:[%s11214_s8 + $0x2c0] sm:$0xff]   ;;  %v8815_v29 = vld [vmem:[%s11214_s8 + $0x2c8] sm:$0xff]  }
 0x797   :  { %v4207_v43 = vpack.c.bf16 %v4195_v42, %v4195_v42 }
 0x799   :  { %8067 = vmatpush3.bf16.msra.mxu0 %v8784_v51  ;;  %8085 = vmatpush3.bf16.msra.mxu1 %v8785_v52  ;;  %v8817_v51 = vld [vmem:[%s11214_s8 + $0x2d8] sm:$0xff]   ;;  %v3801_v52 = vrot.slane %v10480_v5, %v9370_v13 }
 0x79a   :  { %8086 = vmatprep.subr.bf16.mxu1 %v8786_v55  ;;  %8096 = vmatprep.subr.bf16.mxu0 %v8787_v56  ;;  %v8819_v55 = vld [vmem:[%s11214_s8 + $0x2e8] sm:$0x3f]  }
 0x79b   :  { %v4181_v54 = vadd.f32 %v10413_v41, %v3801_v52  ;;  %v4973_v5 = vsel %vm1607_vm8, %v8819_v55, 0  ;;  %v8821_v41 = vld [vmem:[%s11203_s4 + $0xc8] sm:$0xff]  }
 0x79c   :  { %5088 = vmatmul.mubr.bf16.vlgmr.msra.gmra.mrb[84].mxu0 %v4203_v62  ;;  %v8825_v62 = vld [vmem:[%s11203_s4 + $0x68] ss:$0 sps:$4 sm:$0x33]  }
 0x79d   :  { %8087 = vmatpush3.bf16.msra.mxu1 %v8788_v19  ;;  %8097 = vmatpush3.bf16.msra.mxu0 %v8789_v60  ;;  %v4197_v56 = vmax.f32 %v4181_v54, 0.0  ;;  %v5386_v19 = vpack.c.bf16 %v10332_v40, %v10332_v40  ;;  %v8822_v60 = vld [vmem:[%s11203_s4 + $0x50] sm:$0xff]   ;;  %v8824_v40 = vld [vmem:[%s11203_s4 + $0x60] sm:$0xff]  }
 0x79e   :  { %5167 = vmatprep.mubr.bf16.mxu0 %v4208_v3  ;;  %8088 = vmatprep.subr.bf16.mxu1 %v8790_v63  ;;  %v5256_v63 = vand.u32 %v8825_v62, %v9090_v12  ;;  %v8831_v3 = vld [vmem:[%s11215_s11 + $0x6c] ss:$48 sps:$4 sm:$0xff]  }
 0x79f   :  { %8098 = vmatprep.subr.bf16.mxu0 %v8791_v1  ;;  %v4209_v59 = vpack.c.bf16 %v4197_v56, %v4197_v56  ;;  %v8828_v1 = vld [vmem:[%s11215_s11 + $0xc] ss:$48 sps:$4 sm:$0xff]  }
 0x7a1   :  { %8089 = vmatpush3.bf16.msra.mxu1 %v8792_v4  ;;  %8099 = vmatpush3.bf16.msra.mxu0 %v8793_v7  ;;  %v8829_v4 = vld [vmem:[%s11215_s11 + $0x68] ss:$48 sps:$4 sm:$0xff]   ;;  %v8834_v7 = vld [vmem:[%s11215_s11 + $0x1c] ss:$48 sps:$4 sm:$0xff]  }
 0x7a2   :  { %8100 = vmatprep.subr.bf16.mxu0 %v8794_v9  ;;  %5175 = vmatprep.subr.bf16.mxu1 %v8978_v46 }
 0x7a4   :  { %5128 = vmatmul.mubr.bf16.vlgmr.msra.gmra.mrb[64].mxu1 %v4205_v20  ;;  %v7515_v20 = vld [vmem:[%s11206_s3 + $0x1e] ss:$0 sm:$0xff] }
 0x7a5   :  { %8101 = vmatpush3.bf16.msra.mxu0 %v8795_v17  ;;  %5176 = vmatpush1.bf16.msra.mxu1 %v8796_v18 }
 0x7a6   :  { %7610 = vmatprep.mubr.msk.bf16.mxu1 %vm1603_vm6, %v4210_v24  ;;  %8102 = vmatprep.subr.bf16.mxu0 %v8797_v21 }
 0x7a7   :  { %5177 = vmatprep.subr.bf16.mxu1 %v8978_v46 }
 0x7a9   :  { %8103 = vmatpush3.bf16.msra.mxu0 %v8798_v26  ;;  %5178 = vmatpush1.bf16.msra.mxu1 %v8799_v10 }
 0x7aa   :  { %8104 = vmatprep.subr.bf16.mxu0 %v8800_v27  ;;  %5179 = vmatprep.subr.bf16.mxu1 %v8978_v46 }
 0x7ad   :  { %8105 = vmatpush3.bf16.msra.mxu0 %v8801_v28  ;;  %5180 = vmatpush1.bf16.msra.mxu1 %v8802_v30 }
 0x7ae   :  { %8106 = vmatprep.subr.bf16.mxu0 %v8803_v57  ;;  %5181 = vmatprep.subr.bf16.mxu1 %v8978_v46 }
 0x7b1   :  { %8107 = vmatpush3.bf16.msra.mxu0 %v8804_v31  ;;  %5182 = vmatpush1.bf16.msra.mxu1 %v8805_v32 }
 0x7b2   :  { %8108 = vmatprep.subr.bf16.mxu0 %v8806_v34  ;;  %5183 = vmatprep.subr.bf16.mxu1 %v8978_v46 }
 0x7b5   :  { %8109 = vmatpush3.bf16.msra.mxu0 %v8807_v35  ;;  %5184 = vmatpush1.bf16.msra.mxu1 %v8808_v36 }
 0x7b6   :  { %8110 = vmatprep.subr.bf16.mxu0 %v8809_v37  ;;  %5185 = vmatprep.subr.bf16.mxu1 %v8978_v46 }
 0x7b9   :  { %8111 = vmatpush3.bf16.msra.mxu0 %v8810_v38  ;;  %5186 = vmatpush1.bf16.msra.mxu1 %v8811_v39 }
 0x7ba   :  { %5187 = vmatprep.subr.bf16.mxu1 %v8978_v46  ;;  %8304 = vmatprep.subr.bf16.mxu0 %v8975_v0 }
 0x7bc   :  { %5168 = vmatmul.mubr.bf16.vlgmr.msra.gmra.mrb[88].mxu0 %v4207_v43 }
 0x7bd   :  { %5188 = vmatpush1.bf16.msra.mxu1 %v8812_v14  ;;  %8312 = vmatprep.mubr.msk.bf16.mxu0 %vm8976_vm0, %v8975_v0 }
 0x7be   :  { %5189 = vmatprep.subr.bf16.mxu1 %v8978_v46  ;;  %8305 = vmatpush3.bf16.msra.mxu0 %v8822_v60 }
 0x7bf   :  { %8306 = vmatprep.subr.bf16.mxu0 %v8975_v0 }
 0x7c1   :  { %5190 = vmatpush1.bf16.msra.mxu1 %v8813_v44 }
 0x7c2   :  { %5191 = vmatprep.subr.bf16.mxu1 %v8978_v46  ;;  %8307 = vmatpush3.bf16.msra.mxu0 %v8823_v61 }
 0x7c3   :  { %8308 = vmatprep.subr.bf16.mxu0 %v8975_v0 }
 0x7c5   :  { %5192 = vmatpush1.bf16.msra.mxu1 %v8814_v47 }
 0x7c6   :  { %5193 = vmatprep.subr.bf16.mxu1 %v8978_v46  ;;  %8309 = vmatpush3.bf16.msra.mxu0 %v8824_v40 }
 0x7c7   :  { %8310 = vmatprep.subr.bf16.mxu0 %v8975_v0 }
 0x7c9   :  { %5194 = vmatpush1.bf16.msra.mxu1 %v8815_v29 }
 0x7ca   :  { %5195 = vmatprep.subr.bf16.mxu1 %v8978_v46  ;;  %8311 = vmatpush3.bf16.msra.mxu0 %v5256_v63 }
 0x7cb   :  { %8316 = vmatprep.subr.bf16.mxu0 %v8975_v0 }
 0x7cd   :  { %5196 = vmatpush1.bf16.msra.mxu1 %v8816_v50 }
 0x7ce   :  { %5197 = vmatprep.subr.bf16.mxu1 %v8978_v46 }
 0x7d1   :  { %5198 = vmatpush1.bf16.msra.mxu1 %v8817_v51 }
 0x7d2   :  { %5199 = vmatprep.subr.bf16.mxu1 %v8978_v46 }
 0x7d5   :  { %5200 = vmatpush1.bf16.msra.mxu1 %v8818_v53 }
 0x7d6   :  { %5201 = vmatprep.subr.bf16.mxu1 %v8978_v46 }
 0x7d9   :  { %5202 = vmatpush1.bf16.msra.mxu1 %v4973_v5  ;;  %v8848_v5 = vld [vmem:[%s11203_s4 + $0x70] sm:$0xff]  }
 0x7da   :  { %8328 = vmatprep.subr.bf16.mxu1 %v8975_v0 }
 0x7dc   :  { %5208 = vmatmul.mubr.bf16.vlgmr.msra.gmra.mrb[68].mxu1 %v4209_v59  ;;  %v7623_v59 = vld [vmem:[%s11206_s3 + $0x32] ss:$0 sm:$0xff] }
 0x7dd   :  { %8329 = vmatpush3.bf16.msra.mxu1 %v8820_v25  ;;  %8332 = vmatprep.mubr.msk.bf16.mxu1 %vm8976_vm0, %v8975_v0 }
 0x7de   :  { %8330 = vmatprep.subr.bf16.mxu1 %v8975_v0 }
 0x7e1   :  { %8331 = vmatpush3.bf16.msra.mxu1 %v8821_v41 }
 0x7e2   :  { %5703 = vmatprep.subr.bf16.mxu1 %v8828_v1  ;;  %v8832_v1 = vld [vmem:[%s11215_s11 + $0x18] ss:$48 sps:$4 sm:$0xff]  }
 0x7e4   :  { %8333 = vmatmul.mubr.msk.bf16.vlgmr.msra.gmra.mrb[72].mxu1 %vm1851_vm11, %v5386_v19  ;;  %v8851_v19 = vld [vmem:[%s11203_s4 + $0x78] sm:$0xff]  }
 0x7e5   :  { %5735 = vmatprep.mubr.bf16.mxu1 %v8978_v46  ;;  %5704 = vmatpush1.bf16.msra.mxu1 %v8826_v2 }
 0x7e6   :  { %5705 = vmatprep.subr.bf16.mxu1 %v8831_v3  ;;  %v8837_v3 = vld [vmem:[%s11215_s11 + $0x7c] ss:$48 sps:$4 sm:$0xff]  }
 0x7e9   :  { %5706 = vmatpush1.bf16.msra.mxu1 %v8829_v4  ;;  %v8835_v4 = vld [vmem:[%s11215_s11 + $0x78] ss:$48 sps:$4 sm:$0xff]  }
 0x7ea   :  { %5785 = vmatprep.subr.bf16.mxu1 %v8834_v7  ;;  %v8840_v7 = vld [vmem:[%s11215_s11 + $0x2c] ss:$48 sps:$4 sm:$0xff]  }
 0x84f   :  { %v8024_v8 = vpop.f32.mrb[80].mxu0 }
 0x850   :  { %v8025_v9 = vpop.f32.mrb[81].mxu0 }
 0x851   :  { %v8026_v45 = vadd.f32 %v8025_v9, %v8024_v8  ;;  %v8027_v17 = vpop.f32.mrb[82].mxu0  ;;  %v8838_v8 = vld [vmem:[%s11215_s11 + $0x28] ss:$48 sps:$4 sm:$0xff]   ;;  %v8843_v9 = vld [vmem:[%s11215_s11 + $0x8c] ss:$48 sps:$4 sm:$0xff]  }
 0x852   :  { %v8028_v18 = vpop.f32.mrb[83].mxu0  ;;  %v8844_v17 = vld [vmem:[%s11216_s12 + $0xc0] sm:$0xff]  }
 0x853   :  { %v5010_v26 = vadd.f32 %v8026_v45, %v7515_v20  ;;  %v8841_v45 = vld [vmem:[%s11215_s11 + $0x88] ss:$48 sps:$4 sm:$0xff]   ;;  %v8845_v18 = vld [vmem:[%s11216_s12 + $0x80] sm:$0xff]  }
 0x854   :  { %v8846_v20 = vld [vmem:[%s11216_s12 + $0xc8] sm:$0xff]  }
 0x857   :  { %v8046_v21 = vpop.f32.mrb[60].mxu1 }
 0x858   :  { %v8047_v24 = vpop.f32.mrb[61].mxu1 }
 0x859   :  { %v8048_v10 = vadd.f32 %v8047_v24, %v8046_v21  ;;  %v8049_v27 = vpop.f32.mrb[62].mxu1  ;;  %v8847_v21 = vld [vmem:[%s11216_s12 + $0x88] sm:$0xff]   ;;  %v8849_v24 = vld [vmem:[%s11216_s12 + $0xd0] sm:$0xff]  }
 0x85a   :  { %v8050_v28 = vpop.f32.mrb[63].mxu1  ;;  %v8853_v27 = vld [vmem:[%s11216_s12 + $0x98] sm:$0xff]  }
 0x85b   :  { %v5050_v30 = vadd.f32 %v8048_v10, %v5010_v26  ;;  %v8850_v26 = vld [vmem:[%s11216_s12 + $0x90] sm:$0xff]   ;;  %v8852_v10 = vld [vmem:[%s11216_s12 + $0xd8] sm:$0xff]   ;;  %v8854_v28 = vld [vmem:[%s11203_s4 + $0x80] sm:$0xff]  }
 0x86f   :  { %v8068_v57 = vpop.f32.mrb[84].mxu0 }
 0x870   :  { %v8069_v31 = vpop.f32.mrb[85].mxu0 }
 0x871   :  { %v8070_v32 = vadd.f32 %v8069_v31, %v8068_v57  ;;  %v8071_v33 = vpop.f32.mrb[86].mxu0  ;;  %v8856_v57 = vld [vmem:[%s11216_s12 + $0xa0] sm:$0xff]   ;;  %v8857_v31 = vld [vmem:[%s11203_s4 + $0x88] ss:$0 sps:$4 sm:$0x33]  }
 0x872   :  { %v8072_v34 = vpop.f32.mrb[87].mxu0  ;;  %v8858_v33 = vld [vmem:[%s11216_s12 + $0xe8] sm:$0xff]  }
 0x873   :  { %v5090_v35 = vadd.f32 %v8070_v32, %v5050_v30  ;;  %v8855_v30 = vld [vmem:[%s11216_s12 + $0xe0] sm:$0xff]   ;;  %v5339_v32 = vand.u32 %v8857_v31, %v9090_v12  ;;  %v8859_v34 = vld [vmem:[%s11216_s12 + $0xa8] sm:$0xff]   ;;  %v8864_v12 = vld [vmem:[%s11216_s12 + $0xb0] sm:$0xff]  }
 0x874   :  { %v8884_v31 = vld [vmem:[%s11216_s12 + $0x190] sm:$0xff]  }
 0x877   :  { %v8090_v36 = vpop.f32.mrb[64].mxu1 }
 0x878   :  { %v8091_v6 = vpop.f32.mrb[65].mxu1 }
 0x879   :  { %v8092_v37 = vadd.f32 %v8091_v6, %v8090_v36  ;;  %v8093_v38 = vpop.f32.mrb[66].mxu1  ;;  %v8863_v36 = vld [vmem:[%s11216_s12 + $0xf0] sm:$0xff]   ;;  %v8868_v6 = vld [vmem:[%s11216_s12 + $0xf8] sm:$0xff]  }
 0x87a   :  { %v8094_v39 = vpop.f32.mrb[67].mxu1  ;;  %v8873_v38 = vld [vmem:[%s11216_s12 + $0x1c0] sm:$0xff]  }
 0x87b   :  { %v5130_v42 = vadd.f32 %v8092_v37, %v5090_v35  ;;  %v8862_v35 = vld [vmem:[%s11215_s11 + $0x4] ss:$48 sps:$4 sm:$0xff]   ;;  %v8869_v37 = vld [vmem:[%s11216_s12 + $0xb8] sm:$0xff]  }
 0x87c   :  { %v7611_v39 = vld [vmem:[%s11206_s3 + $0x1f] ss:$0 sm:$0xff] }
 0x88f   :  { %v8112_v14 = vpop.f32.mrb[88].mxu0 }
 0x890   :  { %v8113_v43 = vpop.f32.mrb[89].mxu0 }
 0x891   :  { %v8114_v44 = vadd.f32 %v8113_v43, %v8112_v14  ;;  %v8115_v47 = vpop.f32.mrb[90].mxu0 }
 0x892   :  { %v8116_v29 = vpop.f32.mrb[91].mxu0  ;;  %v10797_v47 = vld [vmem:[%s11206_s3 + $0x33] sm:$0xff] }
 0x893   :  { %v5170_v50 = vadd.f32 %v8114_v44, %v5130_v42 }
 0x8af   :  { %v5209_v51 = vpop.f32.mrb[68].mxu1 }
 0x8b0   :  { %v5210_v52 = vadd.f32 %v5209_v51, %v5170_v50  ;;  %v5211_v53 = vpop.f32.mrb[69].mxu1  ;;  %v8860_v51 = vld [vmem:[%s11215_s11] ss:$48 sps:$4 sm:$0xff]  }
 0x8b1   :  { %v5212_v54 = vpop.f32.mrb[70].mxu1  ;;  %v5490_v53 = vrot.slane %v10797_v47, %v9370_v13 }
 0x8b2   :  { %v5215_v55 = vmax.f32 %v5210_v52, 0.0  ;;  %v5213_v56 = vpop.f32.mrb[71].mxu1  ;;  %v8867_v54 = vld [vmem:[%s11215_s11 + $0x64] ss:$48 sps:$4 sm:$0xff]  }
 0x8b4   :  { %v5223_v25 = vpack.c.bf16 %v5215_v55, %v5215_v55  ;;  %v5494_v55 = vrot.slane %v10797_v47, %v9381_v16 }
 0x8b6   :  { %8313 = vmatmul.mubr.msk.bf16.vlgmr.msra.gmra.mrb[92].mxu0 %vm167_vm4, %v5223_v25 }
 0x8b7   :  { %v5443_v41 = vpop.f32.mrb[72].mxu1  ;;  %8317 = vmatpush3.bf16.msra.mxu0 %v8848_v5  ;;  %8324 = vmatprep.mubr.msk.bf16.mxu0 %vm8976_vm0, %v8975_v0  ;;  %v8865_v5 = vld [vmem:[%s11215_s11 + $0x60] ss:$48 sps:$4 sm:$0xff]  }
 0x8b8   :  { %v5444_v60 = vadd.f32 %v7623_v59, %v5443_v41  ;;  %v8334_v61 = vpop.f32.mrb[73].mxu1  ;;  %8318 = vmatprep.subr.bf16.mxu0 %v8975_v0  ;;  %v8872_v41 = vld [vmem:[%s11215_s11 + $0x14] ss:$48 sps:$4 sm:$0xff]  }
 0x8b9   :  { %v5446_v40 = vpop.f32.mrb[74].mxu1 }
 0x8ba   :  { %v5449_v62 = vmax.f32 %v5444_v60, 0.0  ;;  %v8335_v63 = vpop.f32.mrb[75].mxu1 }
 0x8bb   :  { %8319 = vmatpush3.bf16.msra.mxu0 %v8851_v19  ;;  %v8870_v63 = vld [vmem:[%s11215_s11 + $0x10] ss:$48 sps:$4 sm:$0xff]  }
 0x8bc   :  { %v10700_v2 = vpack.c.bf16 %v5449_v62, %v5449_v62  ;;  %8320 = vmatprep.subr.bf16.mxu0 %v8975_v0 }
 0x8be   :  { %7652 = vmatmul.mubr.msk.bf16.vlgmr.msra.gmra.mrb[76].mxu1 %vm1851_vm11, %v10700_v2 }
 0x8bf   :  { %5786 = vmatpush1.bf16.msra.mxu1 %v8832_v1  ;;  %5817 = vmatprep.mubr.bf16.mxu1 %v8978_v46  ;;  %v8877_v1 = vld [vmem:[%s11215_s11 + $0x74] ss:$48 sps:$4 sm:$0xff]  }
 0x8c0   :  { %5787 = vmatprep.subr.bf16.mxu1 %v8837_v3  ;;  %8321 = vmatpush3.bf16.msra.mxu0 %v8854_v28  ;;  %v8880_v28 = vld [vmem:[%s11215_s11 + $0x20] ss:$48 sps:$4 sm:$0xff]  }
 0x8c1   :  { %8322 = vmatprep.subr.bf16.mxu0 %v8975_v0 }
 0x8c3   :  { %5788 = vmatpush1.bf16.msra.mxu1 %v8835_v4  ;;  %v5510_v4 = vrot.slane %v10797_v47, %v9413_v49  ;;  %v8875_v49 = vld [vmem:[%s11215_s11 + $0x70] ss:$48 sps:$4 sm:$0xff]  }
 0x8c4   :  { %5867 = vmatprep.subr.bf16.mxu1 %v8840_v7  ;;  %8323 = vmatpush3.bf16.msra.mxu0 %v5339_v32  ;;  %v8874_v7 = vld [vmem:[%s11216_s12 + $0x180] sm:$0xff]   ;;  %v8888_v32 = vld [vmem:[%s11216_s12 + $0x1d8] sm:$0xff]  }
 0x8c5   :  { %5662 = vmatprep.subr.bf16.mxu0 %v8862_v35 }
 0x8c6   :  { %7654 = vmatmul.mubr.msk.bf16.vlgmr.msra.gmra.mrb[80].mxu1 %vm1851_vm11, %v10700_v2 }
 0x8c7   :  { %5868 = vmatpush1.bf16.msra.mxu1 %v8838_v8  ;;  %5899 = vmatprep.mubr.bf16.mxu1 %v8978_v46 }
 0x8c8   :  { %5869 = vmatprep.subr.bf16.mxu1 %v8843_v9  ;;  %v8878_v9 = vld [vmem:[%s11216_s12 + $0x1c8] sm:$0xff]  }
 0x8cb   :  { %5870 = vmatpush1.bf16.msra.mxu1 %v8841_v45 }
 0x8cc   :  { %8153 = vmatprep.subr.bf16.mxu1 %v8844_v17 }
 0x8ce   :  { %7656 = vmatmul.mubr.msk.bf16.vlgmr.msra.gmra.mrb[84].mxu1 %vm1851_vm11, %v10700_v2 }
 0x8cf   :  { %8154 = vmatpush3.bf16.msra.mxu1 %v8845_v18  ;;  %v8882_v18 = vld [vmem:[%s11215_s11 + $0x24] ss:$48 sps:$4 sm:$0xff]  }
 0x8d0   :  { %8155 = vmatprep.subr.bf16.mxu1 %v8846_v20 }
 0x8d3   :  { %8156 = vmatpush3.bf16.msra.mxu1 %v8847_v21 }
 0x8d4   :  { %8157 = vmatprep.subr.bf16.mxu1 %v8849_v24  ;;  %v8879_v24 = vld [vmem:[%s11216_s12 + $0x188] sm:$0xff]  }
 0x8d7   :  { %8158 = vmatpush3.bf16.msra.mxu1 %v8850_v26 }
 0x8d8   :  { %8159 = vmatprep.subr.bf16.mxu1 %v8852_v10  ;;  %v8883_v10 = vld [vmem:[%s11216_s12 + $0x1d0] sm:$0xff]  }
 0x8db   :  { %8160 = vmatpush3.bf16.msra.mxu1 %v8853_v27 }
 0x8dc   :  { %8161 = vmatprep.subr.bf16.mxu1 %v8855_v30  ;;  %v8887_v30 = vld [vmem:[%s11215_s11 + $0x84] ss:$48 sps:$4 sm:$0xff]  }
 0x8df   :  { %8162 = vmatpush3.bf16.msra.mxu1 %v8856_v57 }
 0x8e0   :  { %8163 = vmatprep.subr.bf16.mxu1 %v8858_v33 }
 0x8e3   :  { %8164 = vmatpush3.bf16.msra.mxu1 %v8859_v34  ;;  %v8885_v34 = vld [vmem:[%s11215_s11 + $0x80] ss:$48 sps:$4 sm:$0xff]  }
 0x8e4   :  { %8165 = vmatprep.subr.bf16.mxu1 %v8863_v36  ;;  %v8912_v36 = vld [vmem:[%s11216_s12 + $0x40] sm:$0xff]  }
 0x8e7   :  { %8166 = vmatpush3.bf16.msra.mxu1 %v8864_v12 }
 0x8e8   :  { %8167 = vmatprep.subr.bf16.mxu1 %v8868_v6  ;;  %v8889_v6 = vld [vmem:[%s11216_s12 + $0x198] sm:$0xff]  }
 0x8eb   :  { %8168 = vmatpush3.bf16.msra.mxu1 %v8869_v37 }
 0x8ec   :  { %8197 = vmatprep.subr.bf16.mxu1 %v8873_v38  ;;  %v8890_v38 = vld [vmem:[%s11216_s12 + $0x1e0] sm:$0xff]  }
 0x989   :  { %v5292_v42 = vpop.f32.mrb[92].mxu0 }
 0x98a   :  { %v5293_v14 = vadd.f32 %v7611_v39, %v5292_v42  ;;  %v8314_v43 = vpop.f32.mrb[93].mxu0  ;;  %v8913_v39 = vld [vmem:[%s11216_s12] sm:$0xff]   ;;  %v8914_v42 = vld [vmem:[%s11216_s12 + $0x48] sm:$0xff]  }
 0x98b   :  { %v5295_v44 = vpop.f32.mrb[94].mxu0  ;;  %v8892_v43 = vld [vmem:[%s11216_s12 + $0x1e8] sm:$0xff]  }
 0x98c   :  { %v5298_v29 = vmax.f32 %v5293_v14, 0.0  ;;  %v8315_v50 = vpop.f32.mrb[95].mxu0  ;;  %v8891_v14 = vld [vmem:[%s11216_s12 + $0x1a0] sm:$0xff]   ;;  %v8915_v44 = vld [vmem:[%s11216_s12 + $0x8] sm:$0xff]  }
 0x98d   :  { %v8893_v50 = vld [vmem:[%s11216_s12 + $0x1a8] sm:$0xff]  }
 0x98e   :  { %v5306_v52 = vpack.c.bf16 %v5298_v29, %v5298_v29  ;;  %v10897_v29 = vld [vmem:[%s11206_s3 + $0x3b] sm:$0xf] }
 0x990   :  { %8325 = vmatmul.mubr.msk.bf16.vlgmr.msra.gmra.mrb[96].mxu0 %vm167_vm4, %v5306_v52  ;;  %v8894_v52 = vld [vmem:[%s11216_s12 + $0x1f0] sm:$0xff]  }
 0x991   :  { %5663 = vmatpush1.bf16.msra.mxu0 %v8860_v51  ;;  %v5737_v56 = vpop.f32.mrb[76].mxu1  ;;  %5694 = vmatprep.mubr.bf16.mxu0 %v8978_v46  ;;  %v5506_v51 = vrot.slane %v10797_v47, %v9459_v23  ;;  %v8895_v23 = vld [vmem:[%s11216_s12 + $0x1b0] sm:$0xff]  }
 0x992   :  { %v5738_v25 = vadd.f32 %v5737_v56, %v5490_v53  ;;  %v5739_v59 = vpop.f32.mrb[77].mxu1  ;;  %5664 = vmatprep.subr.bf16.mxu0 %v8867_v54  ;;  %v5526_v53 = vrot.slane %v10897_v29, %v9381_v16  ;;  %v8917_v54 = vld [vmem:[%s11216_s12 + $0x10] sm:$0xff]   ;;  %v8896_v16 = vld [vmem:[%s11216_s12 + $0x1f8] sm:$0xff]  }
 0x993   :  { %v5740_v19 = vadd.f32 %v5739_v59, %v5494_v55  ;;  %v5741_v60 = vpop.f32.mrb[78].mxu1  ;;  %v8918_v55 = vld [vmem:[%s11216_s12 + $0x58] sm:$0xff]  }
 0x994   :  { %v5910_v61 = vmax.f32 %v5738_v25, 0.0  ;;  %v5742_v40 = vpop.f32.mrb[79].mxu1  ;;  %v8919_v25 = vld [vmem:[%s11216_s12 + $0x18] sm:$0xff]   ;;  %v8898_v60 = vld [vmem:[%s11216_s12 + $0x280] sm:$0xff]  }
 0x995   :  { %v5911_v62 = vmax.f32 %v5740_v19, 0.0  ;;  %5665 = vmatpush1.bf16.msra.mxu0 %v8865_v5  ;;  %v8897_v59 = vld [vmem:[%s11216_s12 + $0x1b8] sm:$0xff]  }
 0x996   :  { %5744 = vmatprep.subr.bf16.mxu0 %v8872_v41  ;;  %v5922_v8 = vpack.c.bf16 %v5910_v61, %v5910_v61 }
 0x997   :  { %v5923_v3 = vpack.c.bf16 %v5911_v62, %v5911_v62  ;;  %v8899_v62 = vld [vmem:[%s11216_s12 + $0x288] sm:$0xff]  }
 0x998   :  { %7651 = vmatmul.mubr.msk.bf16.vlgmr.msra.gmra.mrb[100].mxu0 %vm1851_vm11, %v10700_v2 }
 0x999   :  { %5745 = vmatpush1.bf16.msra.mxu0 %v8870_v63  ;;  %v10833_v45 = vpop.f32.mrb[80].mxu1  ;;  %6768 = vmatprep.mubr.bf16.mxu1 %v5923_v3  ;;  %v8900_v63 = vld [vmem:[%s11216_s12 + $0x290] sm:$0xff]   ;;  %v8902_v3 = vld [vmem:[%s11216_s12 + $0x2a0] sm:$0xff]  }
 0x99a   :  { %v5821_v17 = vpop.f32.mrb[81].mxu1  ;;  %6769 = vmatmul.mubr.bf16.vlgmr.msra.gmra.mrb[88].mxu1 %v5922_v8  ;;  %5746 = vmatprep.subr.bf16.mxu0 %v8877_v1  ;;  %v5820_v56 = vadd.f32 %v10833_v45, %v5506_v51  ;;  %v8901_v1 = vld [vmem:[%s11216_s12 + $0x298] sm:$0xff]   ;;  %v8907_v45 = vld [vmem:[%s11216_s12 + $0x2c8] sm:$0xff]  }
 0x99b   :  { %v5822_v20 = vadd.f32 %v5821_v17, %v5510_v4  ;;  %8198 = vmatpush3.bf16.msra.mxu1 %v8874_v7  ;;  %v5823_v21 = vpop.f32.mrb[82].mxu1  ;;  %5776 = vmatprep.mubr.bf16.mxu0 %v8978_v46  ;;  %v8903_v4 = vld [vmem:[%s11216_s12 + $0x2a8] sm:$0xff]   ;;  %v8904_v7 = vld [vmem:[%s11216_s12 + $0x2b0] sm:$0xff]   ;;  %v8905_v8 = vld [vmem:[%s11216_s12 + $0x2b8] sm:$0xff]  }
 0x99c   :  { %v5824_v26 = vpop.f32.mrb[83].mxu1  ;;  %8199 = vmatprep.subr.bf16.mxu1 %v8878_v9  ;;  %v5914_v41 = vmax.f32 %v5820_v56, 0.0  ;;  %v8906_v9 = vld [vmem:[%s11216_s12 + $0x2c0] sm:$0xff]   ;;  %v5522_v21 = vrot.slane %v10897_v29, %v9370_v13  ;;  %v8911_v13 = vld [vmem:[%s11216_s12 + $0x2e8] sm:$0x3f]  }
 0x99d   :  { %v5915_v27 = vmax.f32 %v5822_v20, 0.0  ;;  %5747 = vmatpush1.bf16.msra.mxu0 %v8875_v49  ;;  %v8908_v49 = vld [vmem:[%s11216_s12 + $0x2d0] sm:$0xff]   ;;  %v8920_v17 = vld [vmem:[%s11216_s12 + $0x60] sm:$0xff]   ;;  %v8923_v26 = vld [vmem:[%s11216_s12 + $0x28] sm:$0xff]  }
 0x99e   :  { %5826 = vmatprep.subr.bf16.mxu0 %v8882_v18  ;;  %v5926_v61 = vpack.c.bf16 %v5914_v41, %v5914_v41  ;;  %v8909_v18 = vld [vmem:[%s11216_s12 + $0x2d8] sm:$0xff]   ;;  %v8921_v20 = vld [vmem:[%s11216_s12 + $0x20] sm:$0xff]  }
 0x99f   :  { %v5927_v57 = vpack.c.bf16 %v5915_v27, %v5915_v27  ;;  %8200 = vmatpush3.bf16.msra.mxu1 %v8879_v24  ;;  %v8922_v24 = vld [vmem:[%s11216_s12 + $0x68] sm:$0xff]  }
 0x9a0   :  { %7653 = vmatmul.mubr.msk.bf16.vlgmr.msra.gmra.mrb[104].mxu0 %vm1851_vm11, %v10700_v2  ;;  %8201 = vmatprep.subr.bf16.mxu1 %v8883_v10  ;;  %v8910_v10 = vld [vmem:[%s11216_s12 + $0x2e0] sm:$0xff]  }
 0x9a1   :  { %5827 = vmatpush1.bf16.msra.mxu0 %v8880_v28  ;;  %v10862_v33 = vpop.f32.mrb[84].mxu1  ;;  %6848 = vmatprep.mubr.bf16.mxu1 %v5927_v57  ;;  %v8924_v28 = vld [vmem:[%s11216_s12 + $0x70] sm:$0xff]  }
 0x9a2   :  { %v5903_v35 = vpop.f32.mrb[85].mxu1  ;;  %5828 = vmatprep.subr.bf16.mxu0 %v8887_v30  ;;  %5858 = vmatprep.mubr.bf16.mxu0 %v8978_v46  ;;  %v5902_v27 = vadd.f32 %v10862_v33, %v5522_v21  ;;  %v8925_v30 = vld [vmem:[%s11216_s12 + $0x30] sm:$0xff]   ;;  %v8927_v33 = vld [vmem:[%s11216_s12 + $0x38] sm:$0xff]   ;;  %v8937_v21 = vld [vmem:[%s11216_s12 + $0x120] sm:$0xff]  }
 0x9a3   :  { %8202 = vmatpush3.bf16.msra.mxu1 %v8884_v31  ;;  %v5905_v12 = vpop.f32.mrb[86].mxu1  ;;  %v5904_v5 = vadd.f32 %v5903_v35, %v5526_v53  ;;  %v6694_v31 = vsel %vm1607_vm8, %v8911_v13, 0  ;;  %v7617_v35 = vld [vmem:[%s11206_s3 + $0x20] ss:$0 sm:$0xff]  ;;  %v5518_v13 = vrot.slane %v10897_v29, %v9378_v15 }
 0x9a4   :  { %v5906_v37 = vpop.f32.mrb[87].mxu1  ;;  %8203 = vmatprep.subr.bf16.mxu1 %v8888_v32  ;;  %v5918_v57 = vmax.f32 %v5902_v27, 0.0  ;;  %v8926_v32 = vld [vmem:[%s11216_s12 + $0x78] sm:$0xff]   ;;  %v8940_v27 = vld [vmem:[%s11216_s12 + $0x170] sm:$0xff]  }
 0x9a5   :  { %5829 = vmatpush1.bf16.msra.mxu0 %v8885_v34  ;;  %v5919_v19 = vmax.f32 %v5904_v5, 0.0 }
 0x9a6   :  { %8131 = vmatprep.subr.bf16.mxu0 %v8912_v36  ;;  %v5930_v34 = vpack.c.bf16 %v5918_v57, %v5918_v57  ;;  %v8942_v57 = vld [vmem:[%s11216_s12 + $0x178] sm:$0xff]  }
 0x9a7   :  { %8204 = vmatpush3.bf16.msra.mxu1 %v8889_v6  ;;  %v5931_v40 = vpack.c.bf16 %v5919_v19, %v5919_v19  ;;  %v8930_v19 = vld [vmem:[%s11216_s12 + $0x148] sm:$0xff]  }
 0x9a8   :  { %7655 = vmatmul.mubr.msk.bf16.vlgmr.msra.gmra.mrb[108].mxu0 %vm1851_vm11, %v10700_v2  ;;  %8205 = vmatprep.subr.bf16.mxu1 %v8890_v38  ;;  %v8916_v2 = vld [vmem:[%s11216_s12 + $0x50] sm:$0xff]  }
 0x9a9   :  { %8132 = vmatpush3.bf16.msra.mxu0 %v8913_v39  ;;  %v5482_v39 = vrot.slane %v10797_v47, %v9367_v11 }
 0x9aa   :  { %8133 = vmatprep.subr.bf16.mxu0 %v8914_v42  ;;  %v5486_v42 = vrot.slane %v10797_v47, %v9378_v15 }
 0x9ab   :  { %8206 = vmatpush3.bf16.msra.mxu1 %v8891_v14 }
 0x9ac   :  { %8207 = vmatprep.subr.bf16.mxu1 %v8892_v43 }
 0x9ad   :  { %8134 = vmatpush3.bf16.msra.mxu0 %v8915_v44 }
 0x9ae   :  { %8135 = vmatprep.subr.bf16.mxu0 %v8916_v2 }
 0x9af   :  { %8208 = vmatpush3.bf16.msra.mxu1 %v8893_v50 }
 0x9b0   :  { %8209 = vmatprep.subr.bf16.mxu1 %v8894_v52 }
 0x9b1   :  { %8136 = vmatpush3.bf16.msra.mxu0 %v8917_v54 }
 0x9b2   :  { %8137 = vmatprep.subr.bf16.mxu0 %v8918_v55 }
 0x9b3   :  { %8210 = vmatpush3.bf16.msra.mxu1 %v8895_v23 }
 0x9b4   :  { %8211 = vmatprep.subr.bf16.mxu1 %v8896_v16 }
 0x9b5   :  { %8138 = vmatpush3.bf16.msra.mxu0 %v8919_v25  ;;  %v5502_v25 = vrot.slane %v10797_v47, %v9410_v48  ;;  %v8931_v48 = vld [vmem:[%s11216_s12 + $0x108] sm:$0xff]  }
 0x9b6   :  { %8139 = vmatprep.subr.bf16.mxu0 %v8920_v17  ;;  %v8935_v17 = vld [vmem:[%s11216_s12 + $0x118] sm:$0xff]  }
 0x9b7   :  { %8212 = vmatpush3.bf16.msra.mxu1 %v8897_v59  ;;  %v8929_v59 = vld [vmem:[%s11216_s12 + $0x100] sm:$0xff]  }
 0x9b8   :  { %6896 = vmatprep.subr.bf16.mxu1 %v8978_v46 }
 0x9b9   :  { %8140 = vmatpush3.bf16.msra.mxu0 %v8921_v20  ;;  %v8936_v20 = vld [vmem:[%s11216_s12 + $0x160] sm:$0xff]  }
 0x9ba   :  { %6849 = vmatmul.mubr.bf16.vlgmr.msra.gmra.mrb[92].mxu1 %v5926_v61  ;;  %8141 = vmatprep.subr.bf16.mxu0 %v8922_v24  ;;  %v8938_v24 = vld [vmem:[%s11216_s12 + $0x168] sm:$0xff]  }
 0x9bb   :  { %6897 = vmatpush1.bf16.msra.mxu1 %v8898_v60  ;;  %7752 = vmatprep.mubr.msk.bf16.mxu1 %vm1603_vm6, %v5931_v40 }
 0x9bc   :  { %6898 = vmatprep.subr.bf16.mxu1 %v8978_v46 }
 0x9bd   :  { %8142 = vmatpush3.bf16.msra.mxu0 %v8923_v26  ;;  %v8939_v26 = vld [vmem:[%s11216_s12 + $0x128] sm:$0xff]  }
 0x9be   :  { %8143 = vmatprep.subr.bf16.mxu0 %v8924_v28  ;;  %v8941_v28 = vld [vmem:[%s11216_s12 + $0x130] sm:$0xff]  }
 0x9bf   :  { %6899 = vmatpush1.bf16.msra.mxu1 %v8899_v62 }
 0x9c0   :  { %6900 = vmatprep.subr.bf16.mxu1 %v8978_v46 }
 0x9c1   :  { %8144 = vmatpush3.bf16.msra.mxu0 %v8925_v30 }
 0x9c2   :  { %8145 = vmatprep.subr.bf16.mxu0 %v8926_v32 }
 0x9c3   :  { %6901 = vmatpush1.bf16.msra.mxu1 %v8900_v63 }
 0x9c4   :  { %6902 = vmatprep.subr.bf16.mxu1 %v8978_v46 }
 0x9c5   :  { %8146 = vmatpush3.bf16.msra.mxu0 %v8927_v33  ;;  %v8944_v33 = vld [vmem:[%s11216_s12 + $0x240] sm:$0xff]  }
 0x9c7   :  { %6903 = vmatpush1.bf16.msra.mxu1 %v8901_v1  ;;  %v8932_v1 = vld [vmem:[%s11216_s12 + $0x150] sm:$0xff]  }
 0x9c8   :  { %6904 = vmatprep.subr.bf16.mxu1 %v8978_v46 }
 0x9cb   :  { %6905 = vmatpush1.bf16.msra.mxu1 %v8902_v3 }
 0x9cc   :  { %6906 = vmatprep.subr.bf16.mxu1 %v8978_v46 }
 0x9cf   :  { %6907 = vmatpush1.bf16.msra.mxu1 %v8903_v4 }
 0x9d0   :  { %6908 = vmatprep.subr.bf16.mxu1 %v8978_v46 }
 0x9d3   :  { %6909 = vmatpush1.bf16.msra.mxu1 %v8904_v7  ;;  %v8933_v7 = vld [vmem:[%s11216_s12 + $0x110] sm:$0xff]  }
 0x9d4   :  { %6910 = vmatprep.subr.bf16.mxu1 %v8978_v46 }
 0x9d7   :  { %6911 = vmatpush1.bf16.msra.mxu1 %v8905_v8  ;;  %v8934_v8 = vld [vmem:[%s11216_s12 + $0x158] sm:$0xff]  }
 0x9d8   :  { %6912 = vmatprep.subr.bf16.mxu1 %v8978_v46 }
 0x9db   :  { %6913 = vmatpush1.bf16.msra.mxu1 %v8906_v9 }
 0x9dc   :  { %6914 = vmatprep.subr.bf16.mxu1 %v8978_v46 }
 0x9df   :  { %6915 = vmatpush1.bf16.msra.mxu1 %v8907_v45 }
 0x9e0   :  { %6916 = vmatprep.subr.bf16.mxu1 %v8978_v46 }
 0x9e3   :  { %6917 = vmatpush1.bf16.msra.mxu1 %v8908_v49 }
 0x9e4   :  { %6918 = vmatprep.subr.bf16.mxu1 %v8978_v46 }
 0x9e7   :  { %6919 = vmatpush1.bf16.msra.mxu1 %v8909_v18 }
 0x9e8   :  { %6920 = vmatprep.subr.bf16.mxu1 %v8978_v46 }
 0x9eb   :  { %6921 = vmatpush1.bf16.msra.mxu1 %v8910_v10  ;;  %v5498_v10 = vrot.slane %v10797_v47, %v9456_v22 }
 0x9ec   :  { %6922 = vmatprep.subr.bf16.mxu1 %v8978_v46  ;;  %v8928_v46 = vld [vmem:[%s11216_s12 + $0x140] sm:$0xff]  }
 0x9ed   :  { %8175 = vmatprep.subr.bf16.mxu0 %v8928_v46 }
 0x9ef   :  { %6923 = vmatpush1.bf16.msra.mxu1 %v6694_v31  ;;  %v8943_v31 = vld [vmem:[%s11216_s12 + $0x138] sm:$0xff]  }
 0x9f2   :  { %6929 = vmatmul.mubr.bf16.vlgmr.msra.gmra.mrb[96].mxu1 %v5930_v34 }
 0xa63   :  { %v5375_v36 = vpop.f32.mrb[96].mxu0 }
 0xa64   :  { %v5376_v12 = vadd.f32 %v7617_v35, %v5375_v36  ;;  %v8326_v6 = vpop.f32.mrb[97].mxu0 }
 0xa65   :  { %v5378_v37 = vpop.f32.mrb[98].mxu0 }
 0xa66   :  { %5381 = vst.msk [vmem:[%s11211_s13] sm:$0xff] %vm86_vm1, %v5376_v12  ;;  %v8327_v38 = vpop.f32.mrb[99].mxu0  ;;  %v8945_v12 = vld [vmem:[%s11216_s12 + $0x200] sm:$0xff]   ;;  %v8946_v37 = vld [vmem:[%s11216_s12 + $0x248] sm:$0xff]  }
 0xa6b   :  { %v5696_v14 = vpop.f32.mrb[100].mxu0 }
 0xa6c   :  { %v5697_v43 = vadd.f32 %v5696_v14, %v5482_v39  ;;  %v5698_v44 = vpop.f32.mrb[101].mxu0  ;;  %v8947_v39 = vld [vmem:[%s11216_s12 + $0x208] sm:$0xff]   ;;  %v8949_v14 = vld [vmem:[%s11216_s12 + $0x210] sm:$0xff]  }
 0xa6d   :  { %v5699_v2 = vadd.f32 %v5698_v44, %v5486_v42  ;;  %v5700_v50 = vpop.f32.mrb[102].mxu0  ;;  %v8169_v51 = vpop.f32.mrb[88].mxu1  ;;  %v8948_v42 = vld [vmem:[%s11216_s12 + $0x250] sm:$0xff]   ;;  %v8951_v44 = vld [vmem:[%s11216_s12 + $0x218] sm:$0xff]  }
 0xa6e   :  { %v5908_v52 = vmax.f32 %v5697_v43, 0.0  ;;  %v5701_v53 = vpop.f32.mrb[103].mxu0  ;;  %v8170_v54 = vpop.f32.mrb[89].mxu1  ;;  %v8950_v43 = vld [vmem:[%s11216_s12 + $0x258] sm:$0xff]   ;;  %v8953_v50 = vld [vmem:[%s11216_s12 + $0x220] sm:$0xff]  }
 0xa6f   :  { %v5909_v55 = vmax.f32 %v5699_v2, 0.0  ;;  %v11030_v23 = vadd.f32 %v8170_v54, %v8169_v51  ;;  %v8172_v56 = vpop.f32.mrb[90].mxu1  ;;  %v8952_v2 = vld [vmem:[%s11216_s12 + $0x260] sm:$0xff]   ;;  %v8954_v51 = vld [vmem:[%s11216_s12 + $0x268] sm:$0xff]   ;;  %v5514_v53 = vrot.slane %v10897_v29, %v9367_v11  ;;  %v8956_v54 = vld [vmem:[%s11216_s12 + $0x270] sm:$0xff]  }
 0xa70   :  { %v8173_v16 = vpop.f32.mrb[91].mxu1  ;;  %v5920_v41 = vpack.c.bf16 %v5908_v52, %v5908_v52  ;;  %v8955_v52 = vld [vmem:[%s11216_s12 + $0x228] sm:$0xff]   ;;  %v8959_v11 = vld [vmem:[%s11216_s12 + $0x238] sm:$0xff]  }
 0xa71   :  { %v5921_v5 = vpack.c.bf16 %v5909_v55, %v5909_v55  ;;  %v8957_v55 = vld [vmem:[%s11216_s12 + $0x230] sm:$0xff]   ;;  %v8958_v16 = vld [vmem:[%s11216_s12 + $0x278] sm:$0xff]  }
 0xa73   :  { %v5778_v60 = vpop.f32.mrb[104].mxu0  ;;  %6728 = vmatprep.mubr.bf16.mxu0 %v5921_v5 }
 0xa74   :  { %v5780_v61 = vpop.f32.mrb[105].mxu0  ;;  %6729 = vmatmul.mubr.bf16.vlgmr.msra.gmra.mrb[112].mxu0 %v5920_v41  ;;  %v5779_v30 = vadd.f32 %v5778_v60, %v5498_v10  ;;  %v8960_v60 = vld [vmem:[%s11203_s4 + $0xd0] sm:$0xff]  }
 0xa75   :  { %v5781_v40 = vadd.f32 %v5780_v61, %v5502_v25  ;;  %8176 = vmatpush3.bf16.msra.mxu0 %v8929_v59  ;;  %v5782_v62 = vpop.f32.mrb[106].mxu0  ;;  %v8961_v61 = vld [vmem:[%s11203_s4 + $0xd8] sm:$0xff]  }
 0xa76   :  { %v5783_v63 = vpop.f32.mrb[107].mxu0  ;;  %8177 = vmatprep.subr.bf16.mxu0 %v8930_v19  ;;  %v5912_v32 = vmax.f32 %v5779_v30, 0.0 }
 0xa77   :  { %v5913_v3 = vmax.f32 %v5781_v40, 0.0  ;;  %v8962_v40 = vld [vmem:[%s11203_s4 + $0xe0] ss:$0 sps:$4 sm:$0x77]   ;;  %v7657_v63 = vld [vmem:[%s11206_s3 + $0x3f] ss:$0 sm:$0xff] }
 0xa78   :  { %v5924_v6 = vpack.c.bf16 %v5912_v32, %v5912_v32  ;;  %v6969_v62 = vsel %vm2000_vm9, %v8962_v40, 0  ;;  %v8965_v32 = vld [vmem:[%s11203_s4 + $0xf8] ss:$0 sps:$4 sm:$0x77]  }
 0xa79   :  { %v5925_v4 = vpack.c.bf16 %v5913_v3, %v5913_v3  ;;  %8178 = vmatpush3.bf16.msra.mxu0 %v8931_v48 }
 0xa7a   :  { %8179 = vmatprep.subr.bf16.mxu0 %v8932_v1 }
 0xa7b   :  { %v11052_v9 = vpop.f32.mrb[108].mxu0  ;;  %6808 = vmatprep.mubr.bf16.mxu0 %v5925_v4 }
 0xa7c   :  { %v5862_v45 = vpop.f32.mrb[109].mxu0  ;;  %v5861_v56 = vadd.f32 %v11052_v9, %v5514_v53 }
 0xa7d   :  { %8180 = vmatpush3.bf16.msra.mxu0 %v8933_v7  ;;  %v5864_v49 = vpop.f32.mrb[110].mxu0  ;;  %v5863_v22 = vadd.f32 %v5862_v45, %v5518_v13 }
 0xa7e   :  { %v5865_v18 = vpop.f32.mrb[111].mxu0  ;;  %8181 = vmatprep.subr.bf16.mxu0 %v8934_v8  ;;  %v5916_v29 = vmax.f32 %v5861_v56, 0.0 }
 0xa7f   :  { %v5917_v34 = vmax.f32 %v5863_v22, 0.0 }
 0xa80   :  { %v5928_v5 = vpack.c.bf16 %v5916_v29, %v5916_v29 }
 0xa81   :  { %8182 = vmatpush3.bf16.msra.mxu0 %v8935_v17  ;;  %v5929_v38 = vpack.c.bf16 %v5917_v34, %v5917_v34 }
 0xa82   :  { %8183 = vmatprep.subr.bf16.mxu0 %v8936_v20 }
 0xa85   :  { %8184 = vmatpush3.bf16.msra.mxu0 %v8937_v21 }
 0xa86   :  { %8185 = vmatprep.subr.bf16.mxu0 %v8938_v24 }
 0xa89   :  { %8186 = vmatpush3.bf16.msra.mxu0 %v8939_v26 }
 0xa8a   :  { %8187 = vmatprep.subr.bf16.mxu0 %v8940_v27 }
 0xa8d   :  { %8188 = vmatpush3.bf16.msra.mxu0 %v8941_v28  ;;  %v8213_v47 = vpop.f32.mrb[92].mxu1 }
 0xa8e   :  { %v8214_v15 = vpop.f32.mrb[93].mxu1  ;;  %8189 = vmatprep.subr.bf16.mxu0 %v8942_v57 }
 0xa8f   :  { %v11088_v46 = vadd.f32 %v8214_v15, %v8213_v47  ;;  %v8216_v35 = vpop.f32.mrb[94].mxu1  ;;  %v7044_v15 = vsel %vm2000_vm9, %v8965_v32, 0 }
 0xa90   :  { %v8217_v36 = vpop.f32.mrb[95].mxu1 }
 0xa91   :  { %8190 = vmatpush3.bf16.msra.mxu0 %v8943_v31  ;;  %v8964_v31 = vld [vmem:[%s11203_s4 + $0xf0] sm:$0xff]  }
 0xa92   :  { %8219 = vmatprep.subr.bf16.mxu0 %v8944_v33  ;;  %v7753_v33 = vld [vmem:[%s11206_s3 + $0x40] ss:$0 sm:$0xff] }
 0xa94   :  { %6809 = vmatmul.mubr.bf16.vlgmr.msra.gmra.mrb[116].mxu0 %v5924_v6 }
 0xa95   :  { %8220 = vmatpush3.bf16.msra.mxu0 %v8945_v12  ;;  %6888 = vmatprep.mubr.bf16.mxu0 %v5929_v38 }
 0xa96   :  { %8221 = vmatprep.subr.bf16.mxu0 %v8946_v37  ;;  %v8966_v37 = vld [vmem:[%s11203_s4 + $0x100] sm:$0xff]  }
 0xa99   :  { %8222 = vmatpush3.bf16.msra.mxu0 %v8947_v39  ;;  %v8967_v39 = vld [vmem:[%s11203_s4 + $0x108] sm:$0xff]  }
 0xa9a   :  { %8223 = vmatprep.subr.bf16.mxu0 %v8948_v42  ;;  %v7087_v42 = vmax.f32 %v10341_v58, 0.0 }
 0xa9d   :  { %8224 = vmatpush3.bf16.msra.mxu0 %v8949_v14  ;;  %v7092_v14 = vpack.c.bf16 %v7087_v42, %v7087_v42 }
 0xa9e   :  { %8225 = vmatprep.subr.bf16.mxu0 %v8950_v43  ;;  %v7758_v43 = vld [vmem:[%s11206_s3 + $0x41] ss:$0 sm:$0xff] }
 0xaa1   :  { %8226 = vmatpush3.bf16.msra.mxu0 %v8951_v44 }
 0xaa2   :  { %8227 = vmatprep.subr.bf16.mxu0 %v8952_v2 }
 0xaa5   :  { %8228 = vmatpush3.bf16.msra.mxu0 %v8953_v50 }
 0xaa6   :  { %8229 = vmatprep.subr.bf16.mxu0 %v8954_v51 }
 0xaa9   :  { %8230 = vmatpush3.bf16.msra.mxu0 %v8955_v52 }
 0xaaa   :  { %8231 = vmatprep.subr.bf16.mxu0 %v8956_v54 }
 0xaad   :  { %8232 = vmatpush3.bf16.msra.mxu0 %v8957_v55 }
 0xaae   :  { %8233 = vmatprep.subr.bf16.mxu0 %v8958_v16 }
 0xab1   :  { %8234 = vmatpush3.bf16.msra.mxu0 %v8959_v11 }
 0xab2   :  { %8336 = vmatprep.subr.bf16.mxu0 %v8975_v0 }
 0xab4   :  { %6889 = vmatmul.mubr.bf16.vlgmr.msra.gmra.mrb[120].mxu0 %v5928_v5 }
 0xab5   :  { %8342 = vmatprep.mubr.msk.bf16.mxu0 %vm8976_vm0, %v8975_v0  ;;  %8337 = vmatpush3.bf16.msra.mxu0 %v8960_v60 }
 0xab6   :  { %8338 = vmatprep.subr.bf16.mxu0 %v8975_v0 }
 0xab9   :  { %8339 = vmatpush3.bf16.msra.mxu0 %v8961_v61 }
 0xaba   :  { %8340 = vmatprep.subr.bf16.mxu0 %v8975_v0 }
 0xabd   :  { %8341 = vmatpush3.bf16.msra.mxu0 %v6969_v62 }
 0xabe   :  { %8346 = vmatprep.subr.bf16.mxu0 %v8975_v0 }
 0xac5   :  { %v6930_v25 = vpop.f32.mrb[96].mxu1 }
 0xac6   :  { %v6932_v59 = vpop.f32.mrb[97].mxu1 }
 0xac7   :  { %v6933_v41 = vpop.f32.mrb[98].mxu1 }
 0xac8   :  { %v6934_v19 = vpop.f32.mrb[99].mxu1 }
 0xb47   :  { %v8147_v48 = vpop.f32.mrb[112].mxu0 }
 0xb48   :  { %v8148_v1 = vpop.f32.mrb[113].mxu0 }
 0xb49   :  { %v8149_v3 = vadd.f32 %v8148_v1, %v8147_v48  ;;  %v8150_v4 = vpop.f32.mrb[114].mxu0 }
 0xb4a   :  { %v8151_v7 = vpop.f32.mrb[115].mxu0 }
 0xb4b   :  { %v6731_v8 = vadd.f32 %v8149_v3, %v7657_v63 }
 0xb4d   :  { %v6771_v9 = vadd.f32 %v11030_v23, %v6731_v8  ;;  %v8963_v23 = vld [vmem:[%s11203_s4 + $0xe8] sm:$0xff]  }
 0xb67   :  { %v8191_v45 = vpop.f32.mrb[116].mxu0 }
 0xb68   :  { %v8192_v49 = vpop.f32.mrb[117].mxu0 }
 0xb69   :  { %v8193_v17 = vadd.f32 %v8192_v49, %v8191_v45  ;;  %v8194_v18 = vpop.f32.mrb[118].mxu0 }
 0xb6a   :  { %v8195_v20 = vpop.f32.mrb[119].mxu0 }
 0xb6b   :  { %v6811_v21 = vadd.f32 %v8193_v17, %v6771_v9 }
 0xb6d   :  { %v6851_v24 = vadd.f32 %v11088_v46, %v6811_v21 }
 0xb87   :  { %v8235_v26 = vpop.f32.mrb[120].mxu0 }
 0xb88   :  { %v8236_v10 = vpop.f32.mrb[121].mxu0 }
 0xb89   :  { %v8237_v27 = vadd.f32 %v8236_v10, %v8235_v26  ;;  %v8238_v13 = vpop.f32.mrb[122].mxu0 }
 0xb8a   :  { %v8239_v28 = vpop.f32.mrb[123].mxu0 }
 0xb8b   :  { %v6891_v30 = vadd.f32 %v8237_v27, %v6851_v24 }
 0xb8d   :  { %v6931_v57 = vadd.f32 %v6930_v25, %v6891_v30 }
 0xb8f   :  { %v6936_v22 = vmax.f32 %v6931_v57, 0.0 }
 0xb91   :  { %v6942_v47 = vpack.c.bf16 %v6936_v22, %v6936_v22 }
 0xb93   :  { %8343 = vmatmul.mubr.msk.bf16.vlgmr.msra.gmra.mrb[124].mxu0 %vm1996_vm10, %v6942_v47 }
 0xb94   :  { %8347 = vmatpush3.bf16.msra.mxu0 %v8963_v23  ;;  %8352 = vmatprep.mubr.msk.bf16.mxu0 %vm8976_vm0, %v8975_v0 }
 0xb95   :  { %8348 = vmatprep.subr.bf16.mxu0 %v8975_v0 }
 0xb98   :  { %8349 = vmatpush3.bf16.msra.mxu0 %v8964_v31 }
 0xb99   :  { %8350 = vmatprep.subr.bf16.mxu0 %v8975_v0 }
 0xb9c   :  { %8351 = vmatpush3.bf16.msra.mxu0 %v7044_v15 }
 0xb9d   :  { %8356 = vmatprep.subr.bf16.mxu0 %v8975_v0 }
 0xc66   :  { %v7005_v34 = vpop.f32.mrb[124].mxu0 }
 0xc67   :  { %v7006_v46 = vadd.f32 %v7753_v33, %v7005_v34  ;;  %v8344_v35 = vpop.f32.mrb[125].mxu0 }
 0xc68   :  { %v7008_v36 = vpop.f32.mrb[126].mxu0 }
 0xc69   :  { %v7011_v12 = vmax.f32 %v7006_v46, 0.0  ;;  %v8345_v6 = vpop.f32.mrb[127].mxu0 }
 0xc6b   :  { %v7017_v38 = vpack.c.bf16 %v7011_v12, %v7011_v12 }
 0xc6d   :  { %8353 = vmatmul.mubr.msk.bf16.vlgmr.msra.gmra.mrb[128].mxu0 %vm1996_vm10, %v7017_v38 }
 0xc6e   :  { %8357 = vmatpush3.bf16.msra.mxu0 %v8966_v37  ;;  %8360 = vmatprep.mubr.msk.bf16.mxu0 %vm8976_vm0, %v8975_v0 }
 0xc6f   :  { %8358 = vmatprep.subr.bf16.mxu0 %v8975_v0  ;;  %v7763_v0 = vld [vmem:[%s11206_s3 + $0x42] ss:$0 sm:$0xff] }
 0xc72   :  { %8359 = vmatpush3.bf16.msra.mxu0 %v8967_v39 }
 0xc75   :  { %8361 = vmatmul.mubr.msk.bf16.vlgmr.msra.gmra.mrb[132].mxu0 %vm1851_vm11, %v7092_v14 }
 0xd40   :  { %v7080_v44 = vpop.f32.mrb[128].mxu0 }
 0xd41   :  { %v7081_v2 = vadd.f32 %v7758_v43, %v7080_v44  ;;  %v8354_v50 = vpop.f32.mrb[129].mxu0 }
 0xd42   :  { %v7083_v51 = vpop.f32.mrb[130].mxu0 }
 0xd43   :  { %7086 = vst.msk [vmem:[%s11211_s13 + $0x8] sm:$0xff] %vm1923_vm7, %v7081_v2  ;;  %v8355_v58 = vpop.f32.mrb[131].mxu0 }
 0xd48   :  { %v7149_v52 = vpop.f32.mrb[132].mxu0 }
 0xd49   :  { %v7150_v53 = vadd.f32 %v7763_v0, %v7149_v52  ;;  %v8362_v54 = vpop.f32.mrb[133].mxu0 }
 0xd4a   :  { %v7152_v55 = vpop.f32.mrb[134].mxu0 }
 0xd4b   :  { %7156 = vst.msk [vmem:[%s11211_s13 + $0x10] sm:$0xff] %vm7155_vm12, %v7150_v53  ;;  %v8363_v56 = vpop.f32.mrb[135].mxu0 }

</bundles_post_ra>
